<compile_context>
chip_gen: v5e
topology: v5e:2x2
jax: 0.10.0
libtpu: 0.0.40
codegen_flags: <defaults>
</compile_context>

<pallas_src>
import functools

import jax
import jax.numpy as jnp
from jax.experimental import pallas as pl
from jax.experimental.pallas import tpu as pltpu


def _round_up(v, m):
    return (v + m - 1) // m * m


def _interior_mask(bt_l, hp, wp, h, w, bt, n_valid):
    """(1, bt_l) f32 mask: 1.0 on interior pixels of real images, else 0.0.

    Generated in-kernel from an iota (no HBM mask stream, no resident VMEM
    plane).  Row/col are recovered with exact f32 floor-division: indices stay
    far below 2^24 and the 0.5/Wp margin dwarfs f32 rounding error, so no
    vector integer div/mod is needed.
    """
    idx = jax.lax.broadcasted_iota(jnp.int32, (1, bt_l), 1).astype(jnp.float32)
    row_g = jnp.floor((idx + 0.5) / wp)          # row within the Bt*Hp stack
    col = idx - row_g * wp
    img = jnp.floor((row_g + 0.5) / hp)          # image index within this step
    row = row_g - img * hp                       # row within the padded image
    img_global = img + (pl.program_id(0) * bt).astype(jnp.float32)
    valid = ((row >= 1.0) & (row <= h) & (col >= 1.0) & (col <= w)
             & (img_global < n_valid))           # exclude batch-padding images
    return valid.astype(jnp.float32)


def _conv3x3(x_f32, w_ref, b_f32, wp):
    """3x3 same-padding conv on padded-flat planes: three K=3*Cin MXU matmuls.

    x_f32 : (Cin, Bt*L) f32, zero outside each image's valid interior.
    w_ref : VMEM ref (3, Cout, 3*Cin) bf16, layout (ky, cout, kx*Cin + cin).
    b_f32 : (Cout, 1) f32 bias.
    Returns (Cout, Bt*L) f32; halo / padded-image positions hold garbage that
    the caller masks (or crops).
    """
    bt_l = x_f32.shape[-1]
    acc = None
    for iy, dy in enumerate((-1, 0, 1)):
        srow = dy * wp
        # Row shift computed once and reused by the three kx taps; with Wp a
        # multiple of 128 at real widths this is a whole-vreg move and only
        # the +-1 taps rotate lanes.
        row_plane = (x_f32 if srow == 0
                     else pltpu.roll(x_f32, shift=(-srow) % bt_l, axis=1))
        taps = [row_plane if dx == 0
                else pltpu.roll(row_plane, shift=(-dx) % bt_l, axis=1)
                for dx in (-1, 0, 1)]
        im2col = jnp.concatenate(taps, axis=0).astype(jnp.bfloat16)  # (3*Cin, Bt*L)
        part = jnp.dot(w_ref[iy], im2col, preferred_element_type=jnp.float32)
        acc = part if acc is None else acc + part
    return acc + b_f32


def _activation(x, act_name):
    if act_name == 'mish':
        # numerically stable softplus: max(x,0) + log1p(exp(-|x|))   (f32 EUP/VPU)
        sp = jnp.maximum(x, 0.0) + jnp.log1p(jnp.exp(-jnp.abs(x)))
        return x * jnp.tanh(sp)
    if act_name == 'lelu':
        return jnp.where(x >= 0, x, 0.01 * x)   # nn.LeakyReLU default slope
    return jnp.maximum(x, 0.0)                  # module's default branch: ReLU


def _kernel_a(x_ref, w1_ref, b1_ref, w2_ref, b2_ref, a2_ref, stats_ref, *,
              wp, hp, h, w, bt, n_valid, cb_p):
    """conv_1 + conv_2.conv for one batch-group; also per-channel sum / sumsq."""
    bt_l = x_ref.shape[-1]
    mask = _interior_mask(bt_l, hp, wp, h, w, bt, n_valid)        # (1, Bt*L)
    a1 = _conv3x3(x_ref[...], w1_ref, b1_ref[...], wp) * mask     # (Cb, Bt*L)
    a2 = _conv3x3(a1, w2_ref, b2_ref[...], wp) * mask             # (Cb, Bt*L)
    a2_ref[...] = a2.astype(jnp.bfloat16)        # bf16 round trip to kernel B
    # BN statistics taken from the f32 values (one-pass sum / sum-of-squares).
    # TODO(synk): E[x^2]-E[x]^2 can cancel for large-mean activations; switch
    # to a centered second pass if this ever feeds training.
    s = jnp.sum(a2, axis=1, keepdims=True)                        # (Cb, 1)
    sq = jnp.sum(a2 * a2, axis=1, keepdims=True)                  # (Cb, 1)
    # Lane-broadcast so the stats store is a full, unmasked vector store.
    stats_ref[0] = jnp.broadcast_to(jnp.concatenate([s, sq], axis=0),
                                    (2 * cb_p, 128))


def _kernel_b(x_ref, a2_ref, scale_ref, shift_ref, w3_ref, b3_ref, out_ref, *,
              wp, hp, h, w, bt, n_valid, act_name):
    """Folded BN affine + activation + conv_3 + residual add (in place)."""
    bt_l = x_ref.shape[-1]
    mask = _interior_mask(bt_l, hp, wp, h, w, bt, n_valid)
    y = a2_ref[...].astype(jnp.float32) * scale_ref[...] + shift_ref[...]
    y = _activation(y, act_name) * mask
    y3 = _conv3x3(y, w3_ref, b3_ref[...], wp)                     # (Cp, Bt*L)
    # No mask on y3: the halo / padding region of out is cropped in the
    # wrapper, so a post-conv mask would be dead VPU work.
    out_ref[...] = x_ref[...] + y3


def tlu_forward(x, params, act_name='relu', eps=1e-5):
    """x: (N, Cin, H, W) float32 NCHW (PyTorch layout). Returns (N, Cin, H, W)."""
    if act_name == 'pelu':
        # TODO(synk): nn.PReLU has a learnable slope; explicit error instead of
        # silently falling back to ReLU.
        raise NotImplementedError("act_name='pelu' (nn.PReLU) is not supported")

    N, Cin, H, W = x.shape
    Cb = params['gamma'].shape[0]

    # Channel dims padded to full sublane groups.  Wp rounds to 128 at real
    # widths (row shifts become whole-vreg moves) unless that wastes >25%;
    # Hp*Wp stays a multiple of 128 lanes either way.
    Cp = _round_up(max(Cin, 8), 8)
    Cbp = _round_up(max(Cb, 8), 8)
    wp128 = _round_up(W + 2, 128)
    Wp = wp128 if wp128 * 4 <= (W + 2) * 5 else _round_up(W + 2, 32)
    Hp = _round_up(H + 2, 4)
    L = Hp * Wp
    f32 = jnp.float32

    # Images per grid step: amortize per-step overhead on small planes while
    # keeping the per-step working set (x f32 + a2 bf16 + conv temporaries,
    # double-buffered) small versus v7x's 64 MiB VMEM.
    max_lane_elems = (4 << 20) // (4 * max(Cp, Cbp))
    bt = max(1, min(N, max_lane_elems // L))
    ng = -(-N // bt)
    n_pad = ng * bt
    bt_l = bt * L
    # TODO(synk): at real image sizes (bt == 1) add an H-tile grid axis with a
    # 1-row halo instead of whole-image lane blocks.

    # ---- wrapper glue: layout plumbing only (pad / transpose / reshape) ----
    x_pad = jnp.pad(x.astype(f32),
                    ((0, n_pad - N), (0, Cp - Cin),
                     (1, Hp - H - 1), (1, Wp - W - 1)))
    # (Np, Cp, Hp, Wp) -> (Cp, Np*L): channels on sublanes, batch*plane on lanes.
    x_flat = jnp.transpose(x_pad, (1, 0, 2, 3)).reshape(Cp, n_pad * L)

    def prep_w(wt, cin_p, cout_p):
        co, ci, _, _ = wt.shape
        wt = jnp.pad(wt, ((0, cout_p - co), (0, cin_p - ci), (0, 0), (0, 0)))
        # (cout, cin, ky, kx) -> (ky, cout, kx, cin) -> (3, cout_p, 3*cin_p) bf16
        return (jnp.transpose(wt, (2, 0, 3, 1))
                .reshape(3, cout_p, 3 * cin_p).astype(jnp.bfloat16))

    def prep_b(b, cout_p):
        return jnp.pad(b, (0, cout_p - b.shape[0])).reshape(cout_p, 1).astype(f32)

    w1 = prep_w(params['w1'], Cp, Cbp);   b1 = prep_b(params['b1'], Cbp)
    w2 = prep_w(params['w2'], Cbp, Cbp);  b2 = prep_b(params['b2'], Cbp)
    w3 = prep_w(params['w3'], Cbp, Cp);   b3 = prep_b(params['b3'], Cp)
    gamma = jnp.pad(params['gamma'].astype(f32), (0, Cbp - Cb))
    beta = jnp.pad(params['beta'].astype(f32), (0, Cbp - Cb))

    # Explicit VMEM budget derived from the actual tiles, clamped well under
    # v7x's 64 MiB physical VMEM (v5e/v6e have 128 MiB, so this is safe there).
    plane_in = Cp * bt_l * 4                 # x tile, f32
    plane_a2 = Cbp * bt_l * 2                # a2 tile, bf16
    temps = 8 * max(Cp, Cbp) * bt_l * 4      # rolls / im2col / conv outputs
    est = 3 * plane_in + 2 * plane_a2 + temps
    vmem_limit = int(min(max(2 * est, 16 << 20), 48 << 20))
    cparams = pltpu.CompilerParams(dimension_semantics=("parallel",),
                                   vmem_limit_bytes=vmem_limit)

    # ---- kernel A: conv_1 + conv_2.conv + per-group BN sums ----
    a2, stats = pl.pallas_call(
        functools.partial(_kernel_a, wp=Wp, hp=Hp, h=H, w=W, bt=bt,
                          n_valid=N, cb_p=Cbp),
        grid=(ng,),
        in_specs=[
            pl.BlockSpec((Cp, bt_l), lambda g: (0, g)),            # x (padded-flat)
            pl.BlockSpec((3, Cbp, 3 * Cp), lambda g: (0, 0, 0)),   # w1 (bf16)
            pl.BlockSpec((Cbp, 1), lambda g: (0, 0)),              # b1
            pl.BlockSpec((3, Cbp, 3 * Cbp), lambda g: (0, 0, 0)),  # w2 (bf16)
            pl.BlockSpec((Cbp, 1), lambda g: (0, 0)),              # b2
        ],
        out_specs=[
            pl.BlockSpec((Cbp, bt_l), lambda g: (0, g)),           # conv_2 out (bf16)
            pl.BlockSpec((1, 2 * Cbp, 128), lambda g: (g, 0, 0)),  # [sum; sumsq]
        ],
        out_shape=[
            jax.ShapeDtypeStruct((Cbp, n_pad * L), jnp.bfloat16),
            jax.ShapeDtypeStruct((ng, 2 * Cbp, 128), f32),
        ],
        compiler_params=cparams,
    )(x_flat, w1, b1, w2, b2)

    # ---- BatchNorm batch statistics (training mode: biased variance),
    #      folded into a per-channel affine (tiny (Cb,) glue math) ----
    cnt = float(N * H * W)
    mean = jnp.sum(stats[:, :Cbp, 0], axis=0) / cnt
    var = jnp.maximum(jnp.sum(stats[:, Cbp:, 0], axis=0) / cnt - mean * mean, 0.0)
    inv = gamma * jax.lax.rsqrt(var + eps)
    scale = inv.reshape(Cbp, 1)
    shift = (beta - mean * inv).reshape(Cbp, 1)

    # ---- kernel B: BN affine + activation + conv_3 + residual (in place) ----
    out_flat = pl.pallas_call(
        functools.partial(_kernel_b, wp=Wp, hp=Hp, h=H, w=W, bt=bt,
                          n_valid=N, act_name=act_name),
        grid=(ng,),
        in_specs=[
            pl.BlockSpec((Cp, bt_l), lambda g: (0, g)),            # x (residual)
            pl.BlockSpec((Cbp, bt_l), lambda g: (0, g)),           # conv_2 out (bf16)
            pl.BlockSpec((Cbp, 1), lambda g: (0, 0)),              # BN scale
            pl.BlockSpec((Cbp, 1), lambda g: (0, 0)),              # BN shift
            pl.BlockSpec((3, Cp, 3 * Cbp), lambda g: (0, 0, 0)),   # w3 (bf16)
            pl.BlockSpec((Cp, 1), lambda g: (0, 0)),               # b3
        ],
        out_specs=pl.BlockSpec((Cp, bt_l), lambda g: (0, g)),
        out_shape=jax.ShapeDtypeStruct((Cp, n_pad * L), f32),
        input_output_aliases={0: 0},      # residual written in place over x_flat
        compiler_params=cparams,
    )(x_flat, a2, scale, shift, w3, b3)

    # crop the halo / channel / batch padding back to NCHW
    out = out_flat.reshape(Cp, n_pad, Hp, Wp)
    return jnp.transpose(out, (1, 0, 2, 3))[:N, :Cin, 1:H + 1, 1:W + 1]


def init_params(key, in_c, basic_ch):
    """Deterministic synthetic parameters with PyTorch-compatible shapes."""
    k1, k2, k3, k4, k5, k6 = jax.random.split(key, 6)

    def conv_w(k, cout, cin):
        return 0.1 * jax.random.normal(k, (cout, cin, 3, 3), jnp.float32)

    def conv_b(k, cout):
        return 0.1 * jax.random.normal(k, (cout,), jnp.float32)

    return {
        'w1': conv_w(k1, basic_ch, in_c),     'b1': conv_b(k2, basic_ch),
        'w2': conv_w(k3, basic_ch, basic_ch), 'b2': conv_b(k4, basic_ch),
        'gamma': jnp.ones((basic_ch,), jnp.float32),
        'beta': jnp.zeros((basic_ch,), jnp.float32),
        'w3': conv_w(k5, in_c, basic_ch),     'b3': conv_b(k6, in_c),
    }


if __name__ == "__main__":
    # TLU(in_c=4, basic_ch=8, act_name='relu', asy=False, bias=True)
    in_c, basic_ch = 4, 8
    N, H, W = 2, 16, 16

    key = jax.random.PRNGKey(0)
    kx, kp = jax.random.split(key)
    x = jax.random.normal(kx, (N, in_c, H, W), jnp.float32)   # NCHW, like PyTorch
    params = init_params(kp, in_c, basic_ch)

    fwd = jax.jit(functools.partial(tlu_forward, act_name='relu'))
    out = fwd(x, params)
    jax.block_until_ready(out)
    assert out.shape == (N, in_c, H, W)
    print("KERNEL_OK")
</pallas_src>

<mosaic_0001>
module attributes {stable_mosaic.version = 11 : i64} {
  func.func @_kernel_a(%arg0: i32, %arg1: memref<8x1280xf32, #tpu.memory_space<vmem>>, %arg2: memref<3x8x24xbf16, #tpu.memory_space<vmem>>, %arg3: memref<8x1xf32, #tpu.memory_space<vmem>>, %arg4: memref<3x8x24xbf16, #tpu.memory_space<vmem>>, %arg5: memref<8x1xf32, #tpu.memory_space<vmem>>, %arg6: memref<8x1280xbf16, #tpu.memory_space<vmem>>, %arg7: memref<1x16x128xf32, #tpu.memory_space<vmem>>) attributes {dimension_semantics = [#tpu.dimension_semantics<parallel>], iteration_bounds = array<i64: 1>, scalar_prefetch = 0 : i64, scratch_operands = 0 : i64, tpu.core_type = #tpu.core_type<tc>, window_params = [{transform_indices = @transform_0, window_bounds = array<i64: 8, 1280>}, {pipeline_mode = #tpu.pipeline_mode<synchronous>, transform_indices = @transform_1, window_bounds = array<i64: 3, 8, 24>}, {pipeline_mode = #tpu.pipeline_mode<synchronous>, transform_indices = @transform_2, window_bounds = array<i64: 8, 1>}, {pipeline_mode = #tpu.pipeline_mode<synchronous>, transform_indices = @transform_3, window_bounds = array<i64: 3, 8, 24>}, {pipeline_mode = #tpu.pipeline_mode<synchronous>, transform_indices = @transform_4, window_bounds = array<i64: 8, 1>}, {transform_indices = @transform_5, window_bounds = array<i64: 8, 1280>}, {transform_indices = @transform_6, window_bounds = array<i64: 1, 16, 128>}]} {
    %0 = tpu.iota {dimensions = array<i32: 1>} : vector<1x1280xi32>
    %1 = arith.sitofp %0 : vector<1x1280xi32> to vector<1x1280xf32>
    %cst = arith.constant 5.000000e-01 : f32
    %2 = vector.broadcast %cst : f32 to vector<1x1280xf32>
    %3 = arith.addf %1, %2 : vector<1x1280xf32>
    %cst_0 = arith.constant 3.200000e+01 : f32
    %4 = vector.broadcast %cst_0 : f32 to vector<1x1280xf32>
    %5 = arith.divf %3, %4 : vector<1x1280xf32>
    %6 = math.floor %5 : vector<1x1280xf32>
    %cst_1 = arith.constant 3.200000e+01 : f32
    %7 = vector.broadcast %cst_1 : f32 to vector<1x1280xf32>
    %8 = arith.mulf %6, %7 : vector<1x1280xf32>
    %9 = arith.subf %1, %8 : vector<1x1280xf32>
    %cst_2 = arith.constant 5.000000e-01 : f32
    %10 = vector.broadcast %cst_2 : f32 to vector<1x1280xf32>
    %11 = arith.addf %6, %10 : vector<1x1280xf32>
    %cst_3 = arith.constant 2.000000e+01 : f32
    %12 = vector.broadcast %cst_3 : f32 to vector<1x1280xf32>
    %13 = arith.divf %11, %12 : vector<1x1280xf32>
    %14 = math.floor %13 : vector<1x1280xf32>
    %cst_4 = arith.constant 2.000000e+01 : f32
    %15 = vector.broadcast %cst_4 : f32 to vector<1x1280xf32>
    %16 = arith.mulf %14, %15 : vector<1x1280xf32>
    %17 = arith.subf %6, %16 : vector<1x1280xf32>
    %c2_i32 = arith.constant 2 : i32
    %18 = arith.muli %arg0, %c2_i32 : i32
    %19 = arith.sitofp %18 : i32 to f32
    %20 = vector.broadcast %19 : f32 to vector<1x1280xf32>
    %21 = arith.addf %14, %20 : vector<1x1280xf32>
    %cst_5 = arith.constant 1.000000e+00 : f32
    %22 = vector.broadcast %cst_5 : f32 to vector<1x1280xf32>
    %23 = arith.cmpf oge, %17, %22 : vector<1x1280xf32>
    %cst_6 = arith.constant 1.600000e+01 : f32
    %24 = vector.broadcast %cst_6 : f32 to vector<1x1280xf32>
    %25 = arith.cmpf ole, %17, %24 : vector<1x1280xf32>
    %26 = arith.andi %23, %25 : vector<1x1280xi1>
    %cst_7 = arith.constant 1.000000e+00 : f32
    %27 = vector.broadcast %cst_7 : f32 to vector<1x1280xf32>
    %28 = arith.cmpf oge, %9, %27 : vector<1x1280xf32>
    %29 = arith.andi %26, %28 : vector<1x1280xi1>
    %cst_8 = arith.constant 1.600000e+01 : f32
    %30 = vector.broadcast %cst_8 : f32 to vector<1x1280xf32>
    %31 = arith.cmpf ole, %9, %30 : vector<1x1280xf32>
    %32 = arith.andi %29, %31 : vector<1x1280xi1>
    %cst_9 = arith.constant 2.000000e+00 : f32
    %33 = vector.broadcast %cst_9 : f32 to vector<1x1280xf32>
    %34 = arith.cmpf olt, %21, %33 : vector<1x1280xf32>
    %35 = arith.andi %32, %34 : vector<1x1280xi1>
    %36 = arith.extui %35 : vector<1x1280xi1> to vector<1x1280xi32>
    %37 = arith.sitofp %36 : vector<1x1280xi32> to vector<1x1280xf32>
    %c0 = arith.constant 0 : index
    %c0_10 = arith.constant 0 : index
    %38 = vector.load %arg1[%c0, %c0_10] : memref<8x1280xf32, #tpu.memory_space<vmem>>, vector<8x1280xf32>
    %c0_11 = arith.constant 0 : index
    %c0_12 = arith.constant 0 : index
    %39 = vector.load %arg3[%c0_11, %c0_12] : memref<8x1xf32, #tpu.memory_space<vmem>>, vector<8x1xf32>
    %c32_i32 = arith.constant 32 : i32
    %40 = tpu.dynamic_rotate %38 by %c32_i32 dim 1 : vector<8x1280xf32>, i32 -> vector<8x1280xf32>
    %c1_i32 = arith.constant 1 : i32
    %41 = tpu.dynamic_rotate %40 by %c1_i32 dim 1 : vector<8x1280xf32>, i32 -> vector<8x1280xf32>
    %c1279_i32 = arith.constant 1279 : i32
    %42 = tpu.dynamic_rotate %40 by %c1279_i32 dim 1 : vector<8x1280xf32>, i32 -> vector<8x1280xf32>
    %43 = tpu.concatenate %41, %40, %42 in 0 : vector<8x1280xf32>, vector<8x1280xf32>, vector<8x1280xf32> -> vector<24x1280xf32>
    %44 = arith.truncf %43 : vector<24x1280xf32> to vector<24x1280xbf16>
    %c0_13 = arith.constant 0 : index
    %c0_14 = arith.constant 0 : index
    %c0_15 = arith.constant 0 : index
    %45 = vector.load %arg2[%c0_13, %c0_14, %c0_15] : memref<3x8x24xbf16, #tpu.memory_space<vmem>>, vector<1x8x24xbf16>
    %46 = vector.shape_cast %45 : vector<1x8x24xbf16> to vector<8x24xbf16>
    %cst_16 = arith.constant dense<0.000000e+00> : vector<8x1280xf32>
    %47 = tpu.matmul %46, %44, %cst_16 {dimension_numbers = #tpu.dot_dimension_numbers<[1], [0], [0], [1], [0, 0, 1, 1], [], []>} : vector<8x24xbf16>, vector<24x1280xbf16>, vector<8x1280xf32> -> vector<8x1280xf32>
    %c1_i32_17 = arith.constant 1 : i32
    %48 = tpu.dynamic_rotate %38 by %c1_i32_17 dim 1 : vector<8x1280xf32>, i32 -> vector<8x1280xf32>
    %c1279_i32_18 = arith.constant 1279 : i32
    %49 = tpu.dynamic_rotate %38 by %c1279_i32_18 dim 1 : vector<8x1280xf32>, i32 -> vector<8x1280xf32>
    %50 = tpu.concatenate %48, %38, %49 in 0 : vector<8x1280xf32>, vector<8x1280xf32>, vector<8x1280xf32> -> vector<24x1280xf32>
    %51 = arith.truncf %50 : vector<24x1280xf32> to vector<24x1280xbf16>
    %c1 = arith.constant 1 : index
    %c0_19 = arith.constant 0 : index
    %c0_20 = arith.constant 0 : index
    %52 = vector.load %arg2[%c1, %c0_19, %c0_20] : memref<3x8x24xbf16, #tpu.memory_space<vmem>>, vector<1x8x24xbf16>
    %53 = vector.shape_cast %52 : vector<1x8x24xbf16> to vector<8x24xbf16>
    %cst_21 = arith.constant dense<0.000000e+00> : vector<8x1280xf32>
    %54 = tpu.matmul %53, %51, %cst_21 {dimension_numbers = #tpu.dot_dimension_numbers<[1], [0], [0], [1], [0, 0, 1, 1], [], []>} : vector<8x24xbf16>, vector<24x1280xbf16>, vector<8x1280xf32> -> vector<8x1280xf32>
    %55 = arith.addf %47, %54 : vector<8x1280xf32>
    %c1248_i32 = arith.constant 1248 : i32
    %56 = tpu.dynamic_rotate %38 by %c1248_i32 dim 1 : vector<8x1280xf32>, i32 -> vector<8x1280xf32>
    %c1_i32_22 = arith.constant 1 : i32
    %57 = tpu.dynamic_rotate %56 by %c1_i32_22 dim 1 : vector<8x1280xf32>, i32 -> vector<8x1280xf32>
    %c1279_i32_23 = arith.constant 1279 : i32
    %58 = tpu.dynamic_rotate %56 by %c1279_i32_23 dim 1 : vector<8x1280xf32>, i32 -> vector<8x1280xf32>
    %59 = tpu.concatenate %57, %56, %58 in 0 : vector<8x1280xf32>, vector<8x1280xf32>, vector<8x1280xf32> -> vector<24x1280xf32>
    %60 = arith.truncf %59 : vector<24x1280xf32> to vector<24x1280xbf16>
    %c2 = arith.constant 2 : index
    %c0_24 = arith.constant 0 : index
    %c0_25 = arith.constant 0 : index
    %61 = vector.load %arg2[%c2, %c0_24, %c0_25] : memref<3x8x24xbf16, #tpu.memory_space<vmem>>, vector<1x8x24xbf16>
    %62 = vector.shape_cast %61 : vector<1x8x24xbf16> to vector<8x24xbf16>
    %cst_26 = arith.constant dense<0.000000e+00> : vector<8x1280xf32>
    %63 = tpu.matmul %62, %60, %cst_26 {dimension_numbers = #tpu.dot_dimension_numbers<[1], [0], [0], [1], [0, 0, 1, 1], [], []>} : vector<8x24xbf16>, vector<24x1280xbf16>, vector<8x1280xf32> -> vector<8x1280xf32>
    %64 = arith.addf %55, %63 : vector<8x1280xf32>
    %65 = vector.broadcast %39 : vector<8x1xf32> to vector<8x1280xf32>
    %66 = arith.addf %64, %65 : vector<8x1280xf32>
    %67 = vector.broadcast %37 : vector<1x1280xf32> to vector<8x1280xf32>
    %68 = arith.mulf %66, %67 : vector<8x1280xf32>
    %c0_27 = arith.constant 0 : index
    %c0_28 = arith.constant 0 : index
    %69 = vector.load %arg5[%c0_27, %c0_28] : memref<8x1xf32, #tpu.memory_space<vmem>>, vector<8x1xf32>
    %c32_i32_29 = arith.constant 32 : i32
    %70 = tpu.dynamic_rotate %68 by %c32_i32_29 dim 1 : vector<8x1280xf32>, i32 -> vector<8x1280xf32>
    %c1_i32_30 = arith.constant 1 : i32
    %71 = tpu.dynamic_rotate %70 by %c1_i32_30 dim 1 : vector<8x1280xf32>, i32 -> vector<8x1280xf32>
    %c1279_i32_31 = arith.constant 1279 : i32
    %72 = tpu.dynamic_rotate %70 by %c1279_i32_31 dim 1 : vector<8x1280xf32>, i32 -> vector<8x1280xf32>
    %73 = tpu.concatenate %71, %70, %72 in 0 : vector<8x1280xf32>, vector<8x1280xf32>, vector<8x1280xf32> -> vector<24x1280xf32>
    %74 = arith.truncf %73 : vector<24x1280xf32> to vector<24x1280xbf16>
    %c0_32 = arith.constant 0 : index
    %c0_33 = arith.constant 0 : index
    %c0_34 = arith.constant 0 : index
    %75 = vector.load %arg4[%c0_32, %c0_33, %c0_34] : memref<3x8x24xbf16, #tpu.memory_space<vmem>>, vector<1x8x24xbf16>
    %76 = vector.shape_cast %75 : vector<1x8x24xbf16> to vector<8x24xbf16>
    %cst_35 = arith.constant dense<0.000000e+00> : vector<8x1280xf32>
    %77 = tpu.matmul %76, %74, %cst_35 {dimension_numbers = #tpu.dot_dimension_numbers<[1], [0], [0], [1], [0, 0, 1, 1], [], []>} : vector<8x24xbf16>, vector<24x1280xbf16>, vector<8x1280xf32> -> vector<8x1280xf32>
    %c1_i32_36 = arith.constant 1 : i32
    %78 = tpu.dynamic_rotate %68 by %c1_i32_36 dim 1 : vector<8x1280xf32>, i32 -> vector<8x1280xf32>
    %c1279_i32_37 = arith.constant 1279 : i32
    %79 = tpu.dynamic_rotate %68 by %c1279_i32_37 dim 1 : vector<8x1280xf32>, i32 -> vector<8x1280xf32>
    %80 = tpu.concatenate %78, %68, %79 in 0 : vector<8x1280xf32>, vector<8x1280xf32>, vector<8x1280xf32> -> vector<24x1280xf32>
    %81 = arith.truncf %80 : vector<24x1280xf32> to vector<24x1280xbf16>
    %c1_38 = arith.constant 1 : index
    %c0_39 = arith.constant 0 : index
    %c0_40 = arith.constant 0 : index
    %82 = vector.load %arg4[%c1_38, %c0_39, %c0_40] : memref<3x8x24xbf16, #tpu.memory_space<vmem>>, vector<1x8x24xbf16>
    %83 = vector.shape_cast %82 : vector<1x8x24xbf16> to vector<8x24xbf16>
    %cst_41 = arith.constant dense<0.000000e+00> : vector<8x1280xf32>
    %84 = tpu.matmul %83, %81, %cst_41 {dimension_numbers = #tpu.dot_dimension_numbers<[1], [0], [0], [1], [0, 0, 1, 1], [], []>} : vector<8x24xbf16>, vector<24x1280xbf16>, vector<8x1280xf32> -> vector<8x1280xf32>
    %85 = arith.addf %77, %84 : vector<8x1280xf32>
    %c1248_i32_42 = arith.constant 1248 : i32
    %86 = tpu.dynamic_rotate %68 by %c1248_i32_42 dim 1 : vector<8x1280xf32>, i32 -> vector<8x1280xf32>
    %c1_i32_43 = arith.constant 1 : i32
    %87 = tpu.dynamic_rotate %86 by %c1_i32_43 dim 1 : vector<8x1280xf32>, i32 -> vector<8x1280xf32>
    %c1279_i32_44 = arith.constant 1279 : i32
    %88 = tpu.dynamic_rotate %86 by %c1279_i32_44 dim 1 : vector<8x1280xf32>, i32 -> vector<8x1280xf32>
    %89 = tpu.concatenate %87, %86, %88 in 0 : vector<8x1280xf32>, vector<8x1280xf32>, vector<8x1280xf32> -> vector<24x1280xf32>
    %90 = arith.truncf %89 : vector<24x1280xf32> to vector<24x1280xbf16>
    %c2_45 = arith.constant 2 : index
    %c0_46 = arith.constant 0 : index
    %c0_47 = arith.constant 0 : index
    %91 = vector.load %arg4[%c2_45, %c0_46, %c0_47] : memref<3x8x24xbf16, #tpu.memory_space<vmem>>, vector<1x8x24xbf16>
    %92 = vector.shape_cast %91 : vector<1x8x24xbf16> to vector<8x24xbf16>
    %cst_48 = arith.constant dense<0.000000e+00> : vector<8x1280xf32>
    %93 = tpu.matmul %92, %90, %cst_48 {dimension_numbers = #tpu.dot_dimension_numbers<[1], [0], [0], [1], [0, 0, 1, 1], [], []>} : vector<8x24xbf16>, vector<24x1280xbf16>, vector<8x1280xf32> -> vector<8x1280xf32>
    %94 = arith.addf %85, %93 : vector<8x1280xf32>
    %95 = vector.broadcast %69 : vector<8x1xf32> to vector<8x1280xf32>
    %96 = arith.addf %94, %95 : vector<8x1280xf32>
    %97 = vector.broadcast %37 : vector<1x1280xf32> to vector<8x1280xf32>
    %98 = arith.mulf %96, %97 : vector<8x1280xf32>
    %99 = arith.truncf %98 : vector<8x1280xf32> to vector<8x1280xbf16>
    %c0_49 = arith.constant 0 : index
    %c0_50 = arith.constant 0 : index
    %100 = vector.load %arg6[%c0_49, %c0_50] : memref<8x1280xbf16, #tpu.memory_space<vmem>>, vector<8x1280xbf16>
    tpu.vector_store %arg6[%c0_49, %c0_50], %99 {strides = array<i32>} : memref<8x1280xbf16, #tpu.memory_space<vmem>>, vector<8x1280xbf16>,
    %cst_51 = arith.constant dense<0.000000e+00> : vector<8xf32>
    %101 = vector.multi_reduction <add>, %98, %cst_51 [1] : vector<8x1280xf32> to vector<8xf32>
    %102 = vector.shape_cast %101 : vector<8xf32> to vector<8x1xf32>
    %103 = arith.mulf %98, %98 : vector<8x1280xf32>
    %cst_52 = arith.constant dense<0.000000e+00> : vector<8xf32>
    %104 = vector.multi_reduction <add>, %103, %cst_52 [1] : vector<8x1280xf32> to vector<8xf32>
    %105 = vector.shape_cast %104 : vector<8xf32> to vector<8x1xf32>
    %106 = tpu.concatenate %102, %105 in 0 : vector<8x1xf32>, vector<8x1xf32> -> vector<16x1xf32>
    %107 = vector.shape_cast %106 : vector<16x1xf32> to vector<16x1xf32>
    %108 = vector.broadcast %107 : vector<16x1xf32> to vector<16x128xf32>
    %c0_53 = arith.constant 0 : index
    %c0_54 = arith.constant 0 : index
    %c0_55 = arith.constant 0 : index
    %109 = vector.load %arg7[%c0_53, %c0_54, %c0_55] : memref<1x16x128xf32, #tpu.memory_space<vmem>>, vector<1x16x128xf32>
    %110 = vector.shape_cast %109 : vector<1x16x128xf32> to vector<16x128xf32>
    %111 = vector.shape_cast %108 : vector<16x128xf32> to vector<1x16x128xf32>
    tpu.vector_store %arg7[%c0_53, %c0_54, %c0_55], %111 {strides = array<i32>} : memref<1x16x128xf32, #tpu.memory_space<vmem>>, vector<1x16x128xf32>,
    return
  }
  func.func @transform_0(%arg0: i32) -> (i32, i32) {
    %c0_i32 = arith.constant 0 : i32
    %c0_i32_0 = arith.constant 0 : i32
    return %c0_i32, %arg0 : i32, i32
  }
  func.func @transform_1(%arg0: i32) -> (i32, i32, i32) {
    %c0_i32 = arith.constant 0 : i32
    %c0_i32_0 = arith.constant 0 : i32
    %c0_i32_1 = arith.constant 0 : i32
    %c0_i32_2 = arith.constant 0 : i32
    return %c0_i32, %c0_i32_0, %c0_i32_1 : i32, i32, i32
  }
  func.func @transform_2(%arg0: i32) -> (i32, i32) {
    %c0_i32 = arith.constant 0 : i32
    %c0_i32_0 = arith.constant 0 : i32
    %c0_i32_1 = arith.constant 0 : i32
    return %c0_i32, %c0_i32_0 : i32, i32
  }
  func.func @transform_3(%arg0: i32) -> (i32, i32, i32) {
    %c0_i32 = arith.constant 0 : i32
    %c0_i32_0 = arith.constant 0 : i32
    %c0_i32_1 = arith.constant 0 : i32
    %c0_i32_2 = arith.constant 0 : i32
    return %c0_i32, %c0_i32_0, %c0_i32_1 : i32, i32, i32
  }
  func.func @transform_4(%arg0: i32) -> (i32, i32) {
    %c0_i32 = arith.constant 0 : i32
    %c0_i32_0 = arith.constant 0 : i32
    %c0_i32_1 = arith.constant 0 : i32
    return %c0_i32, %c0_i32_0 : i32, i32
  }
  func.func @transform_5(%arg0: i32) -> (i32, i32) {
    %c0_i32 = arith.constant 0 : i32
    %c0_i32_0 = arith.constant 0 : i32
    return %c0_i32, %arg0 : i32, i32
  }
  func.func @transform_6(%arg0: i32) -> (i32, i32, i32) {
    %c0_i32 = arith.constant 0 : i32
    %c0_i32_0 = arith.constant 0 : i32
    %c0_i32_1 = arith.constant 0 : i32
    return %arg0, %c0_i32, %c0_i32_0 : i32, i32, i32
  }
}

module attributes {stable_mosaic.version = 11 : i64} {
  func.func @_kernel_b(%arg0: i32, %arg1: memref<8x1280xf32, #tpu.memory_space<vmem>>, %arg2: memref<8x1280xbf16, #tpu.memory_space<vmem>>, %arg3: memref<8x1xf32, #tpu.memory_space<vmem>>, %arg4: memref<8x1xf32, #tpu.memory_space<vmem>>, %arg5: memref<3x8x24xbf16, #tpu.memory_space<vmem>>, %arg6: memref<8x1xf32, #tpu.memory_space<vmem>>, %arg7: memref<8x1280xf32, #tpu.memory_space<vmem>>) attributes {dimension_semantics = [#tpu.dimension_semantics<parallel>], iteration_bounds = array<i64: 1>, scalar_prefetch = 0 : i64, scratch_operands = 0 : i64, tpu.core_type = #tpu.core_type<tc>, window_params = [{transform_indices = @transform_0, window_bounds = array<i64: 8, 1280>}, {transform_indices = @transform_1, window_bounds = array<i64: 8, 1280>}, {pipeline_mode = #tpu.pipeline_mode<synchronous>, transform_indices = @transform_2, window_bounds = array<i64: 8, 1>}, {pipeline_mode = #tpu.pipeline_mode<synchronous>, transform_indices = @transform_3, window_bounds = array<i64: 8, 1>}, {pipeline_mode = #tpu.pipeline_mode<synchronous>, transform_indices = @transform_4, window_bounds = array<i64: 3, 8, 24>}, {pipeline_mode = #tpu.pipeline_mode<synchronous>, transform_indices = @transform_5, window_bounds = array<i64: 8, 1>}, {transform_indices = @transform_6, window_bounds = array<i64: 8, 1280>}]} {
    %0 = tpu.iota {dimensions = array<i32: 1>} : vector<1x1280xi32>
    %1 = arith.sitofp %0 : vector<1x1280xi32> to vector<1x1280xf32>
    %cst = arith.constant 5.000000e-01 : f32
    %2 = vector.broadcast %cst : f32 to vector<1x1280xf32>
    %3 = arith.addf %1, %2 : vector<1x1280xf32>
    %cst_0 = arith.constant 3.200000e+01 : f32
    %4 = vector.broadcast %cst_0 : f32 to vector<1x1280xf32>
    %5 = arith.divf %3, %4 : vector<1x1280xf32>
    %6 = math.floor %5 : vector<1x1280xf32>
    %cst_1 = arith.constant 3.200000e+01 : f32
    %7 = vector.broadcast %cst_1 : f32 to vector<1x1280xf32>
    %8 = arith.mulf %6, %7 : vector<1x1280xf32>
    %9 = arith.subf %1, %8 : vector<1x1280xf32>
    %cst_2 = arith.constant 5.000000e-01 : f32
    %10 = vector.broadcast %cst_2 : f32 to vector<1x1280xf32>
    %11 = arith.addf %6, %10 : vector<1x1280xf32>
    %cst_3 = arith.constant 2.000000e+01 : f32
    %12 = vector.broadcast %cst_3 : f32 to vector<1x1280xf32>
    %13 = arith.divf %11, %12 : vector<1x1280xf32>
    %14 = math.floor %13 : vector<1x1280xf32>
    %cst_4 = arith.constant 2.000000e+01 : f32
    %15 = vector.broadcast %cst_4 : f32 to vector<1x1280xf32>
    %16 = arith.mulf %14, %15 : vector<1x1280xf32>
    %17 = arith.subf %6, %16 : vector<1x1280xf32>
    %c2_i32 = arith.constant 2 : i32
    %18 = arith.muli %arg0, %c2_i32 : i32
    %19 = arith.sitofp %18 : i32 to f32
    %20 = vector.broadcast %19 : f32 to vector<1x1280xf32>
    %21 = arith.addf %14, %20 : vector<1x1280xf32>
    %cst_5 = arith.constant 1.000000e+00 : f32
    %22 = vector.broadcast %cst_5 : f32 to vector<1x1280xf32>
    %23 = arith.cmpf oge, %17, %22 : vector<1x1280xf32>
    %cst_6 = arith.constant 1.600000e+01 : f32
    %24 = vector.broadcast %cst_6 : f32 to vector<1x1280xf32>
    %25 = arith.cmpf ole, %17, %24 : vector<1x1280xf32>
    %26 = arith.andi %23, %25 : vector<1x1280xi1>
    %cst_7 = arith.constant 1.000000e+00 : f32
    %27 = vector.broadcast %cst_7 : f32 to vector<1x1280xf32>
    %28 = arith.cmpf oge, %9, %27 : vector<1x1280xf32>
    %29 = arith.andi %26, %28 : vector<1x1280xi1>
    %cst_8 = arith.constant 1.600000e+01 : f32
    %30 = vector.broadcast %cst_8 : f32 to vector<1x1280xf32>
    %31 = arith.cmpf ole, %9, %30 : vector<1x1280xf32>
    %32 = arith.andi %29, %31 : vector<1x1280xi1>
    %cst_9 = arith.constant 2.000000e+00 : f32
    %33 = vector.broadcast %cst_9 : f32 to vector<1x1280xf32>
    %34 = arith.cmpf olt, %21, %33 : vector<1x1280xf32>
    %35 = arith.andi %32, %34 : vector<1x1280xi1>
    %36 = arith.extui %35 : vector<1x1280xi1> to vector<1x1280xi32>
    %37 = arith.sitofp %36 : vector<1x1280xi32> to vector<1x1280xf32>
    %c0 = arith.constant 0 : index
    %c0_10 = arith.constant 0 : index
    %38 = vector.load %arg2[%c0, %c0_10] : memref<8x1280xbf16, #tpu.memory_space<vmem>>, vector<8x1280xbf16>
    %39 = arith.extf %38 : vector<8x1280xbf16> to vector<8x1280xf32>
    %c0_11 = arith.constant 0 : index
    %c0_12 = arith.constant 0 : index
    %40 = vector.load %arg3[%c0_11, %c0_12] : memref<8x1xf32, #tpu.memory_space<vmem>>, vector<8x1xf32>
    %41 = vector.broadcast %40 : vector<8x1xf32> to vector<8x1280xf32>
    %42 = arith.mulf %39, %41 : vector<8x1280xf32>
    %c0_13 = arith.constant 0 : index
    %c0_14 = arith.constant 0 : index
    %43 = vector.load %arg4[%c0_13, %c0_14] : memref<8x1xf32, #tpu.memory_space<vmem>>, vector<8x1xf32>
    %44 = vector.broadcast %43 : vector<8x1xf32> to vector<8x1280xf32>
    %45 = arith.addf %42, %44 : vector<8x1280xf32>
    %cst_15 = arith.constant 0.000000e+00 : f32
    %46 = vector.broadcast %cst_15 : f32 to vector<8x1280xf32>
    %47 = arith.maximumf %45, %46 : vector<8x1280xf32>
    %48 = vector.broadcast %37 : vector<1x1280xf32> to vector<8x1280xf32>
    %49 = arith.mulf %47, %48 : vector<8x1280xf32>
    %c0_16 = arith.constant 0 : index
    %c0_17 = arith.constant 0 : index
    %50 = vector.load %arg6[%c0_16, %c0_17] : memref<8x1xf32, #tpu.memory_space<vmem>>, vector<8x1xf32>
    %c32_i32 = arith.constant 32 : i32
    %51 = tpu.dynamic_rotate %49 by %c32_i32 dim 1 : vector<8x1280xf32>, i32 -> vector<8x1280xf32>
    %c1_i32 = arith.constant 1 : i32
    %52 = tpu.dynamic_rotate %51 by %c1_i32 dim 1 : vector<8x1280xf32>, i32 -> vector<8x1280xf32>
    %c1279_i32 = arith.constant 1279 : i32
    %53 = tpu.dynamic_rotate %51 by %c1279_i32 dim 1 : vector<8x1280xf32>, i32 -> vector<8x1280xf32>
    %54 = tpu.concatenate %52, %51, %53 in 0 : vector<8x1280xf32>, vector<8x1280xf32>, vector<8x1280xf32> -> vector<24x1280xf32>
    %55 = arith.truncf %54 : vector<24x1280xf32> to vector<24x1280xbf16>
    %c0_18 = arith.constant 0 : index
    %c0_19 = arith.constant 0 : index
    %c0_20 = arith.constant 0 : index
    %56 = vector.load %arg5[%c0_18, %c0_19, %c0_20] : memref<3x8x24xbf16, #tpu.memory_space<vmem>>, vector<1x8x24xbf16>
    %57 = vector.shape_cast %56 : vector<1x8x24xbf16> to vector<8x24xbf16>
    %cst_21 = arith.constant dense<0.000000e+00> : vector<8x1280xf32>
    %58 = tpu.matmul %57, %55, %cst_21 {dimension_numbers = #tpu.dot_dimension_numbers<[1], [0], [0], [1], [0, 0, 1, 1], [], []>} : vector<8x24xbf16>, vector<24x1280xbf16>, vector<8x1280xf32> -> vector<8x1280xf32>
    %c1_i32_22 = arith.constant 1 : i32
    %59 = tpu.dynamic_rotate %49 by %c1_i32_22 dim 1 : vector<8x1280xf32>, i32 -> vector<8x1280xf32>
    %c1279_i32_23 = arith.constant 1279 : i32
    %60 = tpu.dynamic_rotate %49 by %c1279_i32_23 dim 1 : vector<8x1280xf32>, i32 -> vector<8x1280xf32>
    %61 = tpu.concatenate %59, %49, %60 in 0 : vector<8x1280xf32>, vector<8x1280xf32>, vector<8x1280xf32> -> vector<24x1280xf32>
    %62 = arith.truncf %61 : vector<24x1280xf32> to vector<24x1280xbf16>
    %c1 = arith.constant 1 : index
    %c0_24 = arith.constant 0 : index
    %c0_25 = arith.constant 0 : index
    %63 = vector.load %arg5[%c1, %c0_24, %c0_25] : memref<3x8x24xbf16, #tpu.memory_space<vmem>>, vector<1x8x24xbf16>
    %64 = vector.shape_cast %63 : vector<1x8x24xbf16> to vector<8x24xbf16>
    %cst_26 = arith.constant dense<0.000000e+00> : vector<8x1280xf32>
    %65 = tpu.matmul %64, %62, %cst_26 {dimension_numbers = #tpu.dot_dimension_numbers<[1], [0], [0], [1], [0, 0, 1, 1], [], []>} : vector<8x24xbf16>, vector<24x1280xbf16>, vector<8x1280xf32> -> vector<8x1280xf32>
    %66 = arith.addf %58, %65 : vector<8x1280xf32>
    %c1248_i32 = arith.constant 1248 : i32
    %67 = tpu.dynamic_rotate %49 by %c1248_i32 dim 1 : vector<8x1280xf32>, i32 -> vector<8x1280xf32>
    %c1_i32_27 = arith.constant 1 : i32
    %68 = tpu.dynamic_rotate %67 by %c1_i32_27 dim 1 : vector<8x1280xf32>, i32 -> vector<8x1280xf32>
    %c1279_i32_28 = arith.constant 1279 : i32
    %69 = tpu.dynamic_rotate %67 by %c1279_i32_28 dim 1 : vector<8x1280xf32>, i32 -> vector<8x1280xf32>
    %70 = tpu.concatenate %68, %67, %69 in 0 : vector<8x1280xf32>, vector<8x1280xf32>, vector<8x1280xf32> -> vector<24x1280xf32>
    %71 = arith.truncf %70 : vector<24x1280xf32> to vector<24x1280xbf16>
    %c2 = arith.constant 2 : index
    %c0_29 = arith.constant 0 : index
    %c0_30 = arith.constant 0 : index
    %72 = vector.load %arg5[%c2, %c0_29, %c0_30] : memref<3x8x24xbf16, #tpu.memory_space<vmem>>, vector<1x8x24xbf16>
    %73 = vector.shape_cast %72 : vector<1x8x24xbf16> to vector<8x24xbf16>
    %cst_31 = arith.constant dense<0.000000e+00> : vector<8x1280xf32>
    %74 = tpu.matmul %73, %71, %cst_31 {dimension_numbers = #tpu.dot_dimension_numbers<[1], [0], [0], [1], [0, 0, 1, 1], [], []>} : vector<8x24xbf16>, vector<24x1280xbf16>, vector<8x1280xf32> -> vector<8x1280xf32>
    %75 = arith.addf %66, %74 : vector<8x1280xf32>
    %76 = vector.broadcast %50 : vector<8x1xf32> to vector<8x1280xf32>
    %77 = arith.addf %75, %76 : vector<8x1280xf32>
    %c0_32 = arith.constant 0 : index
    %c0_33 = arith.constant 0 : index
    %78 = vector.load %arg1[%c0_32, %c0_33] : memref<8x1280xf32, #tpu.memory_space<vmem>>, vector<8x1280xf32>
    %79 = arith.addf %78, %77 : vector<8x1280xf32>
    %c0_34 = arith.constant 0 : index
    %c0_35 = arith.constant 0 : index
    %80 = vector.load %arg7[%c0_34, %c0_35] : memref<8x1280xf32, #tpu.memory_space<vmem>>, vector<8x1280xf32>
    tpu.vector_store %arg7[%c0_34, %c0_35], %79 {strides = array<i32>} : memref<8x1280xf32, #tpu.memory_space<vmem>>, vector<8x1280xf32>,
    return
  }
  func.func @transform_0(%arg0: i32) -> (i32, i32) {
    %c0_i32 = arith.constant 0 : i32
    %c0_i32_0 = arith.constant 0 : i32
    return %c0_i32, %arg0 : i32, i32
  }
  func.func @transform_1(%arg0: i32) -> (i32, i32) {
    %c0_i32 = arith.constant 0 : i32
    %c0_i32_0 = arith.constant 0 : i32
    return %c0_i32, %arg0 : i32, i32
  }
  func.func @transform_2(%arg0: i32) -> (i32, i32) {
    %c0_i32 = arith.constant 0 : i32
    %c0_i32_0 = arith.constant 0 : i32
    %c0_i32_1 = arith.constant 0 : i32
    return %c0_i32, %c0_i32_0 : i32, i32
  }
  func.func @transform_3(%arg0: i32) -> (i32, i32) {
    %c0_i32 = arith.constant 0 : i32
    %c0_i32_0 = arith.constant 0 : i32
    %c0_i32_1 = arith.constant 0 : i32
    return %c0_i32, %c0_i32_0 : i32, i32
  }
  func.func @transform_4(%arg0: i32) -> (i32, i32, i32) {
    %c0_i32 = arith.constant 0 : i32
    %c0_i32_0 = arith.constant 0 : i32
    %c0_i32_1 = arith.constant 0 : i32
    %c0_i32_2 = arith.constant 0 : i32
    return %c0_i32, %c0_i32_0, %c0_i32_1 : i32, i32, i32
  }
  func.func @transform_5(%arg0: i32) -> (i32, i32) {
    %c0_i32 = arith.constant 0 : i32
    %c0_i32_0 = arith.constant 0 : i32
    %c0_i32_1 = arith.constant 0 : i32
    return %c0_i32, %c0_i32_0 : i32, i32
  }
  func.func @transform_6(%arg0: i32) -> (i32, i32) {
    %c0_i32 = arith.constant 0 : i32
    %c0_i32_0 = arith.constant 0 : i32
    return %c0_i32, %arg0 : i32, i32
  }
}

</mosaic_0001>

<bundles_post_ra>
// kernel: tlu_forward.3
= control target key start
LH: loop header
LB: loop body
LE: loop exit
PB: predicated region body
PF: predicated region fallthrough
CT: control target
= control target key end

     0   :  { %v1455_v0 = vmov 0   ;;  %v1456_v3 = vmov 32.0   ;;  %v24_v5 = vlaneseq  ;;  %v1457_v6 = vmov 20.0   ;;  %s1460_s9 = smov 32   ;;  %s1461_s10 = smov 127   ;;  %s2675_s2 = inlined_call_operand.vmem [shape: f32[8,1], index: 2, kind: input, shape index: {}]   ;;  %s2676_s3 = inlined_call_operand.vmem [shape: f32[8,1], index: 3, kind: input, shape index: {}]   ;;  %s2677_s1 = inlined_call_operand.vmem [shape: bf16[8,1280], index: 1, kind: input, shape index: {}]   ;;  %s2678_s4 = inlined_call_operand.vmem [shape: bf16[3,8,24], index: 4, kind: input, shape index: {}]   ;;  %s2679_s5 = inlined_call_operand.vmem [shape: f32[8,1], index: 5, kind: input, shape index: {}]   ;;  %s2680_s0 = inlined_call_operand.vmem [shape: f32[8,1280], index: 0, kind: input, shape index: {}, may-alias: {0,6}]   ;;  %s2681_s6 = inlined_call_operand.vmem [shape: f32[8,1280], index: 6, kind: output, shape index: {}, may-alias: {0,6}]  }
   0x1   :  { %1259 = vset.pattern.permute.xlu0 %v1455_v0  ;;  %v297_v1 = vld [vmem:[%s2675_s2] sm:$0xff]  ;;  %1450 = vset.pattern.permute.xlu2 %v1455_v0  ;;  %1451 = vrcp.f32 %v1456_v3  ;;  %s1462_s11 = smov 96  }
   0x2   :  { %300 = vperm.xlu0 %1259, %v297_v1   ;;  %v313_v2 = vld [vmem:[%s2676_s3] sm:$0xff]  ;;  %1453 = vrcp.f32 %v1457_v6  ;;  %v1504_v8 = vand.u32 127, %v24_v5 }
   0x4   :  { %v1507_v10 = vadd.s32 128, %v1504_v8  ;;  %v1510_v12 = vadd.s32 512, %v1504_v8  ;;  %v1513_v13 = vadd.s32 640, %v1504_v8  ;;  %v1516_v14 = vadd.s32 256, %v1504_v8 }
   0x5   :  { %v35_v16 = vcvt.s32.f32 %v1504_v8  ;;  %v1521_v18 = vadd.s32 1152, %v1504_v8  ;;  %v1557_v57 = vadd.s32 384, %v1504_v8 }
   0x6   :  { %v36_v17 = vcvt.s32.f32 %v1507_v10  ;;  %v39_v21 = vcvt.s32.f32 %v1510_v12  ;;  %v40_v22 = vcvt.s32.f32 %v1513_v13  ;;  %v37_v25 = vcvt.s32.f32 %v1516_v14 }
   0x7   :  { %v1452_v4 = vpop.eup %1451  ;;  %v45_v23 = vadd.f32 0.5, %v35_v16  ;;  %v44_v32 = vcvt.s32.f32 %v1521_v18 }
   0x8   :  { %v56_v7 = vmul.f32 32.0, %v1452_v4  ;;  %v1454_v15 = vpop.eup %1453  ;;  %v46_v24 = vadd.f32 0.5, %v36_v17  ;;  %vm60_vm0 = vweird.f32 %v1452_v4  ;;  %v49_v28 = vadd.f32 0.5, %v39_v21 }
   0x9   :  { %v113_v20 = vmul.f32 20.0, %v1454_v15  ;;  %v50_v29 = vadd.f32 0.5, %v40_v22  ;;  %v47_v36 = vadd.f32 0.5, %v37_v25  ;;  %v54_v42 = vadd.f32 0.5, %v44_v32 }
   0xa   :  { %316 = vperm.xlu0 %1259, %v313_v2   ;;  %v57_v9 = vsub.f32 1.0, %v56_v7  ;;  %vm117_vm1 = vweird.f32 %v1454_v15 }
   0xb   :  { %v114_v27 = vsub.f32 1.0, %v113_v20 }
   0xc   :  { %v58_v11 = vmul.f32 %v1452_v4, %v57_v9 }
   0xd   :  { %v115_v33 = vmul.f32 %v1454_v15, %v114_v27 }
   0xe   :  { %v59_v19 = vadd.f32 %v1452_v4, %v58_v11 }
   0xf   :  { %v116_v39 = vadd.f32 %v1454_v15, %v115_v33 }
  0x10   :  { %v1526_v26 = vsel %vm60_vm0, %v1452_v4, %v59_v19  ;;  %v38_v4 = vcvt.s32.f32 %v1557_v57 }
  0x11   :  { %v62_v30 = vmul.f32 %v1526_v26, %v45_v23  ;;  %v63_v31 = vmul.f32 %v1526_v26, %v46_v24  ;;  %v66_v34 = vmul.f32 %v1526_v26, %v49_v28  ;;  %v67_v35 = vmul.f32 %v1526_v26, %v50_v29 }
  0x12   :  { %v1541_v45 = vsel %vm117_vm1, %v1454_v15, %v116_v39  ;;  %v64_v48 = vmul.f32 %v1526_v26, %v47_v36  ;;  %v71_v51 = vmul.f32 %v1526_v26, %v54_v42  ;;  %v48_v15 = vadd.f32 0.5, %v38_v4 }
  0x13   :  { %v72_v37 = vfloor.f32 %v62_v30  ;;  %v73_v38 = vfloor.f32 %v63_v31  ;;  %v76_v40 = vfloor.f32 %v66_v34  ;;  %v77_v41 = vfloor.f32 %v67_v35 }
  0x14   :  { %v74_v56 = vfloor.f32 %v64_v48  ;;  %v1559_v61 = vfloor.f32 %v71_v51  ;;  %v65_v27 = vmul.f32 %v1526_v26, %v48_v15  ;;  %v1581_v29 = vadd.s32 768, %v1504_v8 }
  0x15   :  { %v102_v43 = vadd.f32 0.5, %v72_v37  ;;  %v103_v44 = vadd.f32 0.5, %v73_v38  ;;  %v106_v46 = vadd.f32 0.5, %v76_v40  ;;  %v107_v47 = vadd.f32 0.5, %v77_v41 }
  0x16   :  { %v82_v60 = vmul.f32 32.0, %v72_v37  ;;  %v83_v62 = vmul.f32 32.0, %v73_v38  ;;  %v104_v3 = vadd.f32 0.5, %v74_v56  ;;  %v111_v10 = vadd.f32 0.5, %v1559_v61 }
  0x17   :  { %v119_v49 = vmul.f32 %v1541_v45, %v102_v43  ;;  %v1546_v50 = vmul.f32 %v1541_v45, %v103_v44  ;;  %v1551_v54 = vmul.f32 %v1541_v45, %v106_v46  ;;  %v1554_v55 = vmul.f32 %v1541_v45, %v107_v47  ;;  %v1640_v47 = vld [vmem:[%s2677_s1 + $0x10] sm:$0xff]  ;;  %v1772_v43 = vld [vmem:[%s2677_s1 + $0x18] sm:$0xff] }
  0x18   :  { %v92_v5 = vsub.f32 %v35_v16, %v82_v60  ;;  %v93_v6 = vsub.f32 %v36_v17, %v83_v62  ;;  %v1570_v11 = vmul.f32 %v1541_v45, %v104_v3  ;;  %v86_v16 = vmul.f32 32.0, %v76_v40 }
  0x19   :  { %v129_v52 = vfloor.f32 %v119_v49  ;;  %v130_v53 = vfloor.f32 %v1546_v50  ;;  %v133_v0 = vfloor.f32 %v1551_v54  ;;  %v134_v1 = vfloor.f32 %v1554_v55  ;;  %v1706_v54 = vld [vmem:[%s2677_s1 + $0x8] sm:$0xff] }
  0x1a   :  { %vm202_vm7 = vcmp.ge.f32.partialorder %v92_v5, 1.0  ;;  %v87_v17 = vmul.f32 32.0, %v77_v41  ;;  %vm203_vm9 = vcmp.ge.f32.partialorder %v93_v6, 1.0  ;;  %v1575_v23 = vmul.f32 %v1541_v45, %v111_v10 }
  0x1b   :  { %v139_v58 = vmul.f32 20.0, %v129_v52  ;;  %v140_v59 = vmul.f32 20.0, %v130_v53  ;;  %v143_v7 = vmul.f32 20.0, %v133_v0  ;;  %v144_v9 = vmul.f32 20.0, %v134_v1 }
  0x1c   :  { %vm222_vm11 = vcmp.le.f32.partialorder %v92_v5, 16.0  ;;  %v131_v24 = vfloor.f32 %v1570_v11  ;;  %vm223_vm12 = vcmp.le.f32.partialorder %v93_v6, 16.0  ;;  %v138_v28 = vfloor.f32 %v1575_v23 }
  0x1d   :  { %v149_v63 = vsub.f32 %v72_v37, %v139_v58  ;;  %v150_v2 = vsub.f32 %v73_v38, %v140_v59  ;;  %v153_v19 = vsub.f32 %v76_v40, %v143_v7  ;;  %v154_v20 = vsub.f32 %v77_v41, %v144_v9  ;;  %v1604_v37 = vld [vmem:[%s2677_s1] sm:$0xff] }
  0x1e   :  { %vm1587_vm14 = vcmp.lt.f32.partialorder %v129_v52, 2.0  ;;  %v96_v33 = vsub.f32 %v39_v21, %v86_v16  ;;  %v97_v34 = vsub.f32 %v40_v22, %v87_v17  ;;  %v141_v35 = vmul.f32 20.0, %v131_v24 }
  0x1f   :  { %vm172_vm2 = vcmp.ge.f32.partialorder %v149_v63, 1.0  ;;  %vm182_vm3 = vcmp.le.f32.partialorder %v149_v63, 16.0  ;;  %vm173_vm4 = vcmp.ge.f32.partialorder %v150_v2, 1.0  ;;  %vm183_vm5 = vcmp.le.f32.partialorder %v150_v2, 16.0 }
  0x20   :  { %vm192_vm6 = vmand %vm172_vm2, %vm182_vm3  ;;  %vm176_vm0 = vcmp.ge.f32.partialorder %v153_v19, 1.0  ;;  %vm177_vm1 = vcmp.ge.f32.partialorder %v154_v20, 1.0  ;;  %vm186_vm2 = vcmp.le.f32.partialorder %v153_v19, 16.0  ;;  %v84_v12 = vmul.f32 32.0, %v74_v56 }
  0x21   :  { %vm193_vm8 = vmand %vm173_vm4, %vm183_vm5  ;;  %vm187_vm3 = vcmp.le.f32.partialorder %v154_v20, 16.0  ;;  %v151_v21 = vsub.f32 %v74_v56, %v141_v35  ;;  %v75_v13 = vfloor.f32 %v65_v27  ;;  %v1607_v22 = vadd.s32 896, %v1504_v8 }
  0x22   :  { %vm212_vm10 = vmand %vm192_vm6, %vm202_vm7  ;;  %vm1616_vm5 = vcmp.lt.f32.partialorder %v130_v53, 2.0  ;;  %v148_v40 = vmul.f32 20.0, %v138_v28  ;;  %v41_v41 = vcvt.s32.f32 %v1581_v29  ;;  %v287_v42 = vunpack.c.l.bf16 %v1604_v37 }
  0x23   :  { %vm1583_vm13 = vmand %vm193_vm8, %vm203_vm9  ;;  %vm206_vm8 = vcmp.ge.f32.partialorder %v96_v33, 1.0  ;;  %vm207_vm9 = vcmp.ge.f32.partialorder %v97_v34, 1.0  ;;  %v105_v44 = vadd.f32 0.5, %v75_v13  ;;  %v91_v48 = vmul.f32 32.0, %v1559_v61 }
  0x24   :  { %vm1597_vm15 = vmand %vm212_vm10, %vm222_vm11  ;;  %v94_v49 = vsub.f32 %v37_v25, %v84_v12  ;;  %v42_v50 = vcvt.s32.f32 %v1607_v22  ;;  %v51_v51 = vadd.f32 0.5, %v41_v41  ;;  %v1656_v53 = vadd.s32 1024, %v1504_v8 }
  0x25   :  { %vm1612_vm4 = vmand %vm1583_vm13, %vm223_vm12  ;;  %vm174_vm12 = vcmp.ge.f32.partialorder %v151_v21, 1.0  ;;  %vm184_vm13 = vcmp.le.f32.partialorder %v151_v21, 16.0  ;;  %v1653_v52 = vmul.f32 %v1541_v45, %v105_v44  ;;  %v158_v25 = vsub.f32 %v1559_v61, %v148_v40 }
  0x26   :  { %vm252_vm6 = vmand %vm1597_vm15, %vm1587_vm14  ;;  %v52_v56 = vadd.f32 0.5, %v42_v50  ;;  %v68_v58 = vmul.f32 %v1526_v26, %v51_v51  ;;  %v288_v59 = vunpack.c.h.bf16 %v1604_v37  ;;  %v291_v60 = vunpack.c.l.bf16 %v1640_v47 }
  0x27   :  { %vm1628_vm7 = vmand %vm176_vm0, %vm186_vm2  ;;  %v132_v62 = vfloor.f32 %v1653_v52  ;;  %v43_v3 = vcvt.s32.f32 %v1656_v53  ;;  %v292_v7 = vunpack.c.h.bf16 %v1640_v47  ;;  %v101_v9 = vsub.f32 %v44_v32, %v91_v48 }
  0x28   :  { %vm1633_vm10 = vmand %vm177_vm1, %vm187_vm3  ;;  %vm226_vm1 = vcmp.le.f32.partialorder %v96_v33, 16.0  ;;  %vm227_vm3 = vcmp.le.f32.partialorder %v97_v34, 16.0  ;;  %v69_v61 = vmul.f32 %v1526_v26, %v52_v56  ;;  %v1679_v2 = vfloor.f32 %v68_v58 }
  0x29   :  { %vm1660_vm0 = vmand %vm1628_vm7, %vm206_vm8  ;;  %vm204_vm8 = vcmp.ge.f32.partialorder %v94_v49, 1.0  ;;  %v142_v10 = vmul.f32 20.0, %v132_v62  ;;  %v85_v17 = vmul.f32 32.0, %v75_v13  ;;  %v53_v19 = vadd.f32 0.5, %v43_v3 }
  0x2a   :  { %vm217_vm2 = vmand %vm1633_vm10, %vm207_vm9  ;;  %vm1690_vm9 = vcmp.lt.f32.partialorder %v133_v0, 2.0  ;;  %v1711_v0 = vld [vmem:[%s2677_s1 + $0x20] sm:$0xff]  ;;  %v79_v18 = vfloor.f32 %v69_v61  ;;  %v108_v32 = vadd.f32 0.5, %v1679_v2  ;;  %v289_v55 = vunpack.c.l.bf16 %v1706_v54  ;;  %s1459_s1 = smov 1  }
  0x2b   :  { %vm1674_vm7 = vmand %vm174_vm12, %vm184_vm13  ;;  %vm181_vm12 = vcmp.ge.f32.partialorder %v158_v25, 1.0  ;;  %vm191_vm13 = vcmp.le.f32.partialorder %v158_v25, 16.0  ;;  %v152_v27 = vsub.f32 %v75_v13, %v142_v10  ;;  %v290_v35 = vunpack.c.h.bf16 %v1706_v54 }
  0x2c   :  { %vm1684_vm11 = vmand %vm1660_vm0, %vm226_vm1  ;;  %vm224_vm1 = vcmp.le.f32.partialorder %v94_v49, 16.0  ;;  %v109_v30 = vadd.f32 0.5, %v79_v18  ;;  %v1734_v33 = vmul.f32 %v1541_v45, %v108_v32  ;;  %v1458_v12 = vmov 0.0  }
  0x2d   :  { %vm1699_vm10 = vmand %vm217_vm2, %vm227_vm3  ;;  %vm1725_vm2 = vcmp.lt.f32.partialorder %v134_v1, 2.0  ;;  %v296_v1 = vunpack.c.h.bf16 %v1711_v0  ;;  %v1750_v21 = vsel %vm252_vm6, 1.0, %v1458_v12  ;;  %vm231_vm6 = vcmp.le.f32.partialorder %v101_v9, 16.0 }
  0x2e   :  { %vm1717_vm0 = vmand %vm1674_vm7, %vm204_vm8  ;;  %vm211_vm8 = vcmp.ge.f32.partialorder %v101_v9, 1.0  ;;  %v1766_v36 = vmul.f32 %v1541_v45, %v109_v30  ;;  %v135_v31 = vfloor.f32 %v1734_v33  ;;  %v70_v46 = vmul.f32 %v1526_v26, %v53_v19 }
  0x2f   :  { %vm256_vm3 = vmand %vm1684_vm11, %vm1690_vm9  ;;  %v88_v57 = vmul.f32 32.0, %v1679_v2  ;;  %v89_v26 = vmul.f32 32.0, %v79_v18  ;;  %v293_v48 = vunpack.c.l.bf16 %v1772_v43  ;;  %v294_v23 = vunpack.c.h.bf16 %v1772_v43 }
  0x30   :  { %vm1737_vm7 = vmand %vm181_vm12, %vm191_vm13  ;;  %vm1761_vm13 = vcmp.lt.f32.partialorder %v131_v24, 2.0  ;;  %v95_v24 = vsub.f32 %v38_v4, %v85_v17  ;;  %v136_v4 = vfloor.f32 %v1766_v36  ;;  %v145_v51 = vmul.f32 20.0, %v135_v31 }
  0x31   :  { %vm1755_vm12 = vmand %vm1717_vm0, %vm224_vm1  ;;  %v295_v14 = vunpack.c.l.bf16 %v1711_v0  ;;  %v1832_v58 = vfloor.f32 %v70_v46  ;;  %vm1851_vm9 = vcmp.lt.f32.partialorder %v132_v62, 2.0  ;;  %v98_v6 = vsub.f32 %v41_v41, %v88_v57 }
  0x32   :  { %vm2716_vm14 = vmand %vm1612_vm4, %vm1616_vm5  ;;  %vm1800_vm4 = vcmp.lt.f32.partialorder %v138_v28, 2.0  ;;  %vm175_vm5 = vcmp.ge.f32.partialorder %v152_v27, 1.0  ;;  %v1818_v28 = vsel %vm256_vm3, 1.0, %v1458_v12  ;;  %v146_v56 = vmul.f32 20.0, %v136_v4 }
  0x33   :  { %v1782_v11 = vsel %vm2716_vm14, 1.0, %v1458_v12  ;;  %vm257_vm15 = vmand %vm1699_vm10, %vm1725_vm2  ;;  %vm185_vm10 = vcmp.le.f32.partialorder %v152_v27, 16.0  ;;  %v155_v9 = vsub.f32 %v1679_v2, %v145_v51  ;;  %v1866_v52 = vsub.f32 %v42_v50, %v89_v26 }
  0x34   :  { %vm1794_vm0 = vmand %vm1737_vm7, %vm211_vm8  ;;  %v1821_v49 = vsel %vm257_vm15, 1.0, %v1458_v12  ;;  %vm205_vm7 = vcmp.ge.f32.partialorder %v95_v24, 1.0  ;;  %vm225_vm8 = vcmp.le.f32.partialorder %v95_v24, 16.0  ;;  %v156_v62 = vsub.f32 %v79_v18, %v146_v56 }
  0x35   :  { %vm254_vm1 = vmand %vm1755_vm12, %vm1761_vm13  ;;  %vm178_vm13 = vcmp.ge.f32.partialorder %v155_v9, 1.0  ;;  %vm188_vm14 = vcmp.le.f32.partialorder %v155_v9, 16.0  ;;  %v110_v50 = vadd.f32 0.5, %v1832_v58 }
  0x36   :  { %vm1826_vm2 = vmand %vm175_vm5, %vm185_vm10  ;;  %v1847_v61 = vsel %vm254_vm1, 1.0, %v1458_v12  ;;  %vm179_vm15 = vcmp.ge.f32.partialorder %v156_v62, 1.0  ;;  %vm208_vm10 = vcmp.ge.f32.partialorder %v98_v6, 1.0 }
  0x37   :  { %vm1837_vm11 = vmand %vm1794_vm0, %vm231_vm6  ;;  %vm189_vm6 = vcmp.le.f32.partialorder %v156_v62, 16.0  ;;  %v127_v13 = vmul.f32 %v1541_v45, %v110_v50 }
  0x38   :  { %vm1879_vm3 = vmand %vm1826_vm2, %vm205_vm7  ;;  %vm209_vm2 = vcmp.ge.f32.partialorder %v1866_v52, 1.0  ;;  %vm228_vm7 = vcmp.le.f32.partialorder %v98_v6, 16.0 }
  0x39   :  { %vm261_vm12 = vmand %vm1837_vm11, %vm1800_vm4 }
  0x3a   :  { %vm1900_vm0 = vmand %vm1879_vm3, %vm225_vm8  ;;  %v1218_v20 = vsel %vm261_vm12, 1.0, %v1458_v12  ;;  %vm229_vm8 = vcmp.le.f32.partialorder %v1866_v52, 16.0  ;;  %vm1957_vm12 = vcmp.lt.f32.partialorder %v136_v4, 2.0 }
  0x3b   :  { %vm1911_vm5 = vmand %vm178_vm13, %vm188_vm14 }
  0x3c   :  { %vm1916_vm1 = vmand %vm179_vm15, %vm189_vm6 }
  0x3d   :  { %vm255_vm4 = vmand %vm1900_vm0, %vm1851_vm9  ;;  %vm1951_vm9 = vcmp.lt.f32.partialorder %v135_v31, 2.0 }
  0x3e   :  { %vm218_vm11 = vmand %vm1911_vm5, %vm208_vm10  ;;  %v1212_v39 = vsel %vm255_vm4, 1.0, %v1458_v12 }
  0x3f   :  { %vm1943_vm3 = vmand %vm1916_vm1, %vm209_vm2 }
  0x40   :  { %vm1966_vm13 = vmand %vm218_vm11, %vm228_vm7 }
  0x41   :  { %vm1993_vm14 = vmand %vm1943_vm3, %vm229_vm8  ;;  %vm370_vm3 = vcmp.lt.s32.totalorder %v1504_v8, 32 }
  0x42   :  { %vm258_vm15 = vmand %vm1966_vm13, %vm1951_vm9  ;;  %vm432_vm9 = vcmp.lt.s32.totalorder %v1504_v8, 127  ;;  %vm401_vm13 = vcmp.lt.s32.totalorder %v1504_v8, 1 }
  0x43   :  { %vm259_vm6 = vmand %vm1993_vm14, %vm1957_vm12  ;;  %vm550_vm12 = vcmask 1043456   ;;  %vm546_vm14 = vcmask 195584  }
  0x74   :  { %v1774_v44 = vpop.permute.xlu0 %300 }
  0x75   :  { %v303_v10 = vmul.f32 %v1774_v44, %v287_v42  ;;  %v304_v15 = vmul.f32 %v1774_v44, %v288_v59  ;;  %v307_v29 = vmul.f32 %v1774_v44, %v291_v60  ;;  %v308_v41 = vmul.f32 %v1774_v44, %v292_v7 }
  0x76   :  { %v305_v2 = vmul.f32 %v1774_v44, %v289_v55  ;;  %v312_v42 = vmul.f32 %v1774_v44, %v296_v1  ;;  %v306_v47 = vmul.f32 %v1774_v44, %v290_v35  ;;  %v90_v35 = vmul.f32 32.0, %v1832_v58 }
  0x77   :  { %v309_v45 = vmul.f32 %v1774_v44, %v293_v48  ;;  %v310_v36 = vmul.f32 %v1774_v44, %v294_v23  ;;  %v137_v48 = vfloor.f32 %v127_v13 }
  0x78   :  { %v100_v4 = vsub.f32 %v43_v3, %v90_v35 }
  0x79   :  { %vm250_vm7 = vcmp.lt.f32.partialorder %v137_v48, 2.0 }
  0x7a   :  { %vm210_vm0 = vcmp.ge.f32.partialorder %v100_v4, 1.0  ;;  %vm230_vm1 = vcmp.le.f32.partialorder %v100_v4, 16.0 }
  0x7c   :  { %v1883_v22 = vpop.permute.xlu0 %316 }
  0x7d   :  { %v319_v59 = vadd.f32 %v1883_v22, %v303_v10  ;;  %v320_v60 = vadd.f32 %v1883_v22, %v304_v15  ;;  %v323_v7 = vadd.f32 %v1883_v22, %v307_v29  ;;  %v324_v54 = vadd.f32 %v1883_v22, %v308_v41 }
  0x7e   :  { %v321_v18 = vadd.f32 %v1883_v22, %v305_v2  ;;  %v328_v32 = vadd.f32 %v1883_v22, %v312_v42  ;;  %v322_v30 = vadd.f32 %v1883_v22, %v306_v47  ;;  %v325_v31 = vadd.f32 %v1883_v22, %v309_v45 }
  0x7f   :  { %v329_v17 = vmax.f32 %v319_v59, 0.0  ;;  %v330_v19 = vmax.f32 %v320_v60, 0.0  ;;  %v333_v40 = vmax.f32 %v323_v7, 0.0  ;;  %v334_v24 = vmax.f32 %v324_v54, 0.0 }
  0x80   :  { %v331_v46 = vmax.f32 %v321_v18, 0.0  ;;  %v338_v38 = vmax.f32 %v328_v32, 0.0  ;;  %v332_v57 = vmax.f32 %v322_v30, 0.0  ;;  %v326_v3 = vadd.f32 %v1883_v22, %v310_v36 }
  0x81   :  { %v1923_v55 = vmul.f32 %v1750_v21, %v329_v17  ;;  %v1926_v1 = vmul.f32 %v1782_v11, %v330_v19  ;;  %v1979_v25 = vmul.f32 %v1818_v28, %v333_v40  ;;  %v1982_v56 = vmul.f32 %v1821_v49, %v334_v24 }
  0x82   :  { %v1985_v43 = vmul.f32 %v1847_v61, %v331_v46  ;;  %v1987_v23 = vmul.f32 %v1218_v20, %v338_v38  ;;  %v147_v28 = vmul.f32 20.0, %v137_v48  ;;  %v311_v49 = vmul.f32 %v1774_v44, %v295_v14 }
  0x83   :  { %v1939_v21 = vpack.i.bf16 %v1926_v1, %v1923_v55  ;;  %v2001_v63 = vmul.f32 %v1212_v39, %v332_v57  ;;  %v1295_v0 = vpack.i.bf16 %v1982_v56, %v1979_v25  ;;  %v335_v14 = vmax.f32 %v325_v31, 0.0 }
  0x84   :  { %v157_v61 = vsub.f32 %v1832_v58, %v147_v28  ;;  %v327_v5 = vadd.f32 %v1883_v22, %v311_v49  ;;  %v1275_v44 = vpack.i.bf16 %v1987_v23, %v1985_v43  ;;  %v336_v6 = vmax.f32 %v326_v3, 0.0 }
  0x85   :  { %1281 = vrot.lane.b32.xlu0 %v1939_v21, %s1459_s1  ;;  %1271 = vrot.lane.b32.xlu2 %v1939_v21, %s1460_s9  ;;  %v1265_v9 = vpack.i.bf16 %v2001_v63, %v1985_v43  ;;  %v1215_v10 = vsel %vm258_vm15, 1.0, %v1458_v12  ;;  %v1216_v58 = vsel %vm259_vm6, 1.0, %v1458_v12  ;;  %v1285_v37 = vpack.i.bf16 %v1985_v43, %v1987_v23 }
  0x86   :  { %1261 = vrot.lane.b32.xlu1 %v1939_v21, %s1461_s10  ;;  %vm180_vm5 = vcmp.ge.f32.partialorder %v157_v61, 1.0  ;;  %vm190_vm10 = vcmp.le.f32.partialorder %v157_v61, 16.0  ;;  %v337_v15 = vmax.f32 %v327_v5, 0.0  ;;  %v2024_v52 = vmul.f32 %v1215_v10, %v335_v14 }
  0x87   :  { %vm200_vm2 = vmand %vm180_vm5, %vm190_vm10  ;;  %v2026_v62 = vmul.f32 %v1216_v58, %v336_v6  ;;  %v1305_v22 = vpack.i.bf16 %v1979_v25, %v2001_v63  ;;  %v1345_v50 = vpack.i.bf16 %v1979_v25, %v1987_v23  ;;  %vm894_vm15 = vcmp.lt.s32.totalorder %v1504_v8, 96 }
  0x88   :  { %vm220_vm8 = vmand %vm200_vm2, %vm210_vm0  ;;  %v1320_v47 = vpack.i.bf16 %v2024_v52, %v1982_v56 }
  0x89   :  { %vm240_vm4 = vmand %vm220_vm8, %vm230_vm1  ;;  %v1310_v2 = vpack.i.bf16 %v2026_v62, %v2024_v52 }
  0x8a   :  { %vm260_vm11 = vmand %vm240_vm4, %vm250_vm7 }
  0x8b   :  { %v1217_v29 = vsel %vm260_vm11, 1.0, %v1458_v12 }
  0x8c   :  { %v2029_v41 = vmul.f32 %v1217_v29, %v337_v15 }
  0x8d   :  { %1296 = vrot.lane.b32.xlu0 %v1295_v0, %s1460_s9  ;;  %1276 = vrot.lane.b32.xlu2 %v1275_v44, %s1460_s9 }
  0x8e   :  { %1266 = vrot.lane.b32.xlu1 %v1265_v9, %s1461_s10  ;;  %v1290_v42 = vpack.i.bf16 %v2001_v63, %v2029_v41  ;;  %v1325_v12 = vpack.i.bf16 %v1987_v23, %v2029_v41  ;;  %v2056_v59 = vpack.i.bf16 %v2029_v41, %v2026_v62 }
  0x95   :  { %1311 = vrot.lane.b32.xlu0 %v1310_v2, %s1461_s10  ;;  %1291 = vrot.lane.b32.xlu2 %v1290_v42, %s1460_s9 }
  0x96   :  { %1286 = vrot.lane.b32.xlu1 %v1285_v37, %s1459_s1 }
  0x9d   :  { %1326 = vrot.lane.b32.xlu0 %v1325_v12, %s1461_s10  ;;  %1306 = vrot.lane.b32.xlu2 %v1305_v22, %s1459_s1 }
  0x9e   :  { %1301 = vrot.lane.b32.xlu1 %v1295_v0, %s1461_s10 }
  0xa5   :  { %1341 = vrot.lane.b32.xlu0 %v1265_v9, %s1462_s11  ;;  %1321 = vrot.lane.b32.xlu2 %v1320_v47, %s1459_s1 }
  0xa6   :  { %1316 = vrot.lane.b32.xlu1 %v1310_v2, %s1460_s9 }
  0xad   :  { %1346 = vrot.lane.b32.xlu0 %v1345_v50, %s1462_s11  ;;  %1336 = vrot.lane.b32.xlu2 %v1939_v21, %s1462_s11 }
  0xae   :  { %1331 = vrot.lane.b32.xlu1 %v2056_v59, %s1459_s1 }
  0xdf   :  { %v1272_v60 = vpop.permute.xlu2 %1271 }
  0xe0   :  { %v1274_v7 = vunpack.i.h.bf16 %v1272_v60  ;;  %v1273_v54 = vunpack.i.l.bf16 %v1272_v60 }
  0xe2   :  { %v2066_v16 = vsel %vm370_vm3, %v1273_v54, %v1274_v7 }
  0xe7   :  { %v1277_v18 = vpop.permute.xlu2 %1276 }
  0xe8   :  { %v1279_v32 = vunpack.i.h.bf16 %v1277_v18  ;;  %v1278_v20 = vunpack.i.l.bf16 %v1277_v18 }
  0xea   :  { %v2070_v17 = vsel %vm370_vm3, %v1279_v32, %v1273_v54  ;;  %v2084_v35 = vsel %vm370_vm3, %v1274_v7, %v1278_v20 }
  0xeb   :  { %v1350_v19 = vpack.i.bf16 %v2066_v16, %v2070_v17 }
  0xed   :  { %1351 = vrot.lane.b32.xlu1 %v1350_v19, %s1461_s10 }
  0xef   :  { %v2075_v27 = vpop.permute.xlu2 %1291 }
  0xf0   :  { %v1294_v30 = vunpack.i.h.bf16 %v2075_v27  ;;  %v1293_v40 = vunpack.i.l.bf16 %v2075_v27 }
  0xf2   :  { %v2080_v34 = vsel %vm370_vm3, %v1278_v20, %v1294_v30  ;;  %v2098_v38 = vsel %vm370_vm3, %v1293_v40, %v1279_v32 }
  0xf3   :  { %v1355_v13 = vpack.i.bf16 %v2080_v34, %v2084_v35  ;;  %v1370_v45 = vpack.i.bf16 %v2084_v35, %v2098_v38 }
  0xf5   :  { %1356 = vrot.lane.b32.xlu2 %v1355_v13, %s1461_s10  ;;  %1361 = vrot.lane.b32.xlu1 %v1350_v19, %s1459_s1 }
  0xf7   :  { %v1282_v24 = vpop.permute.xlu0 %1281  ;;  %v2108_v26 = vpop.permute.xlu2 %1306 }
  0xf8   :  { %v2092_v46 = vpop.permute.xlu1 %1261  ;;  %v1284_v3 = vunpack.i.h.bf16 %v1282_v24  ;;  %v1283_v28 = vunpack.i.l.bf16 %v1282_v24  ;;  %v1309_v24 = vunpack.i.h.bf16 %v2108_v26 }
  0xf9   :  { %v1264_v21 = vunpack.i.h.bf16 %v2092_v46  ;;  %v1263_v11 = vunpack.i.l.bf16 %v2092_v46 }
  0xfa   :  { %v492_v15 = vsel %vm401_vm13, %v1283_v28, %v1284_v3 }
  0xfb   :  { %v522_v39 = vsel %vm432_vm9, %v1263_v11, %v1264_v21  ;;  %v525_v50 = vpack.c.bf16 %v1926_v1, %v492_v15 }
  0xfc   :  { %v534_v57 = vpack.c.bf16 %v522_v39, %v522_v39 }
  0xfd   :  { %1371 = vrot.lane.b32.xlu2 %v1370_v45, %s1459_s1  ;;  %1366 = vrot.lane.b32.xlu1 %v1320_v47, %s1462_s11 }
  0xfe   :  { %v552_v51 = vsel %vm550_vm12, %v534_v57, 0 }
  0xff   :  { %587 = vmatpush.bf16.msra.mxu0 %v552_v51  ;;  %v2113_v33 = vpop.permute.xlu0 %1296  ;;  %v2142_v29 = vpop.permute.xlu2 %1321 }
 0x100   :  { %v1299_v36 = vunpack.i.h.bf16 %v2113_v33  ;;  %v1298_v31 = vunpack.i.l.bf16 %v2113_v33  ;;  %v1267_v4 = vpop.permute.xlu1 %1266  ;;  %v1324_v60 = vunpack.i.h.bf16 %v2142_v29  ;;  %v1323_v7 = vunpack.i.l.bf16 %v2142_v29 }
 0x101   :  { %v1269_v48 = vunpack.i.h.bf16 %v1267_v4  ;;  %v1268_v53 = vunpack.i.l.bf16 %v1267_v4 }
 0x102   :  { %v2122_v49 = vsel %vm370_vm3, %v1298_v31, %v1299_v36  ;;  %v2126_v61 = vsel %vm370_vm3, %v1294_v30, %v1298_v31  ;;  %v2164_v30 = vld [vmem:[%s2678_s4 + $0x4] sm:$0xf] }
 0x103   :  { %v1375_v5 = vpack.i.bf16 %v2122_v49, %v2126_v61  ;;  %v1380_v0 = vpack.i.bf16 %v2126_v61, %v2080_v34  ;;  %v521_v44 = vsel %vm432_vm9, %v1264_v21, %v1268_v53  ;;  %v520_v14 = vsel %vm432_vm9, %v1268_v53, %v1269_v48 }
 0x104   :  { %v535_v6 = vpack.c.bf16 %v521_v44, %v521_v44  ;;  %v536_v9 = vpack.c.bf16 %v520_v14, %v520_v14 }
 0x105   :  { %1376 = vrot.lane.b32.xlu0 %v1375_v5, %s1461_s10  ;;  %1381 = vrot.lane.b32.xlu2 %v1380_v0, %s1459_s1 }
 0x106   :  { %v555_v10 = vsel %vm550_vm12, %v535_v6, 0  ;;  %v558_v58 = vsel %vm550_vm12, %v536_v9, 0 }
 0x107   :  { %600 = vmatpush.bf16.msra.mxu1 %v555_v10  ;;  %613 = vmatpush.bf16.msra.mxu2 %v558_v58  ;;  %v1312_v2 = vpop.permute.xlu0 %1311 }
 0x108   :  { %v1314_v42 = vunpack.i.h.bf16 %v1312_v2  ;;  %v1313_v37 = vunpack.i.l.bf16 %v1312_v2  ;;  %v2144_v12 = vpop.permute.xlu1 %1286  ;;  %v488_v2 = vsel %vm401_vm13, %v1309_v24, %v1323_v7 }
 0x109   :  { %v1289_v22 = vunpack.i.h.bf16 %v2144_v12  ;;  %v1288_v47 = vunpack.i.l.bf16 %v2144_v12 }
 0x10a   :  { %v516_v54 = vsel %vm432_vm9, %v1313_v37, %v1314_v42 }
 0x10b   :  { %601 = vmatpush.bf16.msra.mxu1 %v525_v50  ;;  %v493_v18 = vsel %vm401_vm13, %v1288_v47, %v1283_v28  ;;  %v491_v32 = vsel %vm401_vm13, %v1284_v3, %v1289_v22  ;;  %v540_v19 = vpack.c.bf16 %v516_v54, %v516_v54 }
 0x10c   :  { %v524_v20 = vpack.c.bf16 %v1923_v55, %v493_v18  ;;  %v526_v1 = vpack.c.bf16 %v1985_v43, %v491_v32  ;;  %v487_v55 = vsel %vm401_vm13, %v1323_v7, %v1324_v60  ;;  %v529_v18 = vpack.c.bf16 %v1982_v56, %v488_v2 }
 0x10d   :  { %1386 = vrot.lane.b32.xlu0 %v2056_v59, %s1462_s11  ;;  %v570_v13 = vsel %vm550_vm12, %v540_v19, 0  ;;  %v1308_v59 = vunpack.i.l.bf16 %v2108_v26  ;;  %v530_v31 = vpack.c.bf16 %v2024_v52, %v487_v55  ;;  %v1337_v19 = vpop.permute.xlu2 %1336 }
 0x10e   :  { %588 = vmatpush.bf16.msra.mxu0 %v524_v20  ;;  %614 = vmatpush.bf16.msra.mxu2 %v526_v1 }
 0x10f   :  { %v1327_v43 = vpop.permute.xlu0 %1326  ;;  %1221 = vmatmul.msk.bf16.vlgmr.msra.gmra.mxu1 %vm546_vm14, %v2164_v30  ;;  %v490_v44 = vsel %vm401_vm13, %v1289_v22, %v1308_v59 }
 0x110   :  { %v1329_v21 = vunpack.i.h.bf16 %v1327_v43  ;;  %v1328_v45 = vunpack.i.l.bf16 %v1327_v43  ;;  %v1302_v39 = vpop.permute.xlu1 %1301 }
 0x111   :  { %v1304_v57 = vunpack.i.h.bf16 %v1302_v39  ;;  %v1303_v51 = vunpack.i.l.bf16 %v1302_v39  ;;  %1220 = vmatmul.msk.bf16.vlgmr.msra.gmra.mxu0 %vm546_vm14, %v2164_v30  ;;  %1222 = vmatmul.msk.bf16.vlgmr.msra.gmra.mxu2 %vm546_vm14, %v2164_v30 }
 0x112   :  { %665 = vmatpush.bf16.msrb.mxu2 %v570_v13  ;;  %v515_v3 = vsel %vm432_vm9, %v1314_v42, %v1328_v45  ;;  %v514_v0 = vsel %vm432_vm9, %v1328_v45, %v1329_v21  ;;  %v523_v14 = vsel %vm432_vm9, %v1329_v21, %v1263_v11  ;;  %v527_v11 = vpack.c.bf16 %v2001_v63, %v490_v44 }
 0x113   :  { %v519_v4 = vsel %vm432_vm9, %v1269_v48, %v1303_v51  ;;  %v518_v53 = vsel %vm432_vm9, %v1303_v51, %v1304_v57  ;;  %v517_v26 = vsel %vm432_vm9, %v1304_v57, %v1313_v37  ;;  %v489_v48 = vsel %vm401_vm13, %v1308_v59, %v1309_v24 }
 0x114   :  { %v537_v52 = vpack.c.bf16 %v519_v4, %v519_v4  ;;  %v538_v28 = vpack.c.bf16 %v518_v53, %v518_v53  ;;  %v539_v5 = vpack.c.bf16 %v517_v26, %v517_v26  ;;  %v541_v58 = vpack.c.bf16 %v515_v3, %v515_v3 }
 0x115   :  { %v542_v42 = vpack.c.bf16 %v514_v0, %v514_v0  ;;  %v543_v46 = vpack.c.bf16 %v523_v14, %v523_v14  ;;  %v528_v54 = vpack.c.bf16 %v1979_v25, %v489_v48  ;;  %v1338_v13 = vunpack.i.l.bf16 %v1337_v19 }
 0x116   :  { %666 = vmatpush.bf16.msrb.mxu2 %v530_v31  ;;  %v561_v6 = vsel %vm550_vm12, %v537_v52, 0  ;;  %v564_v9 = vsel %vm550_vm12, %v538_v28, 0  ;;  %v567_v10 = vsel %vm550_vm12, %v539_v5, 0  ;;  %v573_v32 = vsel %vm550_vm12, %v541_v58, 0 }
 0x117   :  { %626 = vmatpush.bf16.msra.mxu3 %v561_v6  ;;  %639 = vmatpush.bf16.msrb.mxu0 %v564_v9  ;;  %v1342_v15 = vpop.permute.xlu0 %1341  ;;  %v576_v20 = vsel %vm550_vm12, %v542_v42, 0  ;;  %v579_v63 = vsel %vm550_vm12, %v543_v46, 0 }
 0x118   :  { %652 = vmatpush.bf16.msrb.mxu1 %v567_v10  ;;  %v1317_v37 = vpop.permute.xlu1 %1316  ;;  %v1343_v1 = vunpack.i.l.bf16 %v1342_v15  ;;  %v1344_v55 = vunpack.i.h.bf16 %v1342_v15 }
 0x119   :  { %v1319_v22 = vunpack.i.h.bf16 %v1317_v37  ;;  %v1318_v50 = vunpack.i.l.bf16 %v1317_v37 }
 0x11a   :  { %v2260_v51 = vsel %vm894_vm15, %v1343_v1, %v1344_v55 }
 0x11b   :  { %627 = vmatpush.bf16.msra.mxu3 %v527_v11  ;;  %640 = vmatpush.bf16.msrb.mxu0 %v528_v54  ;;  %v2214_v7 = vsel %vm370_vm3, %v1319_v22, %v1293_v40  ;;  %v2220_v25 = vsel %vm370_vm3, %v1299_v36, %v1318_v50  ;;  %v2224_v56 = vsel %vm370_vm3, %v1318_v50, %v1319_v22  ;;  %v1339_v36 = vunpack.i.h.bf16 %v1337_v19 }
 0x11c   :  { %653 = vmatpush.bf16.msrb.mxu1 %v529_v18  ;;  %v1400_v27 = vpack.i.bf16 %v2098_v38, %v2214_v7  ;;  %v1395_v40 = vpack.i.bf16 %v2220_v25, %v2122_v49  ;;  %v1390_v33 = vpack.i.bf16 %v2224_v56, %v2220_v25 }
 0x11d   :  { %v2246_v59 = vsel %vm894_vm15, %v1339_v36, %v1343_v1  ;;  %v2264_v31 = vsel %vm894_vm15, %v1338_v13, %v1339_v36 }
 0x11e   :  { %1401 = vrot.lane.b32.xlu0 %v1400_v27, %s1461_s10  ;;  %1396 = vrot.lane.b32.xlu2 %v1395_v40, %s1459_s1  ;;  %v1410_v52 = vpack.i.bf16 %v2246_v59, %v2264_v31 }
 0x11f   :  { %678 = vmatpush.bf16.msrb.mxu3 %v573_v32  ;;  %691 = vmatpush.bf16.msra.mxu0 %v576_v20  ;;  %v2236_v43 = vpop.permute.xlu0 %1346 }
 0x120   :  { %704 = vmatpush.bf16.msra.mxu1 %v579_v63  ;;  %1391 = vrot.lane.b32.xlu1 %v1390_v33, %s1461_s10  ;;  %v1349_v24 = vunpack.i.h.bf16 %v2236_v43  ;;  %v1332_v21 = vpop.permute.xlu1 %1331  ;;  %v1348_v0 = vunpack.i.l.bf16 %v2236_v43  ;;  %v2338_v33 = vld [vmem:[%s2678_s4] sm:$0xf] }
 0x121   :  { %1223 = vmatmul.msk.bf16.vlgmr.msra.gmra.mxu3 %vm546_vm14, %v2164_v30  ;;  %1225 = vmatmul.msk.bf16.vlgmr.msrb.gmra.mxu1 %vm546_vm14, %v2164_v30  ;;  %v1334_v45 = vunpack.i.h.bf16 %v1332_v21  ;;  %v1333_v39 = vunpack.i.l.bf16 %v1332_v21 }
 0x122   :  { %1224 = vmatmul.msk.bf16.vlgmr.msrb.gmra.mxu0 %vm546_vm14, %v2164_v30  ;;  %1226 = vmatmul.msk.bf16.vlgmr.msrb.gmra.mxu2 %vm546_vm14, %v2164_v30  ;;  %v2256_v57 = vsel %vm894_vm15, %v1344_v55, %v1349_v24 }
 0x123   :  { %v1415_v4 = vpack.i.bf16 %v2256_v57, %v2260_v51  ;;  %v486_v53 = vsel %vm401_vm13, %v1324_v60, %v1333_v39  ;;  %v485_v26 = vsel %vm401_vm13, %v1333_v39, %v1334_v45  ;;  %v484_v3 = vsel %vm401_vm13, %v1334_v45, %v1288_v47 }
 0x124   :  { %v531_v28 = vpack.c.bf16 %v2026_v62, %v486_v53  ;;  %v532_v5 = vpack.c.bf16 %v2029_v41, %v485_v26  ;;  %v533_v29 = vpack.c.bf16 %v1987_v23, %v484_v3  ;;  %v1405_v60 = vpack.i.bf16 %v2214_v7, %v2224_v56 }
 0x125   :  { %v2293_v62 = vsel %vm894_vm15, %v1348_v0, %v1338_v13 }
 0x126   :  { %1416 = vrot.lane.b32.xlu0 %v1415_v4, %s1461_s10  ;;  %1411 = vrot.lane.b32.xlu2 %v1410_v52, %s1461_s10  ;;  %v1425_v23 = vpack.i.bf16 %v2260_v51, %v2293_v62 }
 0x127   :  { %679 = vmatpush.bf16.msrb.mxu3 %v531_v28  ;;  %692 = vmatpush.bf16.msra.mxu0 %v532_v5 }
 0x128   :  { %1406 = vrot.lane.b32.xlu1 %v1405_v60, %s1459_s1  ;;  %705 = vmatpush.bf16.msra.mxu1 %v533_v29 }
 0x12e   :  { %1426 = vrot.lane.b32.xlu2 %v1425_v23, %s1459_s1 }
 0x130   :  { %1421 = vrot.lane.b32.xlu1 %v1410_v52, %s1459_s1 }
 0x131   :  { %1227 = vmatmul.msk.bf16.vlgmr.msrb.gmra.mxu3 %vm546_vm14, %v2164_v30  ;;  %1229 = vmatmul.msk.bf16.vlgmr.msra.gmra.mxu1 %vm546_vm14, %v2164_v30 }
 0x132   :  { %1228 = vmatmul.msk.bf16.vlgmr.msra.gmra.mxu0 %vm546_vm14, %v2164_v30 }
 0x14f   :  { %v1357_v41 = vpop.permute.xlu2 %1356 }
 0x150   :  { %v1359_v12 = vunpack.i.h.bf16 %v1357_v41  ;;  %v1358_v47 = vunpack.i.l.bf16 %v1357_v41 }
 0x152   :  { %v439_v44 = vsel %vm432_vm9, %v1358_v47, %v1359_v12 }
 0x153   :  { %v455_v48 = vpack.c.bf16 %v439_v44, %v439_v44 }
 0x155   :  { %v721_v14 = vsel %vm550_vm12, %v455_v48, 0 }
 0x156   :  { %776 = vmatpush.bf16.msrb.mxu0 %v721_v14 }
 0x157   :  { %v2318_v42 = vpop.permute.xlu2 %1371 }
 0x158   :  { %v1374_v50 = vunpack.i.h.bf16 %v2318_v42  ;;  %v1373_v11 = vunpack.i.l.bf16 %v2318_v42 }
 0x15f   :  { %v2308_v6 = vpop.permute.xlu1 %1351  ;;  %v2362_v21 = vpop.permute.xlu2 %1381 }
 0x160   :  { %v1354_v9 = vunpack.i.h.bf16 %v2308_v6  ;;  %v1353_v10 = vunpack.i.l.bf16 %v2308_v6  ;;  %v1384_v53 = vunpack.i.h.bf16 %v2362_v21 }
 0x162   :  { %v441_v30 = vsel %vm432_vm9, %v1353_v10, %v1354_v9  ;;  %v440_v58 = vsel %vm432_vm9, %v1354_v9, %v1358_v47 }
 0x163   :  { %v453_v15 = vpack.c.bf16 %v441_v30, %v441_v30  ;;  %v454_v2 = vpack.c.bf16 %v440_v58, %v440_v58 }
 0x165   :  { %v715_v37 = vsel %vm550_vm12, %v453_v15, 0  ;;  %v718_v46 = vsel %vm550_vm12, %v454_v2, 0 }
 0x166   :  { %750 = vmatpush.bf16.msra.mxu2 %v715_v37  ;;  %763 = vmatpush.bf16.msra.mxu3 %v718_v46 }
 0x167   :  { %v1362_v22 = vpop.permute.xlu1 %1361 }
 0x168   :  { %v1364_v54 = vunpack.i.h.bf16 %v1362_v22  ;;  %v1363_v18 = vunpack.i.l.bf16 %v1362_v22 }
 0x16a   :  { %v411_v32 = vsel %vm401_vm13, %v1373_v11, %v1363_v18  ;;  %v410_v19 = vsel %vm401_vm13, %v1363_v18, %v1364_v54  ;;  %v409_v20 = vsel %vm401_vm13, %v1364_v54, %v1374_v50 }
 0x16b   :  { %v443_v63 = vpack.c.bf16 %v2070_v17, %v411_v32  ;;  %v444_v27 = vpack.c.bf16 %v2066_v16, %v410_v19  ;;  %v445_v40 = vpack.c.bf16 %v2084_v35, %v409_v20 }
 0x16d   :  { %751 = vmatpush.bf16.msra.mxu2 %v443_v63  ;;  %764 = vmatpush.bf16.msra.mxu3 %v444_v27  ;;  %v349_v63 = vld [vmem:[%s2679_s5] sm:$0xff] }
 0x16e   :  { %777 = vmatpush.bf16.msrb.mxu0 %v445_v40 }
 0x16f   :  { %v1367_v1 = vpop.permute.xlu1 %1366 }
 0x170   :  { %v1369_v36 = vunpack.i.h.bf16 %v1367_v1  ;;  %v1368_v13 = vunpack.i.l.bf16 %v1367_v1  ;;  %1230 = vmatmul.msk.bf16.vlgmr.msra.gmra.mxu2 %vm546_vm14, %v2338_v33  ;;  %1231 = vmatmul.msk.bf16.vlgmr.msra.gmra.mxu3 %vm546_vm14, %v2338_v33 }
 0x171   :  { %1232 = vmatmul.msk.bf16.vlgmr.msrb.gmra.mxu0 %vm546_vm14, %v2338_v33 }
 0x172   :  { %v2348_v16 = vsel %vm894_vm15, %v1368_v13, %v1369_v36  ;;  %v2354_v17 = vsel %vm894_vm15, %v1349_v24, %v1368_v13  ;;  %v1383_v24 = vunpack.i.l.bf16 %v2362_v21 }
 0x173   :  { %v1430_v35 = vpack.i.bf16 %v2348_v16, %v2354_v17  ;;  %v1435_v55 = vpack.i.bf16 %v2354_v17, %v2256_v57 }
 0x174   :  { %v408_v60 = vsel %vm401_vm13, %v1374_v50, %v1383_v24  ;;  %v407_v23 = vsel %vm401_vm13, %v1383_v24, %v1384_v53 }
 0x175   :  { %1431 = vrot.lane.b32.xlu0 %v1430_v35, %s1461_s10  ;;  %1436 = vrot.lane.b32.xlu1 %v1435_v55, %s1459_s1  ;;  %v446_v44 = vpack.c.bf16 %v2080_v34, %v408_v60  ;;  %v447_v48 = vpack.c.bf16 %v2126_v61, %v407_v23 }
 0x177   :  { %v1377_v45 = vpop.permute.xlu0 %1376 }
 0x178   :  { %v1379_v39 = vunpack.i.h.bf16 %v1377_v45  ;;  %v1378_v4 = vunpack.i.l.bf16 %v1377_v45  ;;  %v2380_v14 = vpop.permute.xlu2 %1396 }
 0x179   :  { %v1399_v50 = vunpack.i.h.bf16 %v2380_v14  ;;  %v1398_v54 = vunpack.i.l.bf16 %v2380_v14 }
 0x17a   :  { %v438_v26 = vsel %vm432_vm9, %v1359_v12, %v1378_v4  ;;  %v437_v3 = vsel %vm432_vm9, %v1378_v4, %v1379_v39 }
 0x17b   :  { %v456_v52 = vpack.c.bf16 %v438_v26, %v438_v26  ;;  %v457_v28 = vpack.c.bf16 %v437_v3, %v437_v3  ;;  %v405_v24 = vsel %vm401_vm13, %v1398_v54, %v1399_v50 }
 0x17d   :  { %915 = vrot.lane.b32.xlu0 %v2348_v16, %s1459_s1  ;;  %v724_v5 = vsel %vm550_vm12, %v456_v52, 0  ;;  %v727_v29 = vsel %vm550_vm12, %v457_v28, 0 }
 0x17e   :  { %789 = vmatpush.bf16.msrb.mxu1 %v724_v5  ;;  %802 = vmatpush.bf16.msrb.mxu2 %v727_v29 }
 0x17f   :  { %v1387_v41 = vpop.permute.xlu0 %1386 }
 0x180   :  { %v1389_v12 = vunpack.i.h.bf16 %v1387_v41  ;;  %v1388_v47 = vunpack.i.l.bf16 %v1387_v41  ;;  %v2410_v43 = vpop.permute.xlu2 %1411 }
 0x181   :  { %v1413_v15 = vunpack.i.l.bf16 %v2410_v43 }
 0x182   :  { %790 = vmatpush.bf16.msrb.mxu1 %v446_v44  ;;  %803 = vmatpush.bf16.msrb.mxu2 %v447_v48  ;;  %v2384_v9 = vsel %vm894_vm15, %v1369_v36, %v1388_v47  ;;  %v2390_v30 = vsel %vm894_vm15, %v1389_v12, %v1348_v0  ;;  %v2394_v58 = vsel %vm894_vm15, %v1388_v47, %v1389_v12  ;;  %v1414_v0 = vunpack.i.h.bf16 %v2410_v43 }
 0x183   :  { %947 = vrot.lane.b32.xlu2 %v2384_v9, %s1461_s10  ;;  %v1440_v34 = vpack.i.bf16 %v2390_v30, %v2394_v58  ;;  %v1445_v61 = vpack.i.bf16 %v2394_v58, %v2384_v9  ;;  %v449_v12 = vpack.c.bf16 %v2220_v25, %v405_v24 }
 0x184   :  { %v963_v20 = vsel %vm432_vm9, %v1413_v15, %v1414_v0 }
 0x185   :  { %953 = vrot.lane.b32.xlu0 %v2293_v62, %s1461_s10  ;;  %1441 = vrot.lane.b32.xlu1 %v1440_v34, %s1461_s10  ;;  %v975_v28 = vpack.c.bf16 %v963_v20, %v963_v20 }
 0x186   :  { %1233 = vmatmul.msk.bf16.vlgmr.msrb.gmra.mxu1 %vm546_vm14, %v2338_v33  ;;  %1234 = vmatmul.msk.bf16.vlgmr.msrb.gmra.mxu2 %vm546_vm14, %v2338_v33 }
 0x187   :  { %v991_v47 = vsel %vm550_vm12, %v975_v28, 0 }
 0x18b   :  { %1446 = vrot.lane.b32.xlu2 %v1445_v61, %s1459_s1 }
 0x18d   :  { %921 = vrot.lane.b32.xlu1 %v2390_v30, %s1459_s1 }
 0x18e   :  { %v2427_v27 = vpop.f32.mrf.mxu0 }
 0x190   :  { %v1402_v2 = vpop.permute.xlu0 %1401 }
 0x191   :  { %v1404_v37 = vunpack.i.h.bf16 %v1402_v2  ;;  %v1403_v46 = vunpack.i.l.bf16 %v1402_v2 }
 0x192   :  { %v1392_v22 = vpop.permute.xlu1 %1391 }
 0x193   :  { %v1394_v18 = vunpack.i.h.bf16 %v1392_v22  ;;  %v1393_v32 = vunpack.i.l.bf16 %v1392_v22  ;;  %v433_v19 = vsel %vm432_vm9, %v1403_v46, %v1404_v37  ;;  %1162 = vperm.xlu2 %1450, %v349_v63   ;;  %v442_v45 = vsel %vm432_vm9, %v1404_v37, %v1353_v10 }
 0x194   :  { %v461_v13 = vpack.c.bf16 %v433_v19, %v433_v19  ;;  %v462_v10 = vpack.c.bf16 %v442_v45, %v442_v45 }
 0x195   :  { %v436_v40 = vsel %vm432_vm9, %v1379_v39, %v1393_v32  ;;  %v435_v1 = vsel %vm432_vm9, %v1393_v32, %v1394_v18  ;;  %v434_v36 = vsel %vm432_vm9, %v1394_v18, %v1403_v46  ;;  %v406_v39 = vsel %vm401_vm13, %v1384_v53, %v1398_v54  ;;  %v2472_v54 = vpop.permute.xlu2 %1426 }
 0x196   :  { %v458_v35 = vpack.c.bf16 %v436_v40, %v436_v40  ;;  %v459_v55 = vpack.c.bf16 %v435_v1, %v435_v1  ;;  %v460_v21 = vpack.c.bf16 %v434_v36, %v434_v36  ;;  %v739_v4 = vsel %vm550_vm12, %v461_v13, 0  ;;  %v592_v14 = vpop.f32.mrf.mxu0  ;;  %v2500_v36 = vld [vmem:[%s2678_s4 + $0x8] sm:$0xf] }
 0x197   :  { %854 = vmatpush.bf16.msra.mxu2 %v739_v4  ;;  %v448_v41 = vpack.c.bf16 %v2122_v49, %v406_v39  ;;  %v742_v34 = vsel %vm550_vm12, %v462_v10, 0  ;;  %v1429_v42 = vunpack.i.h.bf16 %v2472_v54  ;;  %v1428_v18 = vunpack.i.l.bf16 %v2472_v54 }
 0x198   :  { %v730_v26 = vsel %vm550_vm12, %v458_v35, 0  ;;  %v733_v3 = vsel %vm550_vm12, %v459_v55, 0  ;;  %v736_v52 = vsel %vm550_vm12, %v460_v21, 0  ;;  %v2447_v6 = vpop.permute.xlu0 %1416 }
 0x199   :  { %815 = vmatpush.bf16.msrb.mxu3 %v730_v26  ;;  %828 = vmatpush.bf16.msra.mxu0 %v733_v3  ;;  %v1419_v5 = vunpack.i.h.bf16 %v2447_v6  ;;  %v1418_v53 = vunpack.i.l.bf16 %v2447_v6 }
 0x19a   :  { %841 = vmatpush.bf16.msra.mxu1 %v736_v52  ;;  %v1407_v29 = vpop.permute.xlu1 %1406 }
 0x19b   :  { %v1409_v60 = vunpack.i.h.bf16 %v1407_v29  ;;  %v1408_v23 = vunpack.i.l.bf16 %v1407_v29  ;;  %v962_v44 = vsel %vm432_vm9, %v1414_v0, %v1418_v53  ;;  %v961_v48 = vsel %vm432_vm9, %v1418_v53, %v1419_v5 }
 0x19c   :  { %v976_v61 = vpack.c.bf16 %v962_v44, %v962_v44  ;;  %v977_v37 = vpack.c.bf16 %v961_v48, %v961_v48 }
 0x19d   :  { %816 = vmatpush.bf16.msrb.mxu3 %v448_v41  ;;  %829 = vmatpush.bf16.msra.mxu0 %v449_v12  ;;  %v404_v49 = vsel %vm401_vm13, %v1399_v50, %v1408_v23  ;;  %v403_v25 = vsel %vm401_vm13, %v1408_v23, %v1409_v60  ;;  %v402_v22 = vsel %vm401_vm13, %v1409_v60, %v1373_v11 }
 0x19e   :  { %v450_v0 = vpack.c.bf16 %v2224_v56, %v404_v49  ;;  %v451_v2 = vpack.c.bf16 %v2214_v7, %v403_v25  ;;  %v994_v46 = vsel %vm550_vm12, %v976_v61, 0  ;;  %v997_v50 = vsel %vm550_vm12, %v977_v37, 0 }
 0x19f   :  { %v452_v56 = vpack.c.bf16 %v2098_v38, %v402_v22  ;;  %v2512_v35 = vpop.f32.mrf.mxu0 }
 0x1a0   :  { %1236 = vmatmul.msk.bf16.vlgmr.msra.gmra.mxu0 %vm546_vm14, %v2338_v33  ;;  %842 = vmatpush.bf16.msra.mxu1 %v450_v0 }
 0x1a1   :  { %867 = vmatpush.bf16.msra.mxu3 %v742_v34  ;;  %1026 = vmatpush.bf16.msrb.mxu0 %v991_v47 }
 0x1a2   :  { %855 = vmatpush.bf16.msra.mxu2 %v451_v2  ;;  %v1422_v7 = vpop.permute.xlu1 %1421  ;;  %1235 = vmatmul.msk.bf16.vlgmr.msrb.gmra.mxu3 %vm546_vm14, %v2338_v33 }
 0x1a3   :  { %v1424_v11 = vunpack.i.h.bf16 %v1422_v7  ;;  %v1423_v32 = vunpack.i.l.bf16 %v1422_v7  ;;  %1237 = vmatmul.msk.bf16.vlgmr.msra.gmra.mxu1 %vm546_vm14, %v2338_v33 }
 0x1a4   :  { %1039 = vmatpush.bf16.msrb.mxu1 %v994_v46  ;;  %v2522_v26 = vpop.f32.mrf.mxu3 }
 0x1a5   :  { %868 = vmatpush.bf16.msra.mxu3 %v452_v56  ;;  %1238 = vmatmul.msk.bf16.vlgmr.msra.gmra.mxu2 %vm546_vm14, %v2338_v33  ;;  %v934_v38 = vsel %vm401_vm13, %v1428_v18, %v1423_v32  ;;  %v933_v19 = vsel %vm401_vm13, %v1423_v32, %v1424_v11  ;;  %v932_v20 = vsel %vm401_vm13, %v1424_v11, %v1429_v42 }
 0x1a6   :  { %1052 = vmatpush.bf16.msrb.mxu2 %v997_v50  ;;  %v965_v63 = vpack.c.bf16 %v2264_v31, %v934_v38  ;;  %v966_v40 = vpack.c.bf16 %v2246_v59, %v933_v19  ;;  %v967_v1 = vpack.c.bf16 %v2260_v51, %v932_v20  ;;  %v2510_v59 = vpop.f32.mrf.mxu1  ;;  %v616_v51 = vpop.f32.mrf.mxu2 }
 0x1a7   :  { %v644_v21 = vpop.f32.mrf.mxu0 }
 0x1a8   :  { %1027 = vmatpush.bf16.msrb.mxu0 %v965_v63  ;;  %1040 = vmatpush.bf16.msrb.mxu1 %v966_v40 }
 0x1aa   :  { %1053 = vmatpush.bf16.msrb.mxu2 %v967_v1 }
 0x1ac   :  { %v631_v12 = vpop.f32.mrf.mxu3 }
 0x1ae   :  { %v605_v31 = vpop.f32.mrf.mxu1  ;;  %v618_v13 = vpop.f32.mrf.mxu2 }
 0x1af   :  { %v2518_v39 = vpop.f32.mrf.mxu0 }
 0x1b0   :  { %1241 = vmatmul.msk.bf16.vlgmr.msrb.gmra.mxu0 %vm546_vm14, %v2500_v36 }
 0x1b2   :  { %1239 = vmatmul.msk.bf16.vlgmr.msra.gmra.mxu3 %vm546_vm14, %v2338_v33 }
 0x1b3   :  { %1242 = vmatmul.msk.bf16.vlgmr.msrb.gmra.mxu1 %vm546_vm14, %v2500_v36 }
 0x1b5   :  { %1243 = vmatmul.msk.bf16.vlgmr.msrb.gmra.mxu2 %vm546_vm14, %v2500_v36 }
 0x1b6   :  { %v2514_v55 = vpop.f32.mrf.mxu1  ;;  %v2516_v45 = vpop.f32.mrf.mxu2 }
 0x1b7   :  { %v696_v3 = vpop.f32.mrf.mxu0 }
 0x1be   :  { %v657_v4 = vpop.f32.mrf.mxu1  ;;  %v670_v24 = vpop.f32.mrf.mxu2 }
 0x1c6   :  { %v2520_v33 = vpop.f32.mrf.mxu1 }
 0x1ce   :  { %v709_v52 = vpop.f32.mrf.mxu1 }
 0x1dd   :  { %v948_v23 = vpop.permute.xlu2 %947 }
 0x1e5   :  { %v1447_v32 = vpop.permute.xlu2 %1446 }
 0x1e6   :  { %v1449_v38 = vunpack.i.h.bf16 %v1447_v32 }
 0x1e7   :  { %v1432_v28 = vpop.permute.xlu0 %1431  ;;  %v1437_v10 = vpop.permute.xlu1 %1436 }
 0x1e8   :  { %v1434_v53 = vunpack.i.h.bf16 %v1432_v28  ;;  %v1433_v29 = vunpack.i.l.bf16 %v1432_v28  ;;  %v1438_v60 = vunpack.i.l.bf16 %v1437_v10  ;;  %v1439_v41 = vunpack.i.h.bf16 %v1437_v10 }
 0x1ea   :  { %v960_v47 = vsel %vm432_vm9, %v1419_v5, %v1433_v29  ;;  %v959_v44 = vsel %vm432_vm9, %v1433_v29, %v1434_v53  ;;  %v958_v48 = vsel %vm432_vm9, %v1434_v53, %v948_v23  ;;  %v931_v25 = vsel %vm401_vm13, %v1429_v42, %v1438_v60  ;;  %v681_v42 = vpop.f32.mrf.mxu3 }
 0x1eb   :  { %v978_v14 = vpack.c.bf16 %v960_v47, %v960_v47  ;;  %v979_v34 = vpack.c.bf16 %v959_v44, %v959_v44  ;;  %v980_v49 = vpack.c.bf16 %v958_v48, %v958_v48  ;;  %v930_v5 = vsel %vm401_vm13, %v1438_v60, %v1439_v41 }
 0x1ec   :  { %v968_v50 = vpack.c.bf16 %v2256_v57, %v931_v25  ;;  %v969_v56 = vpack.c.bf16 %v2354_v17, %v930_v5 }
 0x1ed   :  { %v1000_v61 = vsel %vm550_vm12, %v978_v14, 0  ;;  %v1003_v0 = vsel %vm550_vm12, %v979_v34, 0  ;;  %v1006_v6 = vsel %vm550_vm12, %v980_v49, 0 }
 0x1ee   :  { %1065 = vmatpush.bf16.msrb.mxu3 %v1000_v61  ;;  %1078 = vmatpush.bf16.msra.mxu0 %v1003_v0  ;;  %v779_v2 = vpop.f32.mrf.mxu0 }
 0x1ef   :  { %1091 = vmatpush.bf16.msra.mxu1 %v1006_v6  ;;  %v916_v37 = vpop.permute.xlu0 %915  ;;  %v2539_v46 = vadd.f32 %v779_v2, %v616_v51 }
 0x1f0   :  { %v929_v22 = vsel %vm401_vm13, %v1439_v41, %v916_v37 }
 0x1f1   :  { %v970_v7 = vpack.c.bf16 %v2348_v16, %v929_v22  ;;  %v1448_v16 = vunpack.i.l.bf16 %v1447_v32 }
 0x1f2   :  { %1066 = vmatpush.bf16.msrb.mxu3 %v968_v50  ;;  %1079 = vmatpush.bf16.msra.mxu0 %v969_v56  ;;  %v683_v51 = vpop.f32.mrf.mxu3  ;;  %v1175_v56 = vld [vmem:[%s2680_s0] sm:$0xff] }
 0x1f3   :  { %1092 = vmatpush.bf16.msra.mxu1 %v970_v7  ;;  %v753_v11 = vpop.f32.mrf.mxu2  ;;  %v928_v28 = vsel %vm401_vm13, %v916_v37, %v1448_v16  ;;  %v2595_v37 = vpop.permute.xlu2 %1162 }
 0x1f4   :  { %v754_v5 = vadd.f32 %v753_v11, %v2427_v27  ;;  %v1176_v27 = vld [vmem:[%s2680_s0 + $0x8] sm:$0xff] }
 0x1f5   :  { %1244 = vmatmul.msk.bf16.vlgmr.msrb.gmra.mxu3 %vm546_vm14, %v2500_v36  ;;  %1245 = vmatmul.msk.bf16.vlgmr.msra.gmra.mxu0 %vm546_vm14, %v2500_v36 }
 0x1f6   :  { %1246 = vmatmul.msk.bf16.vlgmr.msra.gmra.mxu1 %vm546_vm14, %v2500_v36  ;;  %v781_v57 = vpop.f32.mrf.mxu0 }
 0x1f7   :  { %v954_v17 = vpop.permute.xlu0 %953  ;;  %v1442_v19 = vpop.permute.xlu1 %1441 }
 0x1f8   :  { %v964_v20 = vsel %vm432_vm9, %v954_v17, %v1413_v15  ;;  %v1444_v63 = vunpack.i.h.bf16 %v1442_v19  ;;  %v1443_v40 = vunpack.i.l.bf16 %v1442_v19  ;;  %v927_v15 = vsel %vm401_vm13, %v1448_v16, %v1449_v38 }
 0x1f9   :  { %v984_v1 = vpack.c.bf16 %v964_v20, %v964_v20  ;;  %v972_v47 = vpack.c.bf16 %v2394_v58, %v927_v15 }
 0x1fa   :  { %v957_v31 = vsel %vm432_vm9, %v948_v23, %v1443_v40  ;;  %v956_v13 = vsel %vm432_vm9, %v1443_v40, %v1444_v63  ;;  %v955_v21 = vsel %vm432_vm9, %v1444_v63, %v954_v17  ;;  %v971_v23 = vpack.c.bf16 %v2384_v9, %v928_v28  ;;  %v766_v14 = vpop.f32.mrf.mxu3 }
 0x1fb   :  { %v1018_v4 = vsel %vm550_vm12, %v984_v1, 0  ;;  %v981_v24 = vpack.c.bf16 %v957_v31, %v957_v31  ;;  %v982_v43 = vpack.c.bf16 %v956_v13, %v956_v13  ;;  %v983_v3 = vpack.c.bf16 %v955_v21, %v955_v21  ;;  %v755_v52 = vpop.f32.mrf.mxu2 }
 0x1fc   :  { %1143 = vmatpush.bf16.msrb.mxu1 %v1018_v4 }
 0x1fd   :  { %v1009_v10 = vsel %vm550_vm12, %v981_v24, 0  ;;  %v1012_v53 = vsel %vm550_vm12, %v982_v43, 0  ;;  %v1015_v29 = vsel %vm550_vm12, %v983_v3, 0 }
 0x1fe   :  { %1104 = vmatpush.bf16.msra.mxu2 %v1009_v10  ;;  %1117 = vmatpush.bf16.msra.mxu3 %v1012_v53 }
 0x1ff   :  { %1130 = vmatpush.bf16.msrb.mxu0 %v1015_v29  ;;  %v922_v60 = vpop.permute.xlu1 %921 }
 0x200   :  { %v925_v41 = vsel %vm401_vm13, %v922_v60, %v1428_v18  ;;  %v926_v12 = vsel %vm401_vm13, %v1449_v38, %v922_v60 }
 0x201   :  { %v973_v44 = vpack.c.bf16 %v2390_v30, %v926_v12  ;;  %v974_v48 = vpack.c.bf16 %v2293_v62, %v925_v41 }
 0x202   :  { %1105 = vmatpush.bf16.msra.mxu2 %v971_v23  ;;  %1118 = vmatpush.bf16.msra.mxu3 %v972_v47  ;;  %v768_v62 = vpop.f32.mrf.mxu3 }
 0x203   :  { %1131 = vmatpush.bf16.msrb.mxu0 %v973_v44  ;;  %1144 = vmatpush.bf16.msrb.mxu1 %v974_v48  ;;  %v792_v9 = vpop.f32.mrf.mxu1 }
 0x204   :  { %v793_v54 = vadd.f32 %v792_v9, %v2522_v26 }
 0x205   :  { %1247 = vmatmul.msk.bf16.vlgmr.msra.gmra.mxu2 %vm546_vm14, %v2500_v36  ;;  %1248 = vmatmul.msk.bf16.vlgmr.msra.gmra.mxu3 %vm546_vm14, %v2500_v36 }
 0x206   :  { %1249 = vmatmul.msk.bf16.vlgmr.msrb.gmra.mxu0 %vm546_vm14, %v2500_v36  ;;  %1250 = vmatmul.msk.bf16.vlgmr.msrb.gmra.mxu1 %vm546_vm14, %v2500_v36 }
 0x209   :  { %v805_v8 = vpop.f32.mrf.mxu2 }
 0x20a   :  { %v806_v30 = vadd.f32 %v805_v8, %v2512_v35  ;;  %v767_v35 = vadd.f32 %v766_v14, %v2510_v59 }
 0x20b   :  { %v794_v58 = vpop.f32.mrf.mxu1 }
 0x211   :  { %v807_v18 = vpop.f32.mrf.mxu2 }
 0x21d   :  { %v2590_v34 = vpop.f32.mrf.mxu0 }
 0x220   :  { %v844_v26 = vpop.f32.mrf.mxu1 }
 0x221   :  { %v2592_v49 = vadd.f32 %v844_v26, %v681_v42 }
 0x225   :  { %v833_v25 = vpop.f32.mrf.mxu0  ;;  %v818_v61 = vpop.f32.mrf.mxu3 }
 0x226   :  { %v819_v13 = vadd.f32 %v818_v61, %v2514_v55 }
 0x228   :  { %v857_v0 = vpop.f32.mrf.mxu2  ;;  %v846_v6 = vpop.f32.mrf.mxu1 }
 0x229   :  { %v858_v44 = vadd.f32 %v857_v0, %v2518_v39  ;;  %v832_v39 = vadd.f32 %v2590_v34, %v2516_v45 }
 0x22d   :  { %v1029_v2 = vpop.f32.mrf.mxu0  ;;  %v820_v22 = vpop.f32.mrf.mxu3 }
 0x22e   :  { %v1150_v36 = vadd.f32 %v1029_v2, %v754_v5 }
 0x230   :  { %v859_v50 = vpop.f32.mrf.mxu2  ;;  %v1165_v7 = vadd.f32 %v2595_v37, %v1150_v36  ;;  %v1042_v42 = vpop.f32.mrf.mxu1 }
 0x231   :  { %v1151_v32 = vadd.f32 %v1042_v42, %v767_v35 }
 0x232   :  { %v1185_v57 = vadd.f32 %v1175_v56, %v1165_v7 }
 0x233   :  { %v1166_v11 = vadd.f32 %v2595_v37, %v1151_v32 }
 0x234   :  { %1195 = vst [vmem:[%s2681_s6] sm:$0xff] %v1185_v57 }
 0x235   :  { %v1186_v59 = vadd.f32 %v1176_v27, %v1166_v11  ;;  %v1031_v38 = vpop.f32.mrf.mxu0  ;;  %v870_v17 = vpop.f32.mrf.mxu3 }
 0x236   :  { %v871_v48 = vadd.f32 %v870_v17, %v2520_v33 }
 0x237   :  { %1196 = vst [vmem:[%s2681_s6 + $0x8] sm:$0xff] %v1186_v59 }
 0x238   :  { %v1055_v19 = vpop.f32.mrf.mxu2  ;;  %v1044_v20 = vpop.f32.mrf.mxu1 }
 0x239   :  { %v1152_v16 = vadd.f32 %v1055_v19, %v2539_v46 }
 0x23b   :  { %v1167_v40 = vadd.f32 %v2595_v37, %v1152_v16 }
 0x23d   :  { %v872_v51 = vpop.f32.mrf.mxu3 }
 0x23e   :  { %v1177_v63 = vld [vmem:[%s2680_s0 + $0x10] sm:$0xff] }
 0x23f   :  { %v1187_v1 = vadd.f32 %v1177_v63, %v1167_v40 }
 0x240   :  { %v1057_v31 = vpop.f32.mrf.mxu2 }
 0x241   :  { %1197 = vst [vmem:[%s2681_s6 + $0x10] sm:$0xff] %v1187_v1 }
 0x248   :  { %v1179_v46 = vld [vmem:[%s2680_s0 + $0x20] sm:$0xff]  ;;  %v1180_v52 = vld [vmem:[%s2680_s0 + $0x28] sm:$0xff] }
 0x272   :  { %v1081_v21 = vpop.f32.mrf.mxu0 }
 0x273   :  { %v1154_v4 = vadd.f32 %v1081_v21, %v806_v30  ;;  %v1094_v24 = vpop.f32.mrf.mxu1 }
 0x274   :  { %v1155_v43 = vadd.f32 %v1094_v24, %v819_v13 }
 0x275   :  { %v1169_v3 = vadd.f32 %v2595_v37, %v1154_v4 }
 0x276   :  { %v1170_v15 = vadd.f32 %v2595_v37, %v1155_v43 }
 0x277   :  { %v1189_v28 = vadd.f32 %v1179_v46, %v1169_v3 }
 0x278   :  { %v1190_v10 = vadd.f32 %v1180_v52, %v1170_v15  ;;  %v1068_v53 = vpop.f32.mrf.mxu3 }
 0x279   :  { %1199 = vst [vmem:[%s2681_s6 + $0x20] sm:$0xff] %v1189_v28  ;;  %v1153_v55 = vadd.f32 %v1068_v53, %v793_v54 }
 0x27a   :  { %1200 = vst [vmem:[%s2681_s6 + $0x28] sm:$0xff] %v1190_v10  ;;  %v1083_v60 = vpop.f32.mrf.mxu0 }
 0x27b   :  { %v1168_v23 = vadd.f32 %v2595_v37, %v1153_v55  ;;  %v1096_v41 = vpop.f32.mrf.mxu1 }
 0x280   :  { %v1070_v47 = vpop.f32.mrf.mxu3 }
 0x281   :  { %v1178_v29 = vld [vmem:[%s2680_s0 + $0x18] sm:$0xff] }
 0x282   :  { %v1188_v12 = vadd.f32 %v1178_v29, %v1168_v23 }
 0x283   :  { %v1133_v14 = vpop.f32.mrf.mxu0  ;;  %v1146_v9 = vpop.f32.mrf.mxu1 }
 0x284   :  { %1198 = vst [vmem:[%s2681_s6 + $0x18] sm:$0xff] %v1188_v12  ;;  %v1158_v54 = vadd.f32 %v1133_v14, %v858_v44  ;;  %v1159_v8 = vadd.f32 %v1146_v9, %v871_v48 }
 0x286   :  { %v1173_v58 = vadd.f32 %v2595_v37, %v1158_v54  ;;  %v1174_v18 = vadd.f32 %v2595_v37, %v1159_v8 }
 0x288   :  { %v1107_v25 = vpop.f32.mrf.mxu2  ;;  %v1120_v61 = vpop.f32.mrf.mxu3 }
 0x289   :  { %v1156_v0 = vadd.f32 %v1107_v25, %v832_v39  ;;  %v1157_v6 = vadd.f32 %v1120_v61, %v2592_v49 }
 0x28b   :  { %v1183_v62 = vld [vmem:[%s2680_s0 + $0x40] sm:$0xff]  ;;  %v1184_v30 = vld [vmem:[%s2680_s0 + $0x48] sm:$0xff]  ;;  %v1171_v45 = vadd.f32 %v2595_v37, %v1156_v0  ;;  %v1172_v34 = vadd.f32 %v2595_v37, %v1157_v6  ;;  %v1135_v49 = vpop.f32.mrf.mxu0  ;;  %v1148_v36 = vpop.f32.mrf.mxu1 }
 0x28c   :  { %v1193_v33 = vadd.f32 %v1183_v62, %v1173_v58  ;;  %v1194_v26 = vadd.f32 %v1184_v30, %v1174_v18 }
 0x28e   :  { %1203 = vst [vmem:[%s2681_s6 + $0x40] sm:$0xff] %v1193_v33 }
 0x290   :  { %v1109_v50 = vpop.f32.mrf.mxu2  ;;  %v1122_v56 = vpop.f32.mrf.mxu3 }
 0x295   :  { %v1181_v5 = vld [vmem:[%s2680_s0 + $0x30] sm:$0xff]  ;;  %v1182_v2 = vld [vmem:[%s2680_s0 + $0x38] sm:$0xff] }
 0x296   :  { %1204 = vst [vmem:[%s2681_s6 + $0x48] sm:$0xff] %v1194_v26  ;;  %v1191_v22 = vadd.f32 %v1181_v5, %v1171_v45  ;;  %v1192_v35 = vadd.f32 %v1182_v2, %v1172_v34 }
 0x298   :  { %1201 = vst [vmem:[%s2681_s6 + $0x30] sm:$0xff] %v1191_v22 }
 0x299   :  { %1202 = vst [vmem:[%s2681_s6 + $0x38] sm:$0xff] %v1192_v35 }

// kernel: tlu_forward.2
= control target key start
LH: loop header
LB: loop body
LE: loop exit
PB: predicated region body
PF: predicated region fallthrough
CT: control target
= control target key end

     0   :  { %s2483_s7 = smov 32   ;;  %s2484_s8 = smov 127   ;;  %v23_v31 = vlaneseq  ;;  %vm4409_vm4 = vcmask 1043456   ;;  %vm4407_vm5 = vcmask 195584   ;;  %s4396_s0 = inlined_call_operand.vmem [shape: f32[8,1280], index: 0, kind: input, shape index: {}]   ;;  %s4397_s1 = inlined_call_operand.vmem [shape: bf16[3,8,24], index: 1, kind: input, shape index: {}]   ;;  %s4398_s2 = inlined_call_operand.vmem [shape: f32[8,1], index: 2, kind: input, shape index: {}]   ;;  %s4399_s3 = inlined_call_operand.vmem [shape: bf16[3,8,24], index: 3, kind: input, shape index: {}]   ;;  %s4400_s4 = inlined_call_operand.vmem [shape: f32[8,1], index: 4, kind: input, shape index: {}]   ;;  %s4401_s5 = inlined_call_operand.vmem [shape: bf16[8,1280], index: 5, kind: output, shape index: {0}]   ;;  %s4402_s6 = inlined_call_operand.vmem [shape: f32[1,16,128], index: 6, kind: output, shape index: {1}]  }
   0x1   :  { %v2529_v0 = vld [vmem:[%s4396_s0 + $0x10] sm:$0xff]  ;;  %v2534_v1 = vld [vmem:[%s4396_s0 + $0x18] sm:$0xff]  ;;  %v2539_v2 = vld [vmem:[%s4396_s0 + $0x8] sm:$0xff]  ;;  %s2485_s13 = smov 1  }
   0x2   :  { %v2111_v3 = vpack.i.bf16 %v2534_v1, %v2529_v0  ;;  %v2101_v4 = vpack.i.bf16 %v2529_v0, %v2539_v2  ;;  %v2548_v5 = vld [vmem:[%s4396_s0] sm:$0xff]  ;;  %v2553_v6 = vld [vmem:[%s4396_s0 + $0x28] sm:$0xff]  ;;  %v2581_v13 = vld [vmem:[%s4396_s0 + $0x30] sm:$0xff]  ;;  %v2633_v32 = vand.u32 127, %v23_v31 }
   0x3   :  { %v2121_v7 = vpack.i.bf16 %v2553_v6, %v2548_v5  ;;  %v2562_v8 = vld [vmem:[%s4396_s0 + $0x20] sm:$0xff]  ;;  %v2106_v10 = vpack.i.bf16 %v2539_v2, %v2548_v5  ;;  %v2572_v11 = vld [vmem:[%s4396_s0 + $0x48] sm:$0xff]  ;;  %v2136_v14 = vpack.i.bf16 %v2534_v1, %v2581_v13  ;;  %v2600_v18 = vld [vmem:[%s4396_s0 + $0x38] sm:$0xff]  ;;  %v2146_v20 = vpack.i.bf16 %v2529_v0, %v2553_v6 }
   0x4   :  { %2112 = vrot.lane.b32.xlu1 %v2111_v3, %s2483_s7  ;;  %2102 = vrot.lane.b32.xlu0 %v2101_v4, %s2484_s8  ;;  %v2116_v9 = vpack.i.bf16 %v2539_v2, %v2562_v8  ;;  %v2126_v12 = vpack.i.bf16 %v2572_v11, %v2548_v5  ;;  %v2131_v15 = vpack.i.bf16 %v2562_v8, %v2572_v11  ;;  %v2591_v16 = vld [vmem:[%s4396_s0 + $0x40] sm:$0xff]  ;;  %s2486_s0 = smov 96   ;;  %vm4406_vm0 = vcmp.lt.s32.totalorder %v2633_v32, 32 }
   0x5   :  { %2122 = vrot.lane.b32.xlu2 %v2121_v7, %s2484_s8  ;;  %v2141_v17 = vpack.i.bf16 %v2581_v13, %v2591_v16  ;;  %v2151_v19 = vpack.i.bf16 %v2553_v6, %v2600_v18  ;;  %v2156_v21 = vpack.i.bf16 %v2572_v11, %v2562_v8  ;;  %v2161_v22 = vpack.i.bf16 %v2591_v16, %v2534_v1 }
   0x6   :  { %v2166_v23 = vpack.i.bf16 %v2591_v16, %v2600_v18  ;;  %v2176_v24 = vpack.i.bf16 %v2548_v5, %v2534_v1  ;;  %v2181_v25 = vpack.i.bf16 %v2600_v18, %v2581_v13  ;;  %v2186_v26 = vpack.i.bf16 %v2553_v6, %v2572_v11 }
   0x7   :  { %v2206_v55 = vpack.i.bf16 %v2591_v16, %v2562_v8  ;;  %vm4405_vm1 = vcmp.lt.s32.totalorder %v2633_v32, 96  ;;  %vm4408_vm2 = vcmp.lt.s32.totalorder %v2633_v32, 1  ;;  %vm4410_vm3 = vcmp.lt.s32.totalorder %v2633_v32, 127 }
   0xc   :  { %2117 = vrot.lane.b32.xlu1 %v2116_v9, %s2483_s7  ;;  %2107 = vrot.lane.b32.xlu0 %v2106_v10, %s2485_s13 }
   0xd   :  { %2127 = vrot.lane.b32.xlu2 %v2126_v12, %s2483_s7 }
  0x14   :  { %2137 = vrot.lane.b32.xlu1 %v2136_v14, %s2484_s8  ;;  %2132 = vrot.lane.b32.xlu0 %v2131_v15, %s2485_s13 }
  0x15   :  { %2142 = vrot.lane.b32.xlu2 %v2141_v17, %s2483_s7 }
  0x1c   :  { %2152 = vrot.lane.b32.xlu1 %v2151_v19, %s2483_s7  ;;  %2147 = vrot.lane.b32.xlu0 %v2146_v20, %s2485_s13 }
  0x1d   :  { %2157 = vrot.lane.b32.xlu2 %v2156_v21, %s2484_s8 }
  0x24   :  { %2162 = vrot.lane.b32.xlu0 %v2161_v22, %s2485_s13  ;;  %2167 = vrot.lane.b32.xlu1 %v2166_v23, %s2484_s8 }
  0x25   :  { %2172 = vrot.lane.b32.xlu2 %v2101_v4, %s2486_s0 }
  0x2c   :  { %2177 = vrot.lane.b32.xlu0 %v2176_v24, %s2486_s0  ;;  %2182 = vrot.lane.b32.xlu1 %v2181_v25, %s2485_s13 }
  0x2d   :  { %2187 = vrot.lane.b32.xlu2 %v2186_v26, %s2486_s0 }
  0x34   :  { %2192 = vrot.lane.b32.xlu0 %v2181_v25, %s2486_s0 }
  0x5f   :  { %v2629_v27 = vpop.permute.xlu2 %2122 }
  0x60   :  { %v2125_v20 = vunpack.i.h.bf16 %v2629_v27  ;;  %v2124_v21 = vunpack.i.l.bf16 %v2629_v27 }
  0x67   :  { %v2128_v28 = vpop.permute.xlu2 %2127 }
  0x68   :  { %v2130_v33 = vunpack.i.h.bf16 %v2128_v28  ;;  %v2129_v34 = vunpack.i.l.bf16 %v2128_v28 }
  0x6a   :  { %v2640_v42 = vsel %vm4406_vm0, %v2130_v33, %v2129_v34 }
  0x6f   :  { %v2143_v37 = vpop.permute.xlu2 %2142 }
  0x70   :  { %v2144_v43 = vunpack.i.l.bf16 %v2143_v37  ;;  %v2145_v57 = vunpack.i.h.bf16 %v2143_v37 }
  0x72   :  { %v2669_v51 = vsel %vm4406_vm0, %v2144_v43, %v2130_v33 }
  0x73   :  { %v2221_v54 = vpack.i.bf16 %v2669_v51, %v2640_v42 }
  0x76   :  { %v2113_v29 = vpop.permute.xlu1 %2112  ;;  %v2631_v30 = vpop.permute.xlu0 %2102 }
  0x77   :  { %v2115_v35 = vunpack.i.h.bf16 %v2113_v29  ;;  %v2114_v36 = vunpack.i.l.bf16 %v2113_v29  ;;  %v2680_v56 = vpop.permute.xlu2 %2157  ;;  %v2105_v23 = vunpack.i.h.bf16 %v2631_v30  ;;  %v2104_v24 = vunpack.i.l.bf16 %v2631_v30 }
  0x78   :  { %v2160_v25 = vunpack.i.h.bf16 %v2680_v56  ;;  %v2159_v26 = vunpack.i.l.bf16 %v2680_v56 }
  0x79   :  { %v2648_v45 = vsel %vm4406_vm0, %v2114_v36, %v2115_v35 }
  0x7e   :  { %v2118_v38 = vpop.permute.xlu1 %2117  ;;  %v2635_v39 = vpop.permute.xlu0 %2107 }
  0x7f   :  { %v2120_v40 = vunpack.i.h.bf16 %v2118_v38  ;;  %v2119_v41 = vunpack.i.l.bf16 %v2118_v38  ;;  %v2173_v12 = vpop.permute.xlu2 %2172  ;;  %v2110_v29 = vunpack.i.h.bf16 %v2635_v39 }
  0x80   :  { %v2175_v15 = vunpack.i.h.bf16 %v2173_v12  ;;  %v2174_v17 = vunpack.i.l.bf16 %v2173_v12 }
  0x81   :  { %v2644_v44 = vsel %vm4406_vm0, %v2115_v35, %v2119_v41  ;;  %v2652_v46 = vsel %vm4406_vm0, %v2129_v34, %v2120_v40  ;;  %v2656_v47 = vsel %vm4406_vm0, %v2120_v40, %v2114_v36  ;;  %v2109_v35 = vunpack.i.l.bf16 %v2635_v39 }
  0x82   :  { %v2196_v48 = vpack.i.bf16 %v2644_v44, %v2648_v45  ;;  %v2211_v49 = vpack.i.bf16 %v2652_v46, %v2640_v42  ;;  %v2201_v50 = vpack.i.bf16 %v2648_v45, %v2656_v47  ;;  %v2722_v22 = vsel %vm4405_vm1, %v2174_v17, %v2175_v15 }
  0x84   :  { %2197 = vrot.lane.b32.xlu2 %v2196_v48, %s2484_s8  ;;  %2212 = vrot.lane.b32.xlu1 %v2211_v49, %s2484_s8 }
  0x85   :  { %2202 = vrot.lane.b32.xlu0 %v2201_v50, %s2485_s13  ;;  %v464_v50 = vsel %vm4410_vm3, %v2124_v21, %v2104_v24 }
  0x86   :  { %v2671_v52 = vpop.permute.xlu1 %2137  ;;  %v2673_v53 = vpop.permute.xlu0 %2132 }
  0x87   :  { %v2140_v31 = vunpack.i.h.bf16 %v2671_v52  ;;  %v2139_v36 = vunpack.i.l.bf16 %v2671_v52  ;;  %v2135_v30 = vunpack.i.h.bf16 %v2673_v53  ;;  %v2134_v38 = vunpack.i.l.bf16 %v2673_v53  ;;  %v2757_v49 = vpop.permute.xlu2 %2187 }
  0x88   :  { %v463_v53 = vsel %vm4410_vm3, %v2104_v24, %v2105_v23 }
  0x8c   :  { %2222 = vrot.lane.b32.xlu2 %v2221_v54, %s2485_s13 }
  0x8d   :  { %2207 = vrot.lane.b32.xlu0 %v2206_v55, %s2486_s0  ;;  %v476_v55 = vpack.c.bf16 %v464_v50, %v464_v50 }
  0x8e   :  { %v2153_v58 = vpop.permute.xlu1 %2152  ;;  %v2683_v59 = vpop.permute.xlu0 %2147 }
  0x8f   :  { %v2155_v60 = vunpack.i.h.bf16 %v2153_v58  ;;  %v2154_v61 = vunpack.i.l.bf16 %v2153_v58  ;;  %v2150_v40 = vunpack.i.h.bf16 %v2683_v59  ;;  %v2149_v54 = vunpack.i.l.bf16 %v2683_v59 }
  0x90   :  { %v462_v58 = vsel %vm4410_vm3, %v2105_v23, %v2140_v31  ;;  %v494_v12 = vsel %vm4409_vm4, %v476_v55, 0 }
  0x91   :  { %v2687_v62 = vsel %vm4406_vm0, %v2154_v61, %v2144_v43  ;;  %v2691_v63 = vsel %vm4406_vm0, %v2119_v41, %v2155_v60  ;;  %v2695_v3 = vsel %vm4406_vm0, %v2145_v57, %v2154_v61  ;;  %v2710_v14 = vsel %vm4406_vm0, %v2155_v60, %v2145_v57  ;;  %529 = vmatpush.bf16.msra.mxu0 %v494_v12 }
  0x92   :  { %v2231_v4 = vpack.i.bf16 %v2691_v63, %v2687_v62  ;;  %v2216_v7 = vpack.i.bf16 %v2695_v3, %v2656_v47  ;;  %v2236_v9 = vpack.i.bf16 %v2644_v44, %v2695_v3  ;;  %v2226_v19 = vpack.i.bf16 %v2710_v14, %v2652_v46 }
  0x93   :  { %v2241_v37 = vpack.i.bf16 %v2722_v22, %v2710_v14  ;;  %v477_v57 = vpack.c.bf16 %v463_v53, %v463_v53  ;;  %v478_v60 = vpack.c.bf16 %v462_v58, %v462_v58  ;;  %v434_v61 = vsel %vm4408_vm2, %v2109_v35, %v2110_v29 }
  0x94   :  { %2232 = vrot.lane.b32.xlu2 %v2231_v4, %s2484_s8  ;;  %2217 = vrot.lane.b32.xlu1 %v2216_v7, %s2484_s8  ;;  %v459_v4 = vsel %vm4410_vm3, %v2125_v20, %v2139_v36  ;;  %v467_v24 = vpack.c.bf16 %v2539_v2, %v434_v61  ;;  %v2256_v53 = vpack.i.bf16 %v2687_v62, %v2722_v22  ;;  %v2826_v61 = vld [vmem:[%s4397_s1 + $0x4] sm:$0xf] }
  0x95   :  { %2237 = vrot.lane.b32.xlu0 %v2236_v9, %s2485_s13  ;;  %v2190_v9 = vunpack.i.h.bf16 %v2757_v49  ;;  %v500_v23 = vsel %vm4409_vm4, %v478_v60, 0  ;;  %v465_v12 = vsel %vm4410_vm3, %v2160_v25, %v2124_v21 }
  0x96   :  { %v2706_v10 = vpop.permute.xlu0 %2162  ;;  %v2780_v7 = vpop.permute.xlu1 %2167  ;;  %555 = vmatpush.bf16.msra.mxu2 %v500_v23 }
  0x97   :  { %v2165_v2 = vunpack.i.h.bf16 %v2706_v10  ;;  %v2169_v60 = vunpack.i.l.bf16 %v2780_v7 }
  0x99   :  { %v426_v27 = vsel %vm4408_vm2, %v2165_v2, %v2134_v38 }
  0x9c   :  { %2227 = vrot.lane.b32.xlu1 %v2226_v19, %s2485_s13 }
  0x9e   :  { %v2728_v28 = vpop.permute.xlu0 %2177  ;;  %v2844_v21 = vpop.permute.xlu1 %2182 }
  0x9f   :  { %v2180_v33 = vunpack.i.h.bf16 %v2728_v28  ;;  %v2179_v34 = vunpack.i.l.bf16 %v2728_v28 }
  0xa1   :  { %v2745_v41 = vsel %vm4405_vm1, %v2180_v33, %v2174_v17  ;;  %v2751_v39 = vsel %vm4405_vm1, %v2175_v15, %v2179_v34  ;;  %v497_v15 = vsel %vm4409_vm4, %v477_v57, 0  ;;  %v481_v17 = vpack.c.bf16 %v459_v4, %v459_v4 }
  0xa2   :  { %v2246_v43 = vpack.i.bf16 %v2745_v41, %v2691_v63  ;;  %v2251_v48 = vpack.i.bf16 %v2669_v51, %v2751_v39  ;;  %542 = vmatpush.bf16.msra.mxu1 %v497_v15  ;;  %v485_v15 = vpack.c.bf16 %v465_v12, %v465_v12 }
  0xa3   :  { %v509_v57 = vsel %vm4409_vm4, %v481_v17, 0 }
  0xa4   :  { %2242 = vrot.lane.b32.xlu1 %v2241_v37, %s2484_s8  ;;  %2247 = vrot.lane.b32.xlu2 %v2246_v43, %s2485_s13  ;;  %v435_v37 = vsel %vm4408_vm2, %v2134_v38, %v2109_v35  ;;  %v433_v43 = vsel %vm4408_vm2, %v2110_v29, %v2150_v40  ;;  %v430_v29 = vsel %vm4408_vm2, %v2135_v30, %v2149_v54 }
  0xa5   :  { %2252 = vrot.lane.b32.xlu0 %v2251_v48, %s2484_s8  ;;  %v2164_v48 = vunpack.i.l.bf16 %v2706_v10  ;;  %v466_v55 = vpack.c.bf16 %v2548_v5, %v435_v37  ;;  %v468_v35 = vpack.c.bf16 %v2529_v0, %v433_v43  ;;  %v460_v0 = vsel %vm4410_vm3, %v2159_v26, %v2125_v20 }
  0xa6   :  { %v2786_v19 = vpop.permute.xlu0 %2192  ;;  %543 = vmatpush.bf16.msra.mxu1 %v467_v24  ;;  %v480_v4 = vpack.c.bf16 %v460_v0, %v460_v0  ;;  %v471_v20 = vpack.c.bf16 %v2553_v6, %v430_v29  ;;  %v461_v6 = vsel %vm4410_vm3, %v2140_v31, %v2159_v26  ;;  %v2184_v37 = vunpack.i.l.bf16 %v2844_v21 }
  0xa7   :  { %v2194_v50 = vunpack.i.l.bf16 %v2786_v19  ;;  %530 = vmatpush.bf16.msra.mxu0 %v466_v55  ;;  %556 = vmatpush.bf16.msra.mxu2 %v468_v35  ;;  %v431_v17 = vsel %vm4408_vm2, %v2164_v48, %v2135_v30  ;;  %v521_v30 = vsel %vm4409_vm4, %v485_v15, 0  ;;  %v479_v38 = vpack.c.bf16 %v461_v6, %v461_v6 }
  0xa8   :  { %v506_v23 = vsel %vm4409_vm4, %v480_v4, 0  ;;  %v470_v24 = vpack.c.bf16 %v2562_v8, %v431_v17  ;;  %v458_v43 = vsel %vm4410_vm3, %v2139_v36, %v2169_v60  ;;  %v432_v26 = vsel %vm4408_vm2, %v2150_v40, %v2164_v48 }
  0xa9   :  { %v2812_v58 = vsel %vm4405_vm1, %v2190_v9, %v2194_v50  ;;  %2031 = vmatmul.msk.bf16.vlgmr.msra.gmra.mxu1 %vm4407_vm5, %v2826_v61  ;;  %v503_v8 = vsel %vm4409_vm4, %v479_v38, 0  ;;  %v482_v31 = vpack.c.bf16 %v458_v43, %v458_v43  ;;  %v429_v52 = vsel %vm4408_vm2, %v2149_v54, %v2184_v37 }
  0xaa   :  { %v2261_v5 = vpack.i.bf16 %v2812_v58, %v2745_v41  ;;  %594 = vmatpush.bf16.msrb.mxu1 %v509_v57  ;;  %2030 = vmatmul.msk.bf16.vlgmr.msra.gmra.mxu0 %vm4407_vm5, %v2826_v61  ;;  %v2195_v36 = vunpack.i.h.bf16 %v2786_v19  ;;  %v475_v40 = vpack.c.bf16 %v2572_v11, %v426_v27  ;;  %v472_v55 = vpack.c.bf16 %v2581_v13, %v429_v52 }
  0xab   :  { %581 = vmatpush.bf16.msrb.mxu0 %v506_v23  ;;  %2032 = vmatmul.msk.bf16.vlgmr.msra.gmra.mxu2 %vm4407_vm5, %v2826_v61  ;;  %v512_v48 = vsel %vm4409_vm4, %v482_v31, 0  ;;  %v2189_v11 = vunpack.i.l.bf16 %v2757_v49  ;;  %v2170_v13 = vunpack.i.h.bf16 %v2780_v7  ;;  %v2185_v54 = vunpack.i.h.bf16 %v2844_v21 }
  0xac   :  { %2257 = vrot.lane.b32.xlu1 %v2256_v53, %s2485_s13  ;;  %2262 = vrot.lane.b32.xlu2 %v2261_v5, %s2484_s8  ;;  %v469_v53 = vpack.c.bf16 %v2534_v1, %v432_v26  ;;  %v2887_v59 = vsel %vm4405_vm1, %v2194_v50, %v2195_v36 }
  0xad   :  { %568 = vmatpush.bf16.msra.mxu3 %v503_v8  ;;  %607 = vmatpush.bf16.msrb.mxu2 %v512_v48  ;;  %v2900_v1 = vsel %vm4405_vm1, %v2189_v11, %v2180_v33  ;;  %v456_v50 = vsel %vm4410_vm3, %v2170_v13, %v2160_v25  ;;  %v427_v33 = vsel %vm4408_vm2, %v2185_v54, %v2165_v2  ;;  %v2983_v48 = vld [vmem:[%s4397_s1] sm:$0xf] }
  0xae   :  { %595 = vmatpush.bf16.msrb.mxu1 %v471_v20  ;;  %v484_v57 = vpack.c.bf16 %v456_v50, %v456_v50  ;;  %v474_v25 = vpack.c.bf16 %v2591_v16, %v427_v33  ;;  %v457_v0 = vsel %vm4410_vm3, %v2169_v60, %v2170_v13  ;;  %v428_v20 = vsel %vm4408_vm2, %v2184_v37, %v2185_v54 }
  0xaf   :  { %582 = vmatpush.bf16.msrb.mxu0 %v470_v24  ;;  %v483_v5 = vpack.c.bf16 %v457_v0, %v457_v0  ;;  %v473_v15 = vpack.c.bf16 %v2600_v18, %v428_v20 }
  0xb0   :  { %v518_v56 = vsel %vm4409_vm4, %v484_v57, 0 }
  0xb1   :  { %569 = vmatpush.bf16.msra.mxu3 %v469_v53  ;;  %608 = vmatpush.bf16.msrb.mxu2 %v472_v55  ;;  %v515_v12 = vsel %vm4409_vm4, %v483_v5, 0  ;;  %v2487_v5 = vmov 0  }
  0xb2   :  { %646 = vmatpush.bf16.msra.mxu1 %v521_v30  ;;  %2286 = vset.pattern.permute.xlu1 %v2487_v5 }
  0xb3   :  { %633 = vmatpush.bf16.msra.mxu0 %v518_v56  ;;  %2477 = vset.pattern.permute.xlu2 %v2487_v5 }
  0xb4   :  { %857 = vrot.lane.b32.xlu2 %v2812_v58, %s2485_s13  ;;  %889 = vrot.lane.b32.xlu1 %v2887_v59, %s2484_s8 }
  0xb5   :  { %2033 = vmatmul.msk.bf16.vlgmr.msra.gmra.mxu3 %vm4407_vm5, %v2826_v61  ;;  %2478 = vset.pattern.permute.xlu0 %v2487_v5 }
  0xb6   :  { %647 = vmatpush.bf16.msra.mxu1 %v475_v40  ;;  %620 = vmatpush.bf16.msrb.mxu3 %v515_v12 }
  0xb7   :  { %634 = vmatpush.bf16.msra.mxu0 %v474_v25 }
  0xb9   :  { %2035 = vmatmul.msk.bf16.vlgmr.msrb.gmra.mxu1 %vm4407_vm5, %v2826_v61 }
  0xba   :  { %2034 = vmatmul.msk.bf16.vlgmr.msrb.gmra.mxu0 %vm4407_vm5, %v2826_v61  ;;  %621 = vmatpush.bf16.msrb.mxu3 %v473_v15 }
  0xbb   :  { %2036 = vmatmul.msk.bf16.vlgmr.msrb.gmra.mxu2 %vm4407_vm5, %v2826_v61 }
  0xbc   :  { %895 = vrot.lane.b32.xlu2 %v2900_v1, %s2484_s8 }
  0xc4   :  { %859 = vrot.lane.b32.xlu2 %v2887_v59, %s2485_s13 }
  0xc5   :  { %2037 = vmatmul.msk.bf16.vlgmr.msrb.gmra.mxu3 %vm4407_vm5, %v2826_v61 }
  0xc9   :  { %2039 = vmatmul.msk.bf16.vlgmr.msra.gmra.mxu1 %vm4407_vm5, %v2826_v61 }
  0xca   :  { %2038 = vmatmul.msk.bf16.vlgmr.msra.gmra.mxu0 %vm4407_vm5, %v2826_v61 }
  0xde   :  { %v2928_v35 = vpop.permute.xlu2 %2197 }
  0xdf   :  { %v2200_v10 = vunpack.i.h.bf16 %v2928_v35  ;;  %v2199_v2 = vunpack.i.l.bf16 %v2928_v35 }
  0xe1   :  { %v380_v29 = vsel %vm4410_vm3, %v2199_v2, %v2200_v10 }
  0xe2   :  { %v398_v16 = vpack.c.bf16 %v380_v29, %v380_v29 }
  0xe4   :  { %v666_v4 = vsel %vm4409_vm4, %v398_v16, 0 }
  0xe5   :  { %731 = vmatpush.bf16.msrb.mxu1 %v666_v4 }
  0xe6   :  { %v2943_v17 = vpop.permute.xlu2 %2222 }
  0xe7   :  { %v2225_v18 = vunpack.i.h.bf16 %v2943_v17  ;;  %v2224_v30 = vunpack.i.l.bf16 %v2943_v17  ;;  %v3152_v17 = vld [vmem:[%s4397_s1 + $0x8] sm:$0xf] }
  0xe9   :  { %v353_v52 = vsel %vm4408_vm2, %v2225_v18, %v2224_v30 }
  0xee   :  { %v2947_v7 = vpop.permute.xlu2 %2232 }
  0xef   :  { %v2235_v60 = vunpack.i.h.bf16 %v2947_v7  ;;  %v2234_v28 = vunpack.i.l.bf16 %v2947_v7 }
  0xf1   :  { %v379_v26 = vsel %vm4410_vm3, %v2200_v10, %v2235_v60 }
  0xf2   :  { %v399_v40 = vpack.c.bf16 %v379_v26, %v379_v26 }
  0xf4   :  { %v669_v13 = vsel %vm4409_vm4, %v399_v40, 0 }
  0xf6   :  { %v2950_v23 = vpop.permute.xlu1 %2212 }
  0xf7   :  { %v2215_v27 = vunpack.i.h.bf16 %v2950_v23  ;;  %v2214_v21 = vunpack.i.l.bf16 %v2950_v23  ;;  %v2954_v6 = vpop.permute.xlu0 %2202 }
  0xf8   :  { %v2205_v24 = vunpack.i.h.bf16 %v2954_v6  ;;  %v2204_v61 = vunpack.i.l.bf16 %v2954_v6 }
  0xf9   :  { %v383_v37 = vsel %vm4410_vm3, %v2214_v21, %v2215_v27 }
  0xfa   :  { %v350_v38 = vsel %vm4408_vm2, %v2204_v61, %v2205_v24  ;;  %v395_v43 = vpack.c.bf16 %v383_v37, %v383_v37 }
  0xfb   :  { %v388_v8 = vpack.c.bf16 %v2648_v45, %v350_v38  ;;  %v385_v45 = vpack.c.bf16 %v2640_v42, %v353_v52 }
  0xfc   :  { %v657_v31 = vsel %vm4409_vm4, %v395_v43, 0 }
  0xfd   :  { %732 = vmatpush.bf16.msrb.mxu1 %v388_v8  ;;  %692 = vmatpush.bf16.msra.mxu2 %v657_v31 }
  0xfe   :  { %v3046_v15 = vpop.permute.xlu2 %2247 }
  0xff   :  { %v2208_v53 = vpop.permute.xlu0 %2207 }
 0x100   :  { %v2209_v55 = vunpack.i.l.bf16 %v2208_v53  ;;  %2043 = vmatmul.msk.bf16.vlgmr.msrb.gmra.mxu1 %vm4407_vm5, %v2983_v48  ;;  %v2210_v33 = vunpack.i.h.bf16 %v2208_v53 }
 0x101   :  { %693 = vmatpush.bf16.msra.mxu2 %v385_v45 }
 0x102   :  { %v2993_v54 = vsel %vm4405_vm1, %v2209_v55, %v2190_v9  ;;  %v2999_v50 = vsel %vm4405_vm1, %v2179_v34, %v2209_v55  ;;  %v3021_v10 = vsel %vm4405_vm1, %v2210_v33, %v2189_v11  ;;  %v3027_v29 = vsel %vm4405_vm1, %v2195_v36, %v2210_v33 }
 0x103   :  { %v2266_v42 = vpack.i.bf16 %v2993_v54, %v2900_v1  ;;  %v2276_v57 = vpack.i.bf16 %v2999_v50, %v2751_v39  ;;  %v2271_v12 = vpack.i.bf16 %v2993_v54, %v2999_v50 }
 0x104   :  { %2040 = vmatmul.msk.bf16.vlgmr.msra.gmra.mxu2 %vm4407_vm5, %v2983_v48 }
 0x105   :  { %744 = vmatpush.bf16.msrb.mxu2 %v669_v13  ;;  %2267 = vrot.lane.b32.xlu0 %v2266_v42, %s2485_s13 }
 0x106   :  { %2277 = vrot.lane.b32.xlu1 %v2276_v57, %s2485_s13  ;;  %v3009_v9 = vpop.permute.xlu1 %2217  ;;  %v3074_v6 = vpop.permute.xlu2 %2262  ;;  %v2249_v57 = vunpack.i.l.bf16 %v3046_v15 }
 0x107   :  { %v2220_v34 = vunpack.i.h.bf16 %v3009_v9  ;;  %v2219_v56 = vunpack.i.l.bf16 %v3009_v9  ;;  %v3014_v25 = vpop.permute.xlu0 %2237 }
 0x108   :  { %v2240_v35 = vunpack.i.h.bf16 %v3014_v25  ;;  %v2239_v43 = vunpack.i.l.bf16 %v3014_v25  ;;  %v2265_v25 = vunpack.i.h.bf16 %v3074_v6 }
 0x109   :  { %v382_v16 = vsel %vm4410_vm3, %v2215_v27, %v2219_v56  ;;  %v381_v0 = vsel %vm4410_vm3, %v2219_v56, %v2199_v2  ;;  %v376_v49 = vsel %vm4410_vm3, %v2220_v34, %v2234_v28  ;;  %v2281_v2 = vpack.i.bf16 %v3021_v10, %v3027_v29 }
 0x10a   :  { %v349_v19 = vsel %vm4408_vm2, %v2205_v24, %v2240_v35  ;;  %v396_v36 = vpack.c.bf16 %v382_v16, %v382_v16  ;;  %v397_v11 = vpack.c.bf16 %v381_v0, %v381_v0  ;;  %v402_v4 = vpack.c.bf16 %v376_v49, %v376_v49 }
 0x10b   :  { %v389_v20 = vpack.c.bf16 %v2644_v44, %v349_v19  ;;  %v348_v7 = vsel %vm4408_vm2, %v2240_v35, %v2249_v57 }
 0x10c   :  { %v660_v27 = vsel %vm4409_vm4, %v396_v36, 0  ;;  %v663_v37 = vsel %vm4409_vm4, %v397_v11, 0  ;;  %v678_v24 = vsel %vm4409_vm4, %v402_v4, 0 }
 0x10d   :  { %2272 = vrot.lane.b32.xlu0 %v2271_v12, %s2484_s8  ;;  %745 = vmatpush.bf16.msrb.mxu2 %v389_v20  ;;  %v2250_v20 = vunpack.i.h.bf16 %v3046_v15 }
 0x10e   :  { %2282 = vrot.lane.b32.xlu1 %v2281_v2, %s2484_s8  ;;  %705 = vmatpush.bf16.msra.mxu3 %v660_v27  ;;  %v2228_v38 = vpop.permute.xlu1 %2227 }
 0x10f   :  { %718 = vmatpush.bf16.msrb.mxu0 %v663_v37  ;;  %783 = vmatpush.bf16.msra.mxu1 %v678_v24  ;;  %v2230_v44 = vunpack.i.h.bf16 %v2228_v38  ;;  %v2229_v26 = vunpack.i.l.bf16 %v2228_v38  ;;  %v390_v37 = vpack.c.bf16 %v2691_v63, %v348_v7 }
 0x111   :  { %v352_v8 = vsel %vm4408_vm2, %v2224_v30, %v2229_v26  ;;  %v351_v31 = vsel %vm4408_vm2, %v2229_v26, %v2204_v61  ;;  %v346_v52 = vsel %vm4408_vm2, %v2230_v44, %v2239_v43  ;;  %v291_v30 = vld [vmem:[%s4398_s2] sm:$0xff] }
 0x112   :  { %v386_v40 = vpack.c.bf16 %v2652_v46, %v352_v8  ;;  %v387_v53 = vpack.c.bf16 %v2656_v47, %v351_v31  ;;  %v392_v45 = vpack.c.bf16 %v2695_v3, %v346_v52  ;;  %v2264_v46 = vunpack.i.l.bf16 %v3074_v6 }
 0x114   :  { %706 = vmatpush.bf16.msra.mxu3 %v386_v40  ;;  %719 = vmatpush.bf16.msrb.mxu0 %v387_v53 }
 0x115   :  { %863 = vrot.lane.b32.xlu0 %v3021_v10, %s2485_s13  ;;  %784 = vmatpush.bf16.msra.mxu1 %v392_v45 }
 0x116   :  { %v2243_v61 = vpop.permute.xlu1 %2242  ;;  %1104 = vperm.xlu1 %2286, %v291_v30   ;;  %2044 = vmatmul.msk.bf16.vlgmr.msrb.gmra.mxu2 %vm4407_vm5, %v2983_v48 }
 0x117   :  { %v2245_v47 = vunpack.i.h.bf16 %v2243_v61  ;;  %v2244_v3 = vunpack.i.l.bf16 %v2243_v61  ;;  %v3079_v55 = vpop.permute.xlu0 %2252  ;;  %2041 = vmatmul.msk.bf16.vlgmr.msra.gmra.mxu3 %vm4407_vm5, %v2983_v48  ;;  %2042 = vmatmul.msk.bf16.vlgmr.msrb.gmra.mxu0 %vm4407_vm5, %v2983_v48 }
 0x118   :  { %v2255_v13 = vunpack.i.h.bf16 %v3079_v55  ;;  %v2254_v42 = vunpack.i.l.bf16 %v3079_v55  ;;  %2047 = vmatmul.msk.bf16.vlgmr.msra.gmra.mxu1 %vm4407_vm5, %v2983_v48 }
 0x119   :  { %v378_v33 = vsel %vm4410_vm3, %v2235_v60, %v2244_v3  ;;  %v377_v9 = vsel %vm4410_vm3, %v2244_v3, %v2220_v34  ;;  %v905_v56 = vsel %vm4410_vm3, %v2264_v46, %v2245_v47  ;;  %v3175_v3 = vpop.permute.xlu2 %857 }
 0x11a   :  { %v400_v16 = vpack.c.bf16 %v378_v33, %v378_v33  ;;  %v401_v0 = vpack.c.bf16 %v377_v9, %v377_v9  ;;  %v375_v49 = vsel %vm4410_vm3, %v2234_v28, %v2255_v13  ;;  %v904_v60 = vsel %vm4410_vm3, %v2245_v47, %v2254_v42 }
 0x11b   :  { %v403_v5 = vpack.c.bf16 %v375_v49, %v375_v49  ;;  %v918_v19 = vpack.c.bf16 %v904_v60, %v904_v60  ;;  %v384_v34 = vsel %vm4410_vm3, %v2255_v13, %v2214_v21  ;;  %v917_v28 = vpack.c.bf16 %v905_v56, %v905_v56 }
 0x11c   :  { %v672_v36 = vsel %vm4409_vm4, %v400_v16, 0  ;;  %v675_v11 = vsel %vm4409_vm4, %v401_v0, 0  ;;  %v347_v21 = vsel %vm4408_vm2, %v2249_v57, %v2230_v44  ;;  %v404_v2 = vpack.c.bf16 %v384_v34, %v384_v34 }
 0x11d   :  { %861 = vrot.lane.b32.xlu0 %v3027_v29, %s2485_s13  ;;  %757 = vmatpush.bf16.msrb.mxu3 %v672_v36  ;;  %v681_v4 = vsel %vm4409_vm4, %v403_v5, 0  ;;  %v936_v23 = vsel %vm4409_vm4, %v918_v19, 0  ;;  %v391_v24 = vpack.c.bf16 %v2710_v14, %v347_v21  ;;  %v933_v38 = vsel %vm4409_vm4, %v917_v28, 0 }
 0x11e   :  { %770 = vmatpush.bf16.msra.mxu0 %v675_v11  ;;  %796 = vmatpush.bf16.msra.mxu2 %v681_v4  ;;  %v3124_v12 = vpop.permute.xlu1 %2257  ;;  %v684_v44 = vsel %vm4409_vm4, %v404_v2, 0 }
 0x11f   :  { %v2260_v35 = vunpack.i.h.bf16 %v3124_v12  ;;  %v2259_v27 = vunpack.i.l.bf16 %v3124_v12  ;;  %981 = vmatpush.bf16.msrb.mxu1 %v936_v23 }
 0x121   :  { %758 = vmatpush.bf16.msrb.mxu3 %v390_v37  ;;  %v345_v26 = vsel %vm4408_vm2, %v2239_v43, %v2260_v35  ;;  %v875_v15 = vsel %vm4408_vm2, %v2250_v20, %v2259_v27  ;;  %v344_v63 = vsel %vm4408_vm2, %v2260_v35, %v2225_v18  ;;  %v896_v9 = vpop.permute.xlu2 %895 }
 0x122   :  { %771 = vmatpush.bf16.msra.mxu0 %v391_v24  ;;  %v393_v14 = vpack.c.bf16 %v2687_v62, %v345_v26  ;;  %v908_v8 = vpack.c.bf16 %v2722_v22, %v875_v15  ;;  %v394_v43 = vpack.c.bf16 %v2669_v51, %v344_v63 }
 0x124   :  { %797 = vmatpush.bf16.msra.mxu2 %v393_v14  ;;  %982 = vmatpush.bf16.msrb.mxu1 %v908_v8 }
 0x125   :  { %809 = vmatpush.bf16.msra.mxu3 %v684_v44 }
 0x126   :  { %968 = vmatpush.bf16.msrb.mxu0 %v933_v38  ;;  %v890_v18 = vpop.permute.xlu1 %889  ;;  %v3166_v22 = vpop.f32.mrf.mxu1 }
 0x127   :  { %2045 = vmatmul.msk.bf16.vlgmr.msrb.gmra.mxu3 %vm4407_vm5, %v2983_v48  ;;  %2048 = vmatmul.msk.bf16.vlgmr.msra.gmra.mxu2 %vm4407_vm5, %v2983_v48  ;;  %v900_v51 = vsel %vm4410_vm3, %v2265_v25, %v890_v18  ;;  %v3177_v13 = vpop.f32.mrf.mxu0 }
 0x128   :  { %2052 = vmatmul.msk.bf16.vlgmr.msrb.gmra.mxu1 %vm4407_vm5, %v3152_v17  ;;  %2046 = vmatmul.msk.bf16.vlgmr.msra.gmra.mxu0 %vm4407_vm5, %v2983_v48  ;;  %v922_v62 = vpack.c.bf16 %v900_v51, %v900_v51 }
 0x129   :  { %810 = vmatpush.bf16.msra.mxu3 %v394_v43 }
 0x12a   :  { %v948_v31 = vsel %vm4409_vm4, %v922_v62, 0 }
 0x12b   :  { %1033 = vmatpush.bf16.msra.mxu1 %v948_v31 }
 0x12e   :  { %v547_v52 = vpop.f32.mrf.mxu1  ;;  %v3179_v57 = vpop.f32.mrf.mxu2 }
 0x12f   :  { %v534_v5 = vpop.f32.mrf.mxu0 }
 0x136   :  { %v3171_v40 = vpop.f32.mrf.mxu1  ;;  %v560_v19 = vpop.f32.mrf.mxu2 }
 0x137   :  { %2049 = vmatmul.msk.bf16.vlgmr.msra.gmra.mxu3 %vm4407_vm5, %v2983_v48  ;;  %v906_v48 = vsel %vm4410_vm3, %v896_v9, %v2264_v46 }
 0x138   :  { %v571_v61 = vpop.f32.mrf.mxu3  ;;  %v926_v60 = vpack.c.bf16 %v906_v48, %v906_v48 }
 0x13a   :  { %v960_v46 = vsel %vm4409_vm4, %v926_v60, 0 }
 0x13e   :  { %v599_v53 = vpop.f32.mrf.mxu1  ;;  %v3203_v44 = vpop.f32.mrf.mxu2 }
 0x13f   :  { %v860_v53 = vpop.permute.xlu2 %859 }
 0x140   :  { %v573_v47 = vpop.f32.mrf.mxu3 }
 0x146   :  { %v3173_v45 = vpop.f32.mrf.mxu1  ;;  %v612_v19 = vpop.f32.mrf.mxu2 }
 0x148   :  { %v3181_v33 = vpop.f32.mrf.mxu3 }
 0x14e   :  { %v651_v30 = vpop.f32.mrf.mxu1 }
 0x150   :  { %v625_v11 = vpop.f32.mrf.mxu3 }
 0x177   :  { %v2268_v56 = vpop.permute.xlu0 %2267 }
 0x178   :  { %v2278_v16 = vpop.permute.xlu1 %2277  ;;  %v2270_v0 = vunpack.i.h.bf16 %v2268_v56  ;;  %v2269_v49 = vunpack.i.l.bf16 %v2268_v56 }
 0x179   :  { %v2279_v21 = vunpack.i.l.bf16 %v2278_v16 }
 0x17a   :  { %v876_v34 = vsel %vm4408_vm2, %v2269_v49, %v2250_v20  ;;  %v871_v36 = vsel %vm4408_vm2, %v2270_v0, %v3175_v3 }
 0x17b   :  { %v907_v7 = vpack.c.bf16 %v2745_v41, %v876_v34  ;;  %v912_v28 = vpack.c.bf16 %v2812_v58, %v871_v36  ;;  %v2280_v41 = vunpack.i.h.bf16 %v2278_v16  ;;  %v3201_v58 = vpop.f32.mrf.mxu0  ;;  %v874_v55 = vsel %vm4408_vm2, %v2259_v27, %v2279_v21 }
 0x17c   :  { %v909_v48 = vpack.c.bf16 %v2751_v39, %v874_v55 }
 0x17d   :  { %969 = vmatpush.bf16.msrb.mxu0 %v907_v7  ;;  %1034 = vmatpush.bf16.msra.mxu1 %v912_v28  ;;  %v734_v4 = vpop.f32.mrf.mxu1  ;;  %v872_v12 = vsel %vm4408_vm2, %v2280_v41, %v2270_v0  ;;  %v870_v0 = vsel %vm4408_vm2, %v3175_v3, %v860_v53 }
 0x17e   :  { %v3195_v23 = vadd.f32 %v734_v4, %v571_v61  ;;  %v911_v60 = vpack.c.bf16 %v2993_v54, %v872_v12 }
 0x17f   :  { %v2273_v20 = vpop.permute.xlu0 %2272 }
 0x180   :  { %v2283_v2 = vpop.permute.xlu1 %2282  ;;  %v2275_v24 = vunpack.i.h.bf16 %v2273_v20  ;;  %v2274_v38 = vunpack.i.l.bf16 %v2273_v20  ;;  %2051 = vmatmul.msk.bf16.vlgmr.msrb.gmra.mxu0 %vm4407_vm5, %v3152_v17  ;;  %2056 = vmatmul.msk.bf16.vlgmr.msra.gmra.mxu1 %vm4407_vm5, %v3152_v17 }
 0x181   :  { %1085 = vmatpush.bf16.msrb.mxu1 %v960_v46  ;;  %v2285_v35 = vunpack.i.h.bf16 %v2283_v2  ;;  %v2284_v37 = vunpack.i.l.bf16 %v2283_v2 }
 0x182   :  { %v903_v26 = vsel %vm4410_vm3, %v2254_v42, %v2274_v38  ;;  %v902_v15 = vsel %vm4410_vm3, %v2274_v38, %v2275_v24  ;;  %v901_v63 = vsel %vm4410_vm3, %v2275_v24, %v2265_v25 }
 0x183   :  { %v919_v14 = vpack.c.bf16 %v903_v26, %v903_v26  ;;  %v920_v8 = vpack.c.bf16 %v902_v15, %v902_v15  ;;  %v921_v43 = vpack.c.bf16 %v901_v63, %v901_v63  ;;  %v899_v51 = vsel %vm4410_vm3, %v890_v18, %v2284_v37  ;;  %v586_v5 = vpop.f32.mrf.mxu0 }
 0x184   :  { %v898_v42 = vsel %vm4410_vm3, %v2284_v37, %v2285_v35  ;;  %v897_v6 = vsel %vm4410_vm3, %v2285_v35, %v896_v9  ;;  %v873_v18 = vsel %vm4408_vm2, %v2279_v21, %v2280_v41  ;;  %v923_v27 = vpack.c.bf16 %v899_v51, %v899_v51 }
 0x185   :  { %v939_v62 = vsel %vm4409_vm4, %v919_v14, 0  ;;  %v942_v25 = vsel %vm4409_vm4, %v920_v8, 0  ;;  %v945_v31 = vsel %vm4409_vm4, %v921_v43, 0  ;;  %v736_v52 = vpop.f32.mrf.mxu1  ;;  %v924_v61 = vpack.c.bf16 %v898_v42, %v898_v42 }
 0x186   :  { %994 = vmatpush.bf16.msrb.mxu2 %v939_v62  ;;  %1007 = vmatpush.bf16.msrb.mxu3 %v942_v25  ;;  %v925_v47 = vpack.c.bf16 %v897_v6, %v897_v6  ;;  %v910_v56 = vpack.c.bf16 %v2999_v50, %v873_v18  ;;  %v951_v34 = vsel %vm4409_vm4, %v923_v27, 0  ;;  %v2489_v25 = vmov 20.0  }
 0x187   :  { %1020 = vmatpush.bf16.msra.mxu0 %v945_v31  ;;  %v864_v30 = vpop.permute.xlu0 %863  ;;  %v954_v39 = vsel %vm4409_vm4, %v924_v61, 0  ;;  %v695_v7 = vpop.f32.mrf.mxu2  ;;  %v3290_v52 = vadd.s32 128, %v2633_v32  ;;  %v34_v61 = vcvt.s32.f32 %v2633_v32 }
 0x188   :  { %v867_v9 = vsel %vm4408_vm2, %v864_v30, %v2269_v49  ;;  %v957_v50 = vsel %vm4409_vm4, %v925_v47, 0  ;;  %v3260_v28 = vadd.f32 %v695_v7, %v3177_v13 }
 0x189   :  { %v916_v16 = vpack.c.bf16 %v2900_v1, %v867_v9  ;;  %v913_v1 = vpack.c.bf16 %v2887_v59, %v870_v0  ;;  %v35_v27 = vcvt.s32.f32 %v3290_v52 }
 0x18a   :  { %995 = vmatpush.bf16.msrb.mxu2 %v909_v48  ;;  %1008 = vmatpush.bf16.msrb.mxu3 %v910_v56  ;;  %v44_v56 = vadd.f32 0.5, %v34_v61 }
 0x18b   :  { %1021 = vmatpush.bf16.msra.mxu0 %v911_v60  ;;  %1086 = vmatpush.bf16.msrb.mxu1 %v916_v16  ;;  %v636_v11 = vpop.f32.mrf.mxu0  ;;  %v45_v47 = vadd.f32 0.5, %v35_v27 }
 0x18d   :  { %2053 = vmatmul.msk.bf16.vlgmr.msrb.gmra.mxu2 %vm4407_vm5, %v3152_v17  ;;  %2054 = vmatmul.msk.bf16.vlgmr.msrb.gmra.mxu3 %vm4407_vm5, %v3152_v17 }
 0x18e   :  { %1046 = vmatpush.bf16.msra.mxu2 %v951_v34  ;;  %1059 = vmatpush.bf16.msra.mxu3 %v954_v39  ;;  %v3299_v34 = vadd.s32 640, %v2633_v32 }
 0x18f   :  { %1072 = vmatpush.bf16.msrb.mxu0 %v957_v50  ;;  %v862_v54 = vpop.permute.xlu0 %861  ;;  %v697_v2 = vpop.f32.mrf.mxu2 }
 0x190   :  { %v868_v3 = vsel %vm4408_vm2, %v862_v54, %v864_v30  ;;  %v869_v49 = vsel %vm4408_vm2, %v860_v53, %v862_v54  ;;  %2055 = vmatmul.msk.bf16.vlgmr.msra.gmra.mxu0 %vm4407_vm5, %v3152_v17  ;;  %2060 = vmatmul.msk.bf16.vlgmr.msrb.gmra.mxu1 %vm4407_vm5, %v3152_v17  ;;  %v39_v54 = vcvt.s32.f32 %v3299_v34  ;;  %v3321_v2 = vadd.s32 256, %v2633_v32 }
 0x191   :  { %v914_v59 = vpack.c.bf16 %v3027_v29, %v869_v49  ;;  %v915_v36 = vpack.c.bf16 %v3021_v10, %v868_v3  ;;  %v3305_v49 = vadd.s32 512, %v2633_v32 }
 0x192   :  { %1047 = vmatpush.bf16.msra.mxu2 %v913_v1 }
 0x193   :  { %1060 = vmatpush.bf16.msra.mxu3 %v914_v59  ;;  %1073 = vmatpush.bf16.msrb.mxu0 %v915_v36  ;;  %v638_v21 = vpop.f32.mrf.mxu0  ;;  %v3308_v59 = vadd.s32 1152, %v2633_v32  ;;  %v38_v7 = vcvt.s32.f32 %v3305_v49 }
 0x195   :  { %v786_v46 = vpop.f32.mrf.mxu1 }
 0x196   :  { %v3263_v4 = vadd.f32 %v786_v46, %v3181_v33  ;;  %v43_v46 = vcvt.s32.f32 %v3308_v59 }
 0x199   :  { %v747_v29 = vpop.f32.mrf.mxu2 }
 0x19a   :  { %v708_v20 = vpop.f32.mrf.mxu3  ;;  %v3275_v33 = vadd.f32 %v747_v29, %v3201_v58  ;;  %v2488_v58 = vmov 32.0  }
 0x19b   :  { %v721_v10 = vpop.f32.mrf.mxu0  ;;  %v709_v24 = vadd.f32 %v708_v20, %v3166_v22  ;;  %2479 = vrcp.f32 %v2488_v58  ;;  %v3324_v20 = vadd.s32 384, %v2633_v32 }
 0x19c   :  { %v3272_v37 = vadd.f32 %v721_v10, %v3179_v57  ;;  %2481 = vrcp.f32 %v2489_v25  ;;  %v53_v10 = vadd.f32 0.5, %v43_v46 }
 0x19d   :  { %v788_v35 = vpop.f32.mrf.mxu1  ;;  %2057 = vmatmul.msk.bf16.vlgmr.msra.gmra.mxu2 %vm4407_vm5, %v3152_v17  ;;  %2058 = vmatmul.msk.bf16.vlgmr.msra.gmra.mxu3 %vm4407_vm5, %v3152_v17 }
 0x19e   :  { %v48_v35 = vadd.f32 0.5, %v38_v7 }
 0x1a0   :  { %2059 = vmatmul.msk.bf16.vlgmr.msrb.gmra.mxu0 %vm4407_vm5, %v3152_v17 }
 0x1a1   :  { %v749_v15 = vpop.f32.mrf.mxu2  ;;  %v2480_v42 = vpop.eup %2479 }
 0x1a2   :  { %v710_v13 = vpop.f32.mrf.mxu3  ;;  %v55_v62 = vmul.f32 32.0, %v2480_v42  ;;  %vm59_vm6 = vweird.f32 %v2480_v42 }
 0x1a3   :  { %v723_v26 = vpop.f32.mrf.mxu0  ;;  %v36_v13 = vcvt.s32.f32 %v3321_v2 }
 0x1a4   :  { %v56_v31 = vsub.f32 1.0, %v55_v62 }
 0x1a5   :  { %v984_v38 = vpop.f32.mrf.mxu1 }
 0x1a6   :  { %v3278_v41 = vadd.f32 %v984_v38, %v709_v24  ;;  %v57_v12 = vmul.f32 %v2480_v42, %v56_v31  ;;  %v37_v24 = vcvt.s32.f32 %v3324_v20 }
 0x1a8   :  { %v58_v53 = vadd.f32 %v2480_v42, %v57_v12 }
 0x1aa   :  { %v3280_v63 = vpop.f32.mrf.mxu3  ;;  %v799_v8 = vpop.f32.mrf.mxu2  ;;  %v3294_v9 = vsel %vm59_vm6, %v2480_v42, %v58_v53 }
 0x1ab   :  { %v773_v17 = vpop.f32.mrf.mxu0  ;;  %v3285_v57 = vadd.f32 %v799_v8, %v636_v11  ;;  %v62_v16 = vmul.f32 %v3294_v9, %v45_v47  ;;  %v61_v5 = vmul.f32 %v3294_v9, %v44_v56  ;;  %v49_v11 = vadd.f32 0.5, %v39_v54 }
 0x1ac   :  { %v3283_v51 = vadd.f32 %v773_v17, %v3203_v44  ;;  %v2482_v44 = vpop.eup %2481  ;;  %v65_v26 = vmul.f32 %v3294_v9, %v48_v35  ;;  %v46_v17 = vadd.f32 0.5, %v36_v13 }
 0x1ad   :  { %v986_v14 = vpop.f32.mrf.mxu1  ;;  %v112_v30 = vmul.f32 20.0, %v2482_v44  ;;  %v72_v19 = vfloor.f32 %v62_v16  ;;  %v71_v39 = vfloor.f32 %v61_v5  ;;  %vm116_vm7 = vweird.f32 %v2482_v44 }
 0x1ae   :  { %v66_v38 = vmul.f32 %v3294_v9, %v49_v11  ;;  %v70_v14 = vmul.f32 %v3294_v9, %v53_v10  ;;  %v75_v8 = vfloor.f32 %v65_v26 }
 0x1af   :  { %v113_v48 = vsub.f32 1.0, %v112_v30  ;;  %v102_v50 = vadd.f32 0.5, %v72_v19  ;;  %v101_v3 = vadd.f32 0.5, %v71_v39  ;;  %v82_v52 = vmul.f32 32.0, %v72_v19 }
 0x1b0   :  { %v105_v42 = vadd.f32 0.5, %v75_v8  ;;  %v3344_v25 = vfloor.f32 %v70_v14  ;;  %v81_v53 = vmul.f32 32.0, %v71_v39  ;;  %v85_v26 = vmul.f32 32.0, %v75_v8 }
 0x1b1   :  { %v114_v60 = vmul.f32 %v2482_v44, %v113_v48  ;;  %v92_v5 = vsub.f32 %v35_v27, %v82_v52 }
 0x1b2   :  { %v762_v43 = vpop.f32.mrf.mxu3  ;;  %v801_v22 = vpop.f32.mrf.mxu2  ;;  %v110_v48 = vadd.f32 0.5, %v3344_v25 }
 0x1b3   :  { %v775_v55 = vpop.f32.mrf.mxu0  ;;  %v115_v0 = vadd.f32 %v2482_v44, %v114_v60  ;;  %v47_v43 = vadd.f32 0.5, %v37_v24  ;;  %v3342_v22 = vfloor.f32 %v66_v38  ;;  %v3358_v60 = vadd.s32 1024, %v2633_v32 }
 0x1b4   :  { %v63_v55 = vmul.f32 %v3294_v9, %v46_v17  ;;  %vm202_vm13 = vcmp.ge.f32.partialorder %v92_v5, 1.0 }
 0x1b5   :  { %v3301_v1 = vsel %vm116_vm7, %v2482_v44, %v115_v0  ;;  %v106_v30 = vadd.f32 0.5, %v3342_v22  ;;  %v91_v0 = vsub.f32 %v34_v61, %v81_v53  ;;  %vm222_vm7 = vcmp.le.f32.partialorder %v92_v5, 16.0  ;;  %v3421_v5 = vpop.permute.xlu1 %1104 }
 0x1b6   :  { %v3311_v36 = vmul.f32 %v3301_v1, %v102_v50  ;;  %v3318_v21 = vmul.f32 %v3301_v1, %v101_v3  ;;  %v3346_v31 = vfloor.f32 %v63_v55  ;;  %v3350_v44 = vmul.f32 %v3301_v1, %v105_v42 }
 0x1b7   :  { %v3362_v50 = vmul.f32 %v3301_v1, %v106_v30  ;;  %v3366_v3 = vmul.f32 %v3301_v1, %v110_v48  ;;  %vm201_vm15 = vcmp.ge.f32.partialorder %v91_v0, 1.0 }
 0x1b8   :  { %v129_v29 = vfloor.f32 %v3311_v36  ;;  %v128_v15 = vfloor.f32 %v3318_v21  ;;  %v103_v56 = vadd.f32 0.5, %v3346_v31  ;;  %v3369_v36 = vadd.s32 768, %v2633_v32 }
 0x1b9   :  { %v4404_v21 = vfloor.f32 %v3362_v50  ;;  %v137_v38 = vfloor.f32 %v3366_v3 }
 0x1ba   :  { %v3287_v6 = vpop.f32.mrf.mxu3  ;;  %v139_v58 = vmul.f32 20.0, %v129_v29  ;;  %v138_v62 = vmul.f32 20.0, %v128_v15  ;;  %v3372_v27 = vmul.f32 %v3301_v1, %v103_v56  ;;  %v40_v10 = vcvt.s32.f32 %v3369_v36 }
 0x1bb   :  { %v143_v55 = vmul.f32 20.0, %v4404_v21 }
 0x1bc   :  { %v149_v12 = vsub.f32 %v72_v19, %v139_v58  ;;  %v148_v47 = vsub.f32 %v71_v39, %v138_v62  ;;  %v132_v19 = vfloor.f32 %v3350_v44  ;;  %v42_v39 = vcvt.s32.f32 %v3358_v60 }
 0x1bd   :  { %v130_v14 = vfloor.f32 %v3372_v27  ;;  %v50_v42 = vadd.f32 0.5, %v40_v10  ;;  %v86_v44 = vmul.f32 32.0, %v3342_v22  ;;  %v813_v27 = vadd.f32 %v3287_v6, %v3173_v45 }
 0x1be   :  { %vm172_vm8 = vcmp.ge.f32.partialorder %v149_v12, 1.0  ;;  %vm182_vm9 = vcmp.le.f32.partialorder %v149_v12, 16.0  ;;  %vm171_vm10 = vcmp.ge.f32.partialorder %v148_v47, 1.0  ;;  %vm181_vm11 = vcmp.le.f32.partialorder %v148_v47, 16.0 }
 0x1bf   :  { %vm192_vm12 = vmand %vm172_vm8, %vm182_vm9  ;;  %v142_v61 = vmul.f32 20.0, %v132_v19  ;;  %v52_v35 = vadd.f32 0.5, %v42_v39  ;;  %vm221_vm9 = vcmp.le.f32.partialorder %v91_v0, 16.0  ;;  %v3406_v12 = vadd.s32 896, %v2633_v32 }
 0x1c0   :  { %vm191_vm14 = vmand %vm171_vm10, %vm181_vm11  ;;  %vm3391_vm10 = vcmp.lt.f32.partialorder %v128_v15, 2.0  ;;  %v95_v15 = vsub.f32 %v38_v7, %v85_v26  ;;  %v140_v30 = vmul.f32 20.0, %v130_v14  ;;  %v67_v47 = vmul.f32 %v3294_v9, %v50_v42 }
 0x1c1   :  { %vm212_vm6 = vmand %vm192_vm12, %vm202_vm13  ;;  %v69_v58 = vmul.f32 %v3294_v9, %v52_v35  ;;  %vm3399_vm12 = vcmp.lt.f32.partialorder %v129_v29, 2.0  ;;  %v4403_v56 = vcvt.s32.f32 %v3406_v12  ;;  %v153_v0 = vsub.f32 %v3342_v22, %v143_v55 }
 0x1c2   :  { %v814_v18 = vpop.f32.mrf.mxu3  ;;  %vm211_vm8 = vmand %vm191_vm14, %vm201_vm15  ;;  %v3428_v49 = vfloor.f32 %v67_v47  ;;  %v90_v7 = vmul.f32 32.0, %v3344_v25  ;;  %v83_v26 = vmul.f32 32.0, %v3346_v31  ;;  %v150_v42 = vsub.f32 %v3346_v31, %v140_v30 }
 0x1c3   :  { %v64_v18 = vmul.f32 %v3294_v9, %v47_v43  ;;  %v152_v43 = vsub.f32 %v75_v8, %v142_v61  ;;  %vm3395_vm11 = vmand %vm212_vm6, %vm222_vm7  ;;  %v147_v8 = vmul.f32 20.0, %v137_v38  ;;  %v3418_v48 = vfloor.f32 %v69_v58 }
 0x1c4   :  { %vm3408_vm13 = vmand %vm211_vm8, %vm221_vm9  ;;  %v51_v61 = vadd.f32 0.5, %v4403_v56  ;;  %vm205_vm9 = vcmp.ge.f32.partialorder %v95_v15, 1.0  ;;  %v2490_v58 = vmov 0.0   ;;  %v107_v53 = vadd.f32 0.5, %v3428_v49 }
 0x1c5   :  { %v3355_v16 = vfloor.f32 %v64_v18  ;;  %vm175_vm14 = vcmp.ge.f32.partialorder %v152_v43, 1.0  ;;  %vm185_vm15 = vcmp.le.f32.partialorder %v152_v43, 16.0  ;;  %vm252_vm6 = vmand %vm3395_vm11, %vm3399_vm12  ;;  %v109_v62 = vadd.f32 0.5, %v3418_v48 }
 0x1c6   :  { %vm251_vm7 = vmand %vm3408_vm13, %vm3391_vm10  ;;  %v3446_v55 = vsel %vm252_vm6, 1.0, %v2490_v58  ;;  %vm176_vm10 = vcmp.ge.f32.partialorder %v153_v0, 1.0  ;;  %v68_v47 = vmul.f32 %v3294_v9, %v51_v61  ;;  %vm225_vm12 = vcmp.le.f32.partialorder %v95_v15, 16.0 }
 0x1c7   :  { %v104_v11 = vadd.f32 0.5, %v3355_v16  ;;  %vm3438_vm8 = vmand %vm175_vm14, %vm185_vm15  ;;  %v3453_v18 = vsel %vm251_vm7, 1.0, %v2490_v58  ;;  %v93_v31 = vsub.f32 %v36_v13, %v83_v26  ;;  %v84_v30 = vmul.f32 32.0, %v3355_v16 }
 0x1c8   :  { %vm215_vm11 = vmand %vm3438_vm8, %vm205_vm9  ;;  %vm173_vm15 = vcmp.ge.f32.partialorder %v150_v42, 1.0  ;;  %vm183_vm6 = vcmp.le.f32.partialorder %v150_v42, 16.0  ;;  %vm186_vm7 = vcmp.le.f32.partialorder %v153_v0, 16.0  ;;  %vm3479_vm9 = vcmp.lt.f32.partialorder %v132_v19, 2.0 }
 0x1c9   :  { %v3384_v17 = vmul.f32 %v3301_v1, %v104_v11  ;;  %v157_v11 = vsub.f32 %v3344_v25, %v147_v8  ;;  %v1108_v25 = vadd.f32 %v3421_v5, %v3278_v41  ;;  %v100_v41 = vsub.f32 %v43_v46, %v90_v7  ;;  %vm3473_vm8 = vmand %vm215_vm11, %vm225_vm12 }
 0x1ca   :  { %v3484_v2 = vmul.f32 %v3301_v1, %v107_v53  ;;  %v3486_v13 = vfloor.f32 %v68_v47  ;;  %vm3501_vm1 = vmand %vm173_vm15, %vm183_vm6  ;;  %vm203_vm0 = vcmp.ge.f32.partialorder %v93_v31, 1.0  ;;  %v94_v7 = vsub.f32 %v37_v24, %v84_v30 }
 0x1cb   :  { %v131_v29 = vfloor.f32 %v3384_v17  ;;  %vm180_vm13 = vcmp.ge.f32.partialorder %v157_v11, 1.0  ;;  %vm190_vm14 = vcmp.le.f32.partialorder %v157_v11, 16.0  ;;  %v3492_v15 = vmul.f32 %v3446_v55, %v1108_v25  ;;  %vm3508_vm2 = vmand %vm176_vm10, %vm186_vm7 }
 0x1cc   :  { %vm3496_vm11 = vmand %vm180_vm13, %vm190_vm14  ;;  %vm210_vm12 = vcmp.ge.f32.partialorder %v100_v41, 1.0  ;;  %v108_v20 = vadd.f32 0.5, %v3486_v13  ;;  %vm230_vm15 = vcmp.le.f32.partialorder %v100_v41, 16.0  ;;  %v134_v35 = vfloor.f32 %v3484_v2 }
 0x1cd   :  { %v141_v43 = vmul.f32 20.0, %v131_v29  ;;  %vm255_vm13 = vmand %vm3473_vm8, %vm3479_vm9  ;;  %vm223_vm7 = vcmp.le.f32.partialorder %v93_v31, 16.0  ;;  %vm204_vm3 = vcmp.ge.f32.partialorder %v94_v7, 1.0  ;;  %v88_v60 = vmul.f32 32.0, %v3486_v13 }
 0x1ce   :  { %vm220_vm10 = vmand %vm3496_vm11, %vm210_vm12  ;;  %v3531_v26 = vmul.f32 %v3301_v1, %v108_v20  ;;  %vm3542_vm12 = vcmp.lt.f32.partialorder %v137_v38, 2.0  ;;  %v89_v38 = vmul.f32 32.0, %v3418_v48  ;;  %v3600_v17 = vsel %vm255_vm13, 1.0, %v2490_v58 }
 0x1cf   :  { %v151_v21 = vsub.f32 %v3355_v16, %v141_v43  ;;  %vm213_vm6 = vmand %vm3501_vm1, %vm203_vm0  ;;  %v96_v43 = vsub.f32 %v39_v54, %v86_v44  ;;  %vm3554_vm1 = vcmp.lt.f32.partialorder %v130_v14, 2.0  ;;  %v144_v54 = vmul.f32 20.0, %v134_v35 }
 0x1d0   :  { %vm3536_vm11 = vmand %vm220_vm10, %vm230_vm15  ;;  %v135_v3 = vfloor.f32 %v3531_v26 }
 0x1d1   :  { %vm174_vm5 = vcmp.ge.f32.partialorder %v151_v21, 1.0  ;;  %vm184_vm14 = vcmp.le.f32.partialorder %v151_v21, 16.0  ;;  %vm3548_vm0 = vmand %vm213_vm6, %vm223_vm7  ;;  %vm206_vm15 = vcmp.ge.f32.partialorder %v96_v43, 1.0  ;;  %v154_v6 = vsub.f32 %v3428_v49, %v144_v54 }
 0x1d2   :  { %vm194_vm4 = vmand %vm174_vm5, %vm184_vm14  ;;  %vm224_vm14 = vcmp.le.f32.partialorder %v94_v7, 16.0  ;;  %vm226_vm7 = vcmp.le.f32.partialorder %v96_v43, 16.0  ;;  %v145_v31 = vmul.f32 20.0, %v135_v3 }
 0x1d3   :  { %vm214_vm5 = vmand %vm194_vm4, %vm204_vm3  ;;  %vm3580_vm4 = vcmp.lt.f32.partialorder %v131_v29, 2.0  ;;  %vm177_vm13 = vcmp.ge.f32.partialorder %v154_v6, 1.0 }
 0x1d4   :  { %vm260_vm10 = vmand %vm3536_vm11, %vm3542_vm12  ;;  %vm187_vm11 = vcmp.le.f32.partialorder %v154_v6, 16.0  ;;  %v155_v61 = vsub.f32 %v3486_v13, %v145_v31 }
 0x1d5   :  { %vm253_vm6 = vmand %vm3548_vm0, %vm3554_vm1 }
 0x1d6   :  { %vm3574_vm3 = vmand %vm214_vm5, %vm224_vm14  ;;  %v3611_v29 = vsel %vm253_vm6, 1.0, %v2490_v58 }
 0x1d7   :  { %vm3590_vm0 = vmand %vm3508_vm2, %vm206_vm15 }
 0x1d8   :  { %vm254_vm2 = vmand %vm3574_vm3, %vm3580_vm4  ;;  %vm178_vm3 = vcmp.ge.f32.partialorder %v155_v61, 1.0  ;;  %vm188_vm4 = vcmp.le.f32.partialorder %v155_v61, 16.0 }
 0x1d9   :  { %vm3633_vm12 = vmand %vm3590_vm0, %vm226_vm7 }
 0x1fd   :  { %v971_v52 = vpop.f32.mrf.mxu0  ;;  %v3455_v8 = vpop.f32.mrf.mxu1 }
 0x1fe   :  { %v1092_v56 = vadd.f32 %v971_v52, %v3260_v28  ;;  %v3471_v28 = vmul.f32 %v3301_v1, %v109_v62  ;;  %v87_v62 = vmul.f32 32.0, %v3428_v49  ;;  %v99_v49 = vsub.f32 %v42_v39, %v89_v38 }
 0x200   :  { %v1107_v9 = vadd.f32 %v3421_v5, %v1092_v56  ;;  %v136_v22 = vfloor.f32 %v3471_v28  ;;  %v97_v46 = vsub.f32 %v40_v10, %v87_v62  ;;  %vm209_vm14 = vcmp.ge.f32.partialorder %v99_v49, 1.0 }
 0x201   :  { %vm229_vm0 = vcmp.le.f32.partialorder %v99_v49, 16.0 }
 0x202   :  { %v3489_v16 = vmul.f32 %v3453_v18, %v1107_v9  ;;  %v146_v1 = vmul.f32 20.0, %v136_v22  ;;  %vm207_vm15 = vcmp.ge.f32.partialorder %v97_v46, 1.0 }
 0x204   :  { %v3514_v11 = vpack.i.bf16 %v3492_v15, %v3489_v16  ;;  %v156_v14 = vsub.f32 %v3418_v48, %v146_v1  ;;  %v4452_v1 = vcvt.s32.f32 %v3406_v12  ;;  %v761_v12 = vadd.f32 %v3280_v63, %v3171_v40 }
 0x205   :  { %v973_v24 = vpop.f32.mrf.mxu0  ;;  %v1038_v0 = vpop.f32.mrf.mxu1 }
 0x206   :  { %2288 = vrot.lane.b32.xlu2 %v3514_v11, %s2484_s8  ;;  %vm179_vm8 = vcmp.ge.f32.partialorder %v156_v14, 1.0  ;;  %vm189_vm9 = vcmp.le.f32.partialorder %v156_v14, 16.0  ;;  %v98_v21 = vsub.f32 %v4452_v1, %v88_v60  ;;  %v1097_v62 = vadd.f32 %v3455_v8, %v761_v12 }
 0x207   :  { %vm3657_vm5 = vmand %vm179_vm8, %vm189_vm9  ;;  %vm227_vm8 = vcmp.le.f32.partialorder %v97_v46, 16.0 }
 0x208   :  { %vm219_vm7 = vmand %vm3657_vm5, %vm209_vm14  ;;  %vm3695_vm5 = vcmp.lt.f32.partialorder %v136_v22, 2.0  ;;  %v1112_v22 = vadd.f32 %v3421_v5, %v1097_v62 }
 0x209   :  { %vm198_vm9 = vmand %vm178_vm3, %vm188_vm4  ;;  %vm228_vm3 = vcmp.le.f32.partialorder %v98_v21, 16.0 }
 0x20d   :  { %v1023_v52 = vpop.f32.mrf.mxu0  ;;  %v1088_v53 = vpop.f32.mrf.mxu1 }
 0x20e   :  { %v1096_v41 = vadd.f32 %v1023_v52, %v3275_v33  ;;  %v1101_v48 = vadd.f32 %v1088_v53, %v813_v27  ;;  %v3608_v33 = vsel %vm260_vm10, 1.0, %v2490_v58  ;;  %vm197_vm10 = vmand %vm177_vm13, %vm187_vm11  ;;  %vm208_vm13 = vcmp.ge.f32.partialorder %v98_v21, 1.0 }
 0x20f   :  { %vm3689_vm11 = vmand %vm219_vm7, %vm229_vm0 }
 0x210   :  { %v1116_v9 = vadd.f32 %v3421_v5, %v1101_v48  ;;  %v997_v59 = vpop.f32.mrf.mxu2  ;;  %v1111_v56 = vadd.f32 %v3421_v5, %v1096_v41  ;;  %v1010_v19 = vpop.f32.mrf.mxu3  ;;  %vm259_vm4 = vmand %vm3689_vm11, %vm3695_vm5  ;;  %vm4471_vm5 = vcmask 195584  }
 0x211   :  { %v1094_v44 = vadd.f32 %v997_v59, %v3272_v37  ;;  %v1095_v7 = vadd.f32 %v1010_v19, %v3195_v23  ;;  %v4447_v37 = vfloor.f32 %v3362_v50  ;;  %v3650_v23 = vsel %vm254_vm2, 1.0, %v2490_v58  ;;  %vm217_vm2 = vmand %vm197_vm10, %vm207_vm15 }
 0x212   :  { %v3626_v39 = vmul.f32 %v3608_v33, %v1116_v9  ;;  %v3662_v0 = vmul.f32 %v3600_v17, %v1111_v56  ;;  %vm3699_vm14 = vmand %vm217_vm2, %vm227_vm8  ;;  %vm3705_vm10 = vcmp.lt.f32.partialorder %v134_v35, 2.0  ;;  %vm3736_vm2 = vcmp.lt.f32.partialorder %v135_v3, 2.0 }
 0x213   :  { %vm3639_vm1 = vcmp.lt.f32.partialorder %v4447_v37, 2.0  ;;  %v1109_v20 = vadd.f32 %v3421_v5, %v1094_v44  ;;  %v1110_v13 = vadd.f32 %v3421_v5, %v1095_v7  ;;  %vm218_vm15 = vmand %vm198_vm9, %vm208_vm13  ;;  %v3743_v6 = vsel %vm259_vm4, 1.0, %v2490_v58 }
 0x214   :  { %v2307_v24 = vpack.i.bf16 %v3626_v39, %v3489_v16  ;;  %vm256_vm6 = vmand %vm3633_vm12, %vm3639_vm1  ;;  %v2322_v31 = vpack.i.bf16 %v3626_v39, %v3662_v0  ;;  %vm4465_vm1 = vcmp.lt.s32.totalorder %v2633_v32, 127  ;;  %vm4467_vm8 = vcmp.lt.s32.totalorder %v2633_v32, 1 }
 0x215   :  { %v3665_v43 = vmul.f32 %v3611_v29, %v1109_v20  ;;  %v1025_v25 = vpop.f32.mrf.mxu0  ;;  %v1090_v42 = vpop.f32.mrf.mxu1  ;;  %v3675_v34 = vmul.f32 %v3650_v23, %v1110_v13  ;;  %vm257_vm7 = vmand %vm3699_vm14, %vm3705_vm10  ;;  %v3728_v2 = vsel %vm256_vm6, 1.0, %v2490_v58  ;;  %vm4466_vm6 = vcmask 1043456  }
 0x216   :  { %2308 = vrot.lane.b32.xlu1 %v2307_v24, %s2485_s13  ;;  %vm3730_vm0 = vmand %vm218_vm15, %vm228_vm3  ;;  %v3751_v26 = vmul.f32 %v3728_v2, %v1112_v22  ;;  %v3754_v3 = vsel %vm257_vm7, 1.0, %v2490_v58  ;;  %v2372_v24 = vpack.i.bf16 %v3662_v0, %v3626_v39  ;;  %vm4472_vm14 = vcmp.lt.s32.totalorder %v2633_v32, 32 }
 0x217   :  { %v2292_v54 = vpack.i.bf16 %v3662_v0, %v3665_v43  ;;  %v2297_v27 = vpack.i.bf16 %v3675_v34, %v3492_v15  ;;  %v2312_v53 = vpack.i.bf16 %v3489_v16, %v3675_v34  ;;  %v2302_v45 = vpack.i.bf16 %v3665_v43, %v3492_v15  ;;  %vm258_vm12 = vmand %vm3730_vm0, %vm3736_vm2 }
 0x218   :  { %v999_v38 = vpop.f32.mrf.mxu2  ;;  %v1012_v14 = vpop.f32.mrf.mxu3  ;;  %v2317_v56 = vpack.i.bf16 %v3675_v34, %v3751_v26  ;;  %v3773_v19 = vsel %vm258_vm12, 1.0, %v2490_v58  ;;  %v2332_v37 = vpack.i.bf16 %v3665_v43, %v3662_v0  ;;  %v2362_v50 = vpack.i.bf16 %v3675_v34, %v3665_v43  ;;  %vm4468_vm9 = vmmov %vm4465_vm1 }
 0x219   :  { %2293 = vrot.lane.b32.xlu0 %v2292_v54, %s2484_s8  ;;  %2298 = vrot.lane.b32.xlu2 %v2297_v27, %s2485_s13  ;;  %vm4469_vm13 = vmmov %vm4466_vm6 }
 0x21a   :  { %vm4470_vm11 = vmmov %vm4467_vm8 }
 0x21b   :  { %vm4473_vm10 = vmmov %vm4472_vm14 }
 0x21c   :  { %vm4474_vm15 = vmmov %vm4473_vm10 }
 0x21d   :  { %v1075_v28 = vpop.f32.mrf.mxu0  ;;  %vm4475_vm3 = vmmov %vm4473_vm10 }
 0x21e   :  { %v1100_v47 = vadd.f32 %v1075_v28, %v3285_v57  ;;  %2313 = vrot.lane.b32.xlu1 %v2312_v53, %s2483_s7  ;;  %vm4476_vm4 = vmmov %vm4471_vm5 }
 0x21f   :  { %vm4477_vm7 = vmmov %vm4465_vm1 }
 0x220   :  { %v1115_v41 = vadd.f32 %v3421_v5, %v1100_v47  ;;  %v1049_v48 = vpop.f32.mrf.mxu2  ;;  %v1062_v49 = vpop.f32.mrf.mxu3  ;;  %vm4478_vm0 = vmmov %vm4465_vm1 }
 0x221   :  { %v1098_v30 = vadd.f32 %v1049_v48, %v3283_v51  ;;  %2303 = vrot.lane.b32.xlu0 %v2302_v45, %s2483_s7  ;;  %v1099_v9 = vadd.f32 %v1062_v49, %v3263_v4  ;;  %2323 = vrot.lane.b32.xlu2 %v2322_v31, %s2483_s7  ;;  %vm4479_vm2 = vmmov %vm4478_vm0 }
 0x222   :  { %v3763_v51 = vmul.f32 %v3743_v6, %v1115_v41  ;;  %vm4480_vm12 = vmmov %vm4478_vm0 }
 0x223   :  { %v1113_v59 = vadd.f32 %v3421_v5, %v1098_v30  ;;  %v1114_v46 = vadd.f32 %v3421_v5, %v1099_v9 }
 0x224   :  { %v2327_v4 = vpack.i.bf16 %v3751_v26, %v3763_v51 }
 0x225   :  { %v3770_v44 = vmul.f32 %v3754_v3, %v1113_v59  ;;  %v1077_v60 = vpop.f32.mrf.mxu0  ;;  %v3781_v5 = vmul.f32 %v3773_v19, %v1114_v46 }
 0x226   :  { %2318 = vrot.lane.b32.xlu1 %v2317_v56, %s2484_s8 }
 0x227   :  { %v2337_v7 = vpack.i.bf16 %v3763_v51, %v3770_v44  ;;  %v2342_v58 = vpack.i.bf16 %v3781_v5, %v3751_v26  ;;  %v2347_v10 = vpack.i.bf16 %v3781_v5, %v3770_v44  ;;  %v2367_v20 = vpack.i.bf16 %v3770_v44, %v3763_v51 }
 0x228   :  { %v1051_v61 = vpop.f32.mrf.mxu2  ;;  %v1064_v36 = vpop.f32.mrf.mxu3  ;;  %v2357_v13 = vpack.i.bf16 %v3781_v5, %v3626_v39 }
 0x229   :  { %2328 = vrot.lane.b32.xlu0 %v2327_v4, %s2483_s7  ;;  %2338 = vrot.lane.b32.xlu2 %v2337_v7, %s2484_s8 }
 0x22e   :  { %2343 = vrot.lane.b32.xlu1 %v2342_v58, %s2485_s13 }
 0x231   :  { %2333 = vrot.lane.b32.xlu0 %v2332_v37, %s2485_s13  ;;  %2348 = vrot.lane.b32.xlu2 %v2347_v10, %s2483_s7 }
 0x236   :  { %2368 = vrot.lane.b32.xlu1 %v2367_v20, %s2485_s13 }
 0x239   :  { %2358 = vrot.lane.b32.xlu0 %v2357_v13, %s2484_s8  ;;  %2353 = vrot.lane.b32.xlu2 %v3514_v11, %s2486_s0 }
 0x23e   :  { %2373 = vrot.lane.b32.xlu1 %v2372_v24, %s2486_s0 }
 0x241   :  { %2363 = vrot.lane.b32.xlu0 %v2362_v50, %s2486_s0 }
 0x260   :  { %v3808_v25 = vpop.permute.xlu2 %2288 }
 0x261   :  { %v2291_v42 = vunpack.i.h.bf16 %v3808_v25  ;;  %v2290_v1 = vunpack.i.l.bf16 %v3808_v25 }
 0x263   :  { %v1297_v11 = vsel %vm4465_vm1, %v2290_v1, %v2291_v42  ;;  %vm4481_vm1 = vmmov %vm4475_vm3 }
 0x264   :  { %v1309_v21 = vpack.c.bf16 %v1297_v11, %v1297_v11 }
 0x266   :  { %v1325_v54 = vsel %vm4466_vm6, %v1309_v21, 0 }
 0x267   :  { %1360 = vmatpush.bf16.msrb.mxu2 %v1325_v54 }
 0x273   :  { %v3817_v12 = vpop.permute.xlu2 %2298 }
 0x274   :  { %v2300_v28 = vunpack.i.l.bf16 %v3817_v12 }
 0x27b   :  { %v3819_v38 = vpop.permute.xlu2 %2323 }
 0x27c   :  { %v2326_v48 = vunpack.i.h.bf16 %v3819_v38  ;;  %v2325_v13 = vunpack.i.l.bf16 %v3819_v38 }
 0x283   :  { %v3833_v22 = vpop.permute.xlu2 %2338 }
 0x284   :  { %v2340_v36 = vunpack.i.l.bf16 %v3833_v22 }
 0x288   :  { %v3821_v27 = vpop.permute.xlu1 %2308 }
 0x289   :  { %v2311_v14 = vunpack.i.h.bf16 %v3821_v27  ;;  %v2310_v62 = vunpack.i.l.bf16 %v3821_v27 }
 0x28b   :  { %v2294_v52 = vpop.permute.xlu0 %2293  ;;  %v1268_v40 = vsel %vm4467_vm8, %v2311_v14, %v2310_v62  ;;  %v1267_v45 = vsel %vm4470_vm11, %v2310_v62, %v2300_v28  ;;  %v3870_v37 = vpop.permute.xlu2 %2348  ;;  %vm4482_vm8 = vmmov %vm4466_vm6 }
 0x28c   :  { %v2295_v63 = vunpack.i.l.bf16 %v2294_v52  ;;  %v1299_v8 = vpack.c.bf16 %v3489_v16, %v1268_v40  ;;  %v3843_v16 = vld [vmem:[%s4399_s3 + $0x4] sm:$0xf]  ;;  %v1300_v59 = vpack.c.bf16 %v3492_v15, %v1267_v45  ;;  %v2296_v58 = vunpack.i.h.bf16 %v2294_v52  ;;  %vm4485_vm11 = vmmov %vm4466_vm6 }
 0x28d   :  { %v2350_v54 = vunpack.i.l.bf16 %v3870_v37 }
 0x28e   :  { %1361 = vmatpush.bf16.msrb.mxu2 %v1299_v8  ;;  %v1296_v53 = vsel %vm4468_vm9, %v2291_v42, %v2295_v63  ;;  %vm4483_vm9 = vmmov %vm4481_vm1 }
 0x28f   :  { %v1310_v47 = vpack.c.bf16 %v1296_v53, %v1296_v53 }
 0x290   :  { %v2314_v35 = vpop.permute.xlu1 %2313 }
 0x291   :  { %v1328_v57 = vsel %vm4469_vm13, %v1310_v47, 0  ;;  %v2316_v41 = vunpack.i.h.bf16 %v2314_v35  ;;  %2062 = vmatmul.msk.bf16.vlgmr.msrb.gmra.mxu2 %vm4471_vm5, %v3843_v16  ;;  %v2315_v30 = vunpack.i.l.bf16 %v2314_v35  ;;  %vm4484_vm13 = vmmov %vm4466_vm6 }
 0x292   :  { %1373 = vmatpush.bf16.msrb.mxu3 %v1328_v57  ;;  %vm4486_vm5 = vmmov %vm4481_vm1 }
 0x293   :  { %v2304_v31 = vpop.permute.xlu0 %2303  ;;  %v3863_v4 = vsel %vm4475_vm3, %v2326_v48, %v2316_v41 }
 0x294   :  { %v2306_v49 = vunpack.i.h.bf16 %v2304_v31  ;;  %v2305_v9 = vunpack.i.l.bf16 %v2304_v31 }
 0x296   :  { %1374 = vmatpush.bf16.msrb.mxu3 %v1300_v59  ;;  %v3851_v46 = vsel %vm4472_vm14, %v2306_v49, %v2315_v30  ;;  %v3855_v56 = vsel %vm4473_vm10, %v2305_v9, %v2306_v49  ;;  %v3859_v60 = vsel %vm4474_vm15, %v2316_v41, %v2305_v9  ;;  %vm4487_vm14 = vmmov %vm4481_vm1  ;;  %vm4488_vm10 = vcmp.lt.s32.totalorder %v2633_v32, 1 }
 0x297   :  { %v2377_v15 = vpack.i.bf16 %v3851_v46, %v3855_v56  ;;  %v2387_v7 = vpack.i.bf16 %v3859_v60, %v3863_v4  ;;  %v2382_v35 = vpack.i.bf16 %v3855_v56, %v3859_v60  ;;  %v2392_v31 = vpack.i.bf16 %v3851_v46, %v3863_v4  ;;  %vm4489_vm15 = vmmov %vm4488_vm10 }
 0x298   :  { %v2319_v61 = vpop.permute.xlu1 %2318  ;;  %vm4490_vm3 = vmmov %vm4488_vm10 }
 0x299   :  { %v2321_v10 = vunpack.i.h.bf16 %v2319_v61  ;;  %v2320_v20 = vunpack.i.l.bf16 %v2319_v61  ;;  %2378 = vrot.lane.b32.xlu2 %v2377_v15, %s2484_s8  ;;  %2388 = vrot.lane.b32.xlu0 %v2387_v7, %s2484_s8  ;;  %v2301_v15 = vunpack.i.h.bf16 %v3817_v12 }
 0x29a   :  { %2063 = vmatmul.msk.bf16.vlgmr.msrb.gmra.mxu3 %vm4476_vm4, %v3843_v16  ;;  %vm4491_vm4 = vmmov %vm4490_vm3 }
 0x29b   :  { %v2329_v24 = vpop.permute.xlu0 %2328  ;;  %v1295_v50 = vsel %vm4477_vm7, %v2295_v63, %v2321_v10  ;;  %v1294_v42 = vsel %vm4478_vm0, %v2321_v10, %v2296_v58  ;;  %v1293_v11 = vsel %vm4479_vm2, %v2296_v58, %v2320_v20  ;;  %v1292_v21 = vsel %vm4480_vm12, %v2320_v20, %v2340_v36  ;;  %v3913_v10 = vpop.permute.xlu2 %2353  ;;  %vm4492_vm7 = vmmov %vm4481_vm1 }
 0x29c   :  { %v2331_v38 = vunpack.i.h.bf16 %v2329_v24  ;;  %v1311_v62 = vpack.c.bf16 %v1295_v50, %v1295_v50  ;;  %v1312_v52 = vpack.c.bf16 %v1294_v42, %v1294_v42  ;;  %v1313_v40 = vpack.c.bf16 %v1293_v11, %v1293_v11  ;;  %vm4494_vm2 = vmmov %vm4481_vm1 }
 0x29d   :  { %v1314_v8 = vpack.c.bf16 %v1292_v21, %v1292_v21  ;;  %v3890_v63 = vsel %vm4481_vm1, %v2315_v30, %v2325_v13  ;;  %v2330_v9 = vunpack.i.l.bf16 %v2329_v24  ;;  %v2407_v20 = vpack.i.bf16 %v3770_v44, %v3751_v26 }
 0x29e   :  { %v1331_v53 = vsel %vm4466_vm6, %v1311_v62, 0  ;;  %v1334_v47 = vsel %vm4482_vm8, %v1312_v52, 0  ;;  %v3898_v57 = vsel %vm4483_vm9, %v2331_v38, %v2350_v54  ;;  %v1337_v45 = vsel %vm4484_vm13, %v1313_v40, 0 }
 0x29f   :  { %1386 = vmatpush.bf16.msra.mxu0 %v1331_v53  ;;  %1399 = vmatpush.bf16.msra.mxu1 %v1334_v47  ;;  %v1340_v41 = vsel %vm4485_vm11, %v1314_v8, 0  ;;  %v2397_v30 = vpack.i.bf16 %v3898_v57, %v3890_v63  ;;  %v2412_v24 = vpack.i.bf16 %v3763_v51, %v3781_v5  ;;  %v3921_v50 = vsel %vm4486_vm5, %v2330_v9, %v2326_v48 }
 0x2a0   :  { %1412 = vmatpush.bf16.msra.mxu2 %v1337_v45  ;;  %1425 = vmatpush.bf16.msra.mxu3 %v1340_v41  ;;  %v3906_v49 = vpop.permute.xlu1 %2343  ;;  %v3925_v42 = vsel %vm4487_vm14, %v2325_v13, %v2331_v38  ;;  %v2351_v48 = vunpack.i.h.bf16 %v3870_v37  ;;  %v2356_v38 = vunpack.i.h.bf16 %v3913_v10  ;;  %vm4493_vm0 = vcmp.lt.s32.totalorder %v2633_v32, 96 }
 0x2a1   :  { %2383 = vrot.lane.b32.xlu2 %v2382_v35, %s2485_s13  ;;  %2393 = vrot.lane.b32.xlu0 %v2392_v31, %s2485_s13  ;;  %v2345_v7 = vunpack.i.l.bf16 %v3906_v49  ;;  %v2402_v8 = vpack.i.bf16 %v3925_v42, %v3921_v50  ;;  %vm4495_vm12 = vcmask 195584   ;;  %vm4496_vm1 = vcmp.lt.s32.totalorder %v2633_v32, 127 }
 0x2a2   :  { %2398 = vrot.lane.b32.xlu1 %v2397_v30, %s2484_s8  ;;  %v3962_v45 = vsel %vm4494_vm2, %v2350_v54, %v2351_v48  ;;  %vm4497_vm6 = vmmov %vm4496_vm1  ;;  %vm4503_vm14 = vcmask 1043456  }
 0x2a3   :  { %v2334_v59 = vpop.permute.xlu0 %2333  ;;  %vm4498_vm8 = vmmov %vm4496_vm1 }
 0x2a4   :  { %v2336_v61 = vunpack.i.h.bf16 %v2334_v59  ;;  %v2335_v58 = vunpack.i.l.bf16 %v2334_v59  ;;  %vm4499_vm9 = vmmov %vm4496_vm1 }
 0x2a5   :  { %vm4500_vm13 = vmmov %vm4495_vm12 }
 0x2a6   :  { %v1266_v11 = vsel %vm4488_vm10, %v2300_v28, %v2336_v61  ;;  %v1265_v21 = vsel %vm4489_vm15, %v2336_v61, %v2301_v15  ;;  %v1264_v62 = vsel %vm4490_vm3, %v2301_v15, %v2335_v58  ;;  %v1263_v52 = vsel %vm4491_vm4, %v2335_v58, %v2345_v7  ;;  %vm4501_vm11 = vmmov %vm4495_vm12 }
 0x2a7   :  { %v1301_v40 = vpack.c.bf16 %v3665_v43, %v1266_v11  ;;  %v1302_v13 = vpack.c.bf16 %v3675_v34, %v1265_v21  ;;  %v1303_v12 = vpack.c.bf16 %v3662_v0, %v1264_v62  ;;  %v2355_v28 = vunpack.i.l.bf16 %v3913_v10  ;;  %vm4502_vm5 = vmmov %vm4501_vm11 }
 0x2a8   :  { %v1304_v53 = vpack.c.bf16 %v3751_v26, %v1263_v52  ;;  %v2369_v37 = vpop.permute.xlu1 %2368  ;;  %v3951_v0 = vsel %vm4492_vm7, %v2351_v48, %v2330_v9  ;;  %v2341_v43 = vunpack.i.h.bf16 %v3833_v22  ;;  %v2427_v9 = vpack.i.bf16 %v3890_v63, %v3898_v57  ;;  %vm4504_vm10 = vmmov %vm4503_vm14 }
 0x2a9   :  { %2408 = vrot.lane.b32.xlu2 %v2407_v20, %s2486_s0  ;;  %2413 = vrot.lane.b32.xlu0 %v2412_v24, %s2486_s0  ;;  %v3958_v35 = vsel %vm4493_vm0, %v2355_v28, %v2356_v38  ;;  %v2371_v41 = vunpack.i.h.bf16 %v2369_v37  ;;  %v2370_v31 = vunpack.i.l.bf16 %v2369_v37  ;;  %v2417_v11 = vpack.i.bf16 %v3925_v42, %v3962_v45  ;;  %vm4505_vm15 = vmmov %vm4490_vm3 }
 0x2aa   :  { %2403 = vrot.lane.b32.xlu1 %v2402_v8, %s2485_s13  ;;  %1387 = vmatpush.bf16.msra.mxu0 %v1301_v40  ;;  %v2422_v30 = vpack.i.bf16 %v3958_v35, %v3951_v0  ;;  %vm4506_vm3 = vmmov %vm4504_vm10 }
 0x2ab   :  { %1400 = vmatpush.bf16.msra.mxu1 %v1302_v13  ;;  %1413 = vmatpush.bf16.msra.mxu2 %v1303_v12  ;;  %v2359_v34 = vpop.permute.xlu0 %2358  ;;  %v1262_v21 = vsel %vm4505_vm15, %v2345_v7, %v2371_v41  ;;  %vm4507_vm4 = vmmov %vm4506_vm3 }
 0x2ac   :  { %1426 = vmatpush.bf16.msra.mxu3 %v1304_v53  ;;  %v2361_v47 = vunpack.i.h.bf16 %v2359_v34  ;;  %v2360_v26 = vunpack.i.l.bf16 %v2359_v34  ;;  %vm4508_vm7 = vmmov %vm4505_vm15  ;;  %v1305_v12 = vpack.c.bf16 %v3770_v44, %v1262_v21  ;;  %v2432_v44 = vpack.i.bf16 %v3958_v35, %v3962_v45 }
 0x2ad   :  { %2064 = vmatmul.msk.bf16.vlgmr.msra.gmra.mxu0 %vm4495_vm12, %v3843_v16  ;;  %vm4509_vm0 = vmmov %vm4508_vm7  ;;  %vm4511_vm12 = vcmp.lt.s32.totalorder %v2633_v32, 96 }
 0x2ae   :  { %v1291_v59 = vsel %vm4496_vm1, %v2340_v36, %v2361_v47  ;;  %v1290_v54 = vsel %vm4497_vm6, %v2361_v47, %v2341_v43  ;;  %v1289_v15 = vsel %vm4498_vm8, %v2341_v43, %v2360_v26  ;;  %v1298_v61 = vsel %vm4499_vm9, %v2360_v26, %v2290_v1  ;;  %2066 = vmatmul.msk.bf16.vlgmr.msra.gmra.mxu2 %vm4500_vm13, %v3843_v16  ;;  %vm4510_vm2 = vmmov %vm4509_vm0 }
 0x2af   :  { %v1315_v58 = vpack.c.bf16 %v1291_v59, %v1291_v59  ;;  %v1316_v20 = vpack.c.bf16 %v1290_v54, %v1290_v54  ;;  %v1317_v22 = vpack.c.bf16 %v1289_v15, %v1289_v15  ;;  %v1318_v24 = vpack.c.bf16 %v1298_v61, %v1298_v61  ;;  %2065 = vmatmul.msk.bf16.vlgmr.msra.gmra.mxu1 %vm4501_vm11, %v3843_v16  ;;  %vm4512_vm1 = vmmov %vm4511_vm12 }
 0x2b0   :  { %v2346_v36 = vunpack.i.h.bf16 %v3906_v49  ;;  %2067 = vmatmul.msk.bf16.vlgmr.msra.gmra.mxu3 %vm4502_vm5, %v3843_v16  ;;  %v1259_v7 = vsel %vm4510_vm2, %v2370_v31, %v2311_v14  ;;  %v4011_v37 = vpop.permute.xlu1 %2373  ;;  %vm4513_vm6 = vmmov %vm4502_vm5  ;;  %vm4517_vm11 = vcmp.lt.s32.totalorder %v2633_v32, 127 }
 0x2b1   :  { %2423 = vrot.lane.b32.xlu2 %v2422_v30, %s2484_s8  ;;  %2428 = vrot.lane.b32.xlu0 %v2427_v9, %s2485_s13  ;;  %v1343_v25 = vsel %vm4503_vm14, %v1315_v58, 0  ;;  %v1346_v1 = vsel %vm4504_vm10, %v1316_v20, 0  ;;  %v1349_v49 = vsel %vm4506_vm3, %v1317_v22, 0  ;;  %v1352_v62 = vsel %vm4507_vm4, %v1318_v24, 0  ;;  %vm4514_vm8 = vmmov %vm4502_vm5  ;;  %v4056_v58 = vld [vmem:[%s4399_s3] sm:$0xf] }
 0x2b2   :  { %2418 = vrot.lane.b32.xlu1 %v2417_v11, %s2484_s8  ;;  %1438 = vmatpush.bf16.msrb.mxu0 %v1343_v25  ;;  %v1261_v52 = vsel %vm4508_vm7, %v2371_v41, %v2346_v36  ;;  %v1260_v48 = vsel %vm4509_vm0, %v2346_v36, %v2370_v31  ;;  %v1308_v43 = vpack.c.bf16 %v3626_v39, %v1259_v7  ;;  %vm4515_vm9 = vmmov %vm4502_vm5  ;;  %v2376_v15 = vunpack.i.h.bf16 %v4011_v37 }
 0x2b3   :  { %1451 = vmatpush.bf16.msrb.mxu1 %v1346_v1  ;;  %1464 = vmatpush.bf16.msrb.mxu2 %v1349_v49  ;;  %v2364_v40 = vpop.permute.xlu0 %2363  ;;  %v1306_v8 = vpack.c.bf16 %v3781_v5, %v1261_v52  ;;  %v1307_v53 = vpack.c.bf16 %v3763_v51, %v1260_v48  ;;  %v2375_v51 = vunpack.i.l.bf16 %v4011_v37  ;;  %vm4516_vm13 = vmmov %vm4502_vm5 }
 0x2b4   :  { %1477 = vmatpush.bf16.msrb.mxu3 %v1352_v62  ;;  %v2365_v13 = vunpack.i.l.bf16 %v2364_v40  ;;  %vm4518_vm5 = vmmov %vm4506_vm3  ;;  %v2366_v59 = vunpack.i.h.bf16 %v2364_v40 }
 0x2b5   :  { %v4031_v39 = vsel %vm4512_vm1, %v2375_v51, %v2355_v28  ;;  %vm4519_vm14 = vmmov %vm4509_vm0 }
 0x2b6   :  { %1439 = vmatpush.bf16.msrb.mxu0 %v1305_v12  ;;  %v4016_v34 = vsel %vm4511_vm12, %v2356_v38, %v2365_v13  ;;  %v2447_v5 = vpack.i.bf16 %v3951_v0, %v4031_v39  ;;  %vm4520_vm10 = vmmov %vm4513_vm6 }
 0x2b7   :  { %1452 = vmatpush.bf16.msrb.mxu1 %v1306_v8  ;;  %1465 = vmatpush.bf16.msrb.mxu2 %v1307_v53  ;;  %v2437_v27 = vpack.i.bf16 %v3921_v50, %v4016_v34  ;;  %vm4521_vm15 = vmmov %vm4512_vm1 }
 0x2b8   :  { %1478 = vmatpush.bf16.msrb.mxu3 %v1308_v43  ;;  %vm4522_vm3 = vmmov %vm4512_vm1 }
 0x2b9   :  { %2438 = vrot.lane.b32.xlu2 %v2437_v27, %s2484_s8  ;;  %vm4523_vm4 = vmmov %vm4512_vm1 }
 0x2ba   :  { %2433 = vrot.lane.b32.xlu1 %v2432_v44, %s2485_s13  ;;  %v4070_v22 = vsel %vm4523_vm4, %v2365_v13, %v2366_v59  ;;  %vm4524_vm7 = vmmov %vm4512_vm1 }
 0x2bb   :  { %vm4525_vm0 = vmmov %vm4517_vm11 }
 0x2bc   :  { %vm4526_vm2 = vmmov %vm4525_vm0 }
 0x2bd   :  { %2068 = vmatmul.msk.bf16.vlgmr.msrb.gmra.mxu0 %vm4513_vm6, %v3843_v16  ;;  %vm4527_vm12 = vmmov %vm4518_vm5 }
 0x2be   :  { %2070 = vmatmul.msk.bf16.vlgmr.msrb.gmra.mxu2 %vm4514_vm8, %v3843_v16  ;;  %vm4528_vm1 = vmmov %vm4518_vm5 }
 0x2bf   :  { %2069 = vmatmul.msk.bf16.vlgmr.msrb.gmra.mxu1 %vm4515_vm9, %v3843_v16  ;;  %vm4529_vm6 = vmmov %vm4519_vm14 }
 0x2c0   :  { %2071 = vmatmul.msk.bf16.vlgmr.msrb.gmra.mxu3 %vm4516_vm13, %v3843_v16  ;;  %vm4530_vm8 = vmmov %vm4525_vm0 }
 0x2c1   :  { %1679 = vrot.lane.b32.xlu2 %v4016_v34, %s2485_s13  ;;  %vm4531_vm9 = vmmov %vm4528_vm1 }
 0x2c2   :  { %2448 = vrot.lane.b32.xlu1 %v2447_v5, %s2485_s13  ;;  %vm4532_vm13 = vmmov %vm4529_vm6 }
 0x2f3   :  { %v2379_v14 = vpop.permute.xlu2 %2378 }
 0x2f4   :  { %v2381_v10 = vunpack.i.h.bf16 %v2379_v14  ;;  %v2380_v38 = vunpack.i.l.bf16 %v2379_v14 }
 0x2f6   :  { %v1214_v28 = vsel %vm4517_vm11, %v2380_v38, %v2381_v10  ;;  %vm4533_vm11 = vmmov %vm4520_vm10 }
 0x2f7   :  { %v1230_v47 = vpack.c.bf16 %v1214_v28, %v1214_v28 }
 0x2f9   :  { %v1494_v26 = vsel %vm4518_vm5, %v1230_v47, 0  ;;  %vm4534_vm5 = vmmov %vm4522_vm3 }
 0x2fa   :  { %1549 = vmatpush.bf16.msra.mxu2 %v1494_v26 }
 0x2fb   :  { %v2384_v41 = vpop.permute.xlu2 %2383 }
 0x2fc   :  { %v2386_v31 = vunpack.i.h.bf16 %v2384_v41  ;;  %v2385_v30 = vunpack.i.l.bf16 %v2384_v41 }
 0x2fe   :  { %v1185_v16 = vsel %vm4519_vm14, %v2385_v30, %v2386_v31  ;;  %vm4535_vm14 = vmmov %vm4522_vm3 }
 0x2ff   :  { %v1220_v9 = vpack.c.bf16 %v3855_v56, %v1185_v16  ;;  %v4066_v56 = vsel %vm4522_vm3, %v2366_v59, %v2376_v15 }
 0x301   :  { %1550 = vmatpush.bf16.msra.mxu2 %v1220_v9 }
 0x303   :  { %v2409_v54 = vpop.permute.xlu2 %2408 }
 0x304   :  { %v2410_v61 = vunpack.i.l.bf16 %v2409_v54  ;;  %2074 = vmatmul.msk.bf16.vlgmr.msra.gmra.mxu2 %vm4520_vm10, %v4056_v58  ;;  %v2411_v11 = vunpack.i.h.bf16 %v2409_v54  ;;  %vm4536_vm10 = vmmov %vm4522_vm3 }
 0x305   :  { %vm4538_vm3 = vmmov %vm4533_vm11 }
 0x306   :  { %v4062_v20 = vsel %vm4521_vm15, %v2376_v15, %v2410_v61  ;;  %v4084_v49 = vsel %vm4524_vm7, %v2410_v61, %v2411_v11  ;;  %vm4537_vm15 = vmmov %vm4529_vm6 }
 0x307   :  { %v2457_v24 = vpack.i.bf16 %v4062_v20, %v4066_v56  ;;  %v2442_v36 = vpack.i.bf16 %v4062_v20, %v4070_v22  ;;  %v2452_v48 = vpack.i.bf16 %v4066_v56, %v4084_v49  ;;  %vm4539_vm4 = vmmov %vm4538_vm3 }
 0x308   :  { %vm4540_vm7 = vmmov %vm4525_vm0 }
 0x309   :  { %2458 = vrot.lane.b32.xlu2 %v2457_v24, %s2485_s13  ;;  %2443 = vrot.lane.b32.xlu0 %v2442_v36, %s2484_s8 }
 0x30b   :  { %v4078_v25 = vpop.permute.xlu0 %2388  ;;  %v4097_v27 = vpop.permute.xlu2 %2423 }
 0x30c   :  { %v2391_v1 = vunpack.i.h.bf16 %v4078_v25  ;;  %v2390_v21 = vunpack.i.l.bf16 %v4078_v25 }
 0x30e   :  { %v1216_v62 = vsel %vm4525_vm0, %v2390_v21, %v2391_v1  ;;  %v1215_v52 = vsel %vm4526_vm2, %v2391_v1, %v2380_v38  ;;  %v2462_v38 = vpack.i.bf16 %v4084_v49, %v4070_v22  ;;  %v2426_v1 = vunpack.i.h.bf16 %v4097_v27  ;;  %vm4541_vm2 = vmmov %vm4525_vm0 }
 0x30f   :  { %v1228_v40 = vpack.c.bf16 %v1216_v62, %v1216_v62  ;;  %v1229_v7 = vpack.c.bf16 %v1215_v52, %v1215_v52  ;;  %v2425_v62 = vunpack.i.l.bf16 %v4097_v27 }
 0x311   :  { %2453 = vrot.lane.b32.xlu0 %v2452_v48, %s2484_s8  ;;  %v1488_v13 = vsel %vm4527_vm12, %v1228_v40, 0  ;;  %v1491_v12 = vsel %vm4528_vm1, %v1229_v7, 0  ;;  %vm4542_vm12 = vmmov %vm4525_vm0 }
 0x312   :  { %1523 = vmatpush.bf16.msra.mxu0 %v1488_v13  ;;  %1536 = vmatpush.bf16.msra.mxu1 %v1491_v12  ;;  %vm4543_vm1 = vmmov %vm4525_vm0 }
 0x313   :  { %v2394_v8 = vpop.permute.xlu0 %2393  ;;  %v4130_v24 = vpop.permute.xlu2 %2438 }
 0x314   :  { %v2395_v53 = vunpack.i.l.bf16 %v2394_v8  ;;  %v2399_v43 = vpop.permute.xlu1 %2398  ;;  %v2396_v5 = vunpack.i.h.bf16 %v2394_v8  ;;  %v2440_v52 = vunpack.i.l.bf16 %v4130_v24 }
 0x315   :  { %v2400_v44 = vunpack.i.l.bf16 %v2399_v43  ;;  %v2401_v40 = vunpack.i.h.bf16 %v2399_v43 }
 0x316   :  { %v1186_v14 = vsel %vm4529_vm6, %v2395_v53, %v2385_v30  ;;  %v1184_v16 = vsel %vm4532_vm13, %v2386_v31, %v2396_v5  ;;  %vm4546_vm13 = vmmov %vm4525_vm0 }
 0x317   :  { %v1219_v28 = vpack.c.bf16 %v3859_v60, %v1186_v14  ;;  %v1213_v47 = vsel %vm4530_vm8, %v2381_v10, %v2400_v44  ;;  %v1221_v10 = vpack.c.bf16 %v3851_v46, %v1184_v16  ;;  %vm4544_vm8 = vmmov %vm4529_vm6 }
 0x318   :  { %v1231_v26 = vpack.c.bf16 %v1213_v47, %v1213_v47 }
 0x319   :  { %2463 = vrot.lane.b32.xlu0 %v2462_v38, %s2485_s13  ;;  %1537 = vmatpush.bf16.msra.mxu1 %v1219_v28 }
 0x31a   :  { %v1497_v41 = vsel %vm4531_vm9, %v1231_v26, 0  ;;  %vm4545_vm9 = vmmov %vm4525_vm0 }
 0x31b   :  { %1562 = vmatpush.bf16.msra.mxu3 %v1497_v41  ;;  %v2414_v9 = vpop.permute.xlu0 %2413 }
 0x31c   :  { %v2416_v30 = vunpack.i.h.bf16 %v2414_v9  ;;  %v2415_v59 = vunpack.i.l.bf16 %v2414_v9  ;;  %v4110_v54 = vpop.permute.xlu1 %2403  ;;  %2073 = vmatmul.msk.bf16.vlgmr.msra.gmra.mxu1 %vm4533_vm11, %v4056_v58  ;;  %vm4547_vm11 = vcmask 1043456  }
 0x31d   :  { %v2405_v60 = vunpack.i.l.bf16 %v4110_v54  ;;  %v2406_v12 = vunpack.i.h.bf16 %v4110_v54  ;;  %v4225_v54 = vld [vmem:[%s4399_s3 + $0x8] sm:$0xf] }
 0x31e   :  { %v4118_v15 = vsel %vm4534_vm5, %v2415_v59, %v2416_v30  ;;  %v4122_v31 = vsel %vm4535_vm14, %v2411_v11, %v2415_v59  ;;  %v4128_v61 = vsel %vm4536_vm10, %v2416_v30, %v2375_v51  ;;  %v2441_v51 = vunpack.i.h.bf16 %v4130_v24  ;;  %vm4548_vm5 = vmmov %vm4547_vm11 }
 0x31f   :  { %1563 = vmatpush.bf16.msra.mxu3 %v1221_v10  ;;  %1721 = vrot.lane.b32.xlu2 %v4118_v15, %s2484_s8  ;;  %v2472_v46 = vpack.i.bf16 %v4128_v61, %v4118_v15  ;;  %v1187_v36 = vsel %vm4537_vm15, %v2405_v60, %v2395_v53  ;;  %v2467_v53 = vpack.i.bf16 %v4031_v39, %v4128_v61  ;;  %vm4549_vm14 = vmmov %vm4548_vm5 }
 0x320   :  { %1719 = vrot.lane.b32.xlu1 %v4122_v31, %s2484_s8  ;;  %v1218_v37 = vpack.c.bf16 %v3863_v4, %v1187_v36  ;;  %v1208_v14 = vsel %vm4540_vm7, %v2425_v62, %v2441_v51  ;;  %v1217_v59 = vsel %vm4545_vm9, %v2441_v51, %v2390_v21  ;;  %v1735_v10 = vsel %vm4546_vm13, %v2426_v1, %v2440_v52  ;;  %vm4550_vm10 = vmmov %vm4548_vm5 }
 0x321   :  { %2473 = vrot.lane.b32.xlu0 %v2472_v46, %s2485_s13  ;;  %vm4551_vm15 = vmmov %vm4529_vm6  ;;  %v1236_v51 = vpack.c.bf16 %v1208_v14, %v1208_v14 }
 0x322   :  { %1524 = vmatpush.bf16.msra.mxu0 %v1218_v37  ;;  %2075 = vmatmul.msk.bf16.vlgmr.msra.gmra.mxu3 %vm4538_vm3, %v4056_v58  ;;  %vm4552_vm3 = vmmov %vm4529_vm6 }
 0x323   :  { %v2429_v11 = vpop.permute.xlu0 %2428  ;;  %vm4561_vm9 = vmmov %vm4552_vm3 }
 0x324   :  { %v2419_v48 = vpop.permute.xlu1 %2418  ;;  %v2431_v7 = vunpack.i.h.bf16 %v2429_v11  ;;  %v2430_v8 = vunpack.i.l.bf16 %v2429_v11  ;;  %v1237_v11 = vpack.c.bf16 %v1217_v59, %v1217_v59  ;;  %vm4562_vm13 = vmmov %vm4552_vm3 }
 0x325   :  { %v2421_v13 = vunpack.i.h.bf16 %v2419_v48  ;;  %v2420_v4 = vunpack.i.l.bf16 %v2419_v48  ;;  %2072 = vmatmul.msk.bf16.vlgmr.msra.gmra.mxu0 %vm4539_vm4, %v4056_v58  ;;  %vm4553_vm4 = vmmov %vm4548_vm5 }
 0x326   :  { %v1183_v30 = vsel %vm4529_vm6, %v2396_v5, %v2431_v7  ;;  %v1181_v25 = vsel %vm4551_vm15, %v2406_v12, %v2430_v8  ;;  %vm4554_vm7 = vmmov %vm4553_vm4 }
 0x327   :  { %v1212_v38 = vsel %vm4525_vm0, %v2400_v44, %v2421_v13  ;;  %v1211_v43 = vsel %vm4541_vm2, %v2421_v13, %v2401_v40  ;;  %v1210_v28 = vsel %vm4542_vm12, %v2401_v40, %v2420_v4  ;;  %v1209_v47 = vsel %vm4543_vm1, %v2420_v4, %v2425_v62  ;;  %vm4555_vm0 = vmmov %vm4553_vm4 }
 0x328   :  { %2468 = vrot.lane.b32.xlu1 %v2467_v53, %s2484_s8  ;;  %v1232_v26 = vpack.c.bf16 %v1212_v38, %v1212_v38  ;;  %v1233_v41 = vpack.c.bf16 %v1211_v43, %v1211_v43  ;;  %v1234_v16 = vpack.c.bf16 %v1210_v28, %v1210_v28  ;;  %v1235_v9 = vpack.c.bf16 %v1209_v47, %v1209_v47  ;;  %vm4567_vm15 = vmmov %vm4555_vm0 }
 0x329   :  { %v1182_v44 = vsel %vm4544_vm8, %v2431_v7, %v2406_v12  ;;  %v1222_v48 = vpack.c.bf16 %v3890_v63, %v1183_v30  ;;  %v1747_v7 = vpack.c.bf16 %v1735_v10, %v1735_v10  ;;  %v1224_v13 = vpack.c.bf16 %v3898_v57, %v1181_v25  ;;  %vm4560_vm8 = vmmov %vm4552_vm3  ;;  %v1680_v30 = vpop.permute.xlu2 %1679 }
 0x32a   :  { %v1500_v46 = vsel %vm4547_vm11, %v1232_v26, 0  ;;  %v1503_v36 = vsel %vm4548_vm5, %v1233_v41, 0  ;;  %v1506_v5 = vsel %vm4549_vm14, %v1234_v16, 0  ;;  %v1509_v37 = vsel %vm4550_vm10, %v1235_v9, 0 }
 0x32b   :  { %1575 = vmatpush.bf16.msrb.mxu0 %v1500_v46  ;;  %1588 = vmatpush.bf16.msrb.mxu1 %v1503_v36  ;;  %v1223_v40 = vpack.c.bf16 %v3925_v42, %v1182_v44  ;;  %v1512_v12 = vsel %vm4553_vm4, %v1236_v51, 0  ;;  %v1515_v53 = vsel %vm4554_vm7, %v1237_v11, 0  ;;  %v1763_v42 = vsel %vm4555_vm0, %v1747_v7, 0 }
 0x32c   :  { %1601 = vmatpush.bf16.msrb.mxu2 %v1506_v5  ;;  %1614 = vmatpush.bf16.msrb.mxu3 %v1509_v37  ;;  %v2434_v21 = vpop.permute.xlu1 %2433  ;;  %vm4556_vm2 = vcmask 195584   ;;  %vm4566_vm10 = vcmp.lt.s32.totalorder %v2633_v32, 127  ;;  %v4246_v5 = vpop.f32.mrf.mxu3 }
 0x32d   :  { %v2435_v62 = vunpack.i.l.bf16 %v2434_v21  ;;  %vm4557_vm12 = vmmov %vm4556_vm2 }
 0x32e   :  { %vm4558_vm1 = vmmov %vm4556_vm2 }
 0x32f   :  { %1576 = vmatpush.bf16.msrb.mxu0 %v1222_v48  ;;  %1589 = vmatpush.bf16.msrb.mxu1 %v1223_v40  ;;  %v1180_v4 = vsel %vm4552_vm3, %v2430_v8, %v2435_v62  ;;  %v2436_v8 = vunpack.i.h.bf16 %v2434_v21  ;;  %vm4559_vm6 = vmmov %vm4558_vm1  ;;  %v1389_v21 = vpop.f32.mrf.mxu0  ;;  %v4252_v40 = vpop.f32.mrf.mxu1 }
 0x330   :  { %1602 = vmatpush.bf16.msrb.mxu2 %v1224_v13  ;;  %1689 = vrot.lane.b32.xlu1 %v4122_v31, %s2485_s13  ;;  %v1225_v63 = vpack.c.bf16 %v3962_v45, %v1180_v4  ;;  %vm4563_vm11 = vmmov %vm4558_vm1 }
 0x331   :  { %vm4564_vm5 = vmmov %vm4558_vm1  ;;  %v1705_v37 = vsel %vm4552_vm3, %v2436_v8, %v1680_v30 }
 0x332   :  { %1615 = vmatpush.bf16.msrb.mxu3 %v1225_v63  ;;  %2077 = vmatmul.msk.bf16.vlgmr.msrb.gmra.mxu1 %vm4557_vm12, %v4056_v58  ;;  %vm4565_vm14 = vmmov %vm4558_vm1  ;;  %v1738_v24 = vpack.c.bf16 %v4016_v34, %v1705_v37 }
 0x333   :  { %1627 = vmatpush.bf16.msra.mxu0 %v1512_v12  ;;  %1640 = vmatpush.bf16.msra.mxu1 %v1515_v53  ;;  %vm4568_vm4 = vmmov %vm4566_vm10 }
 0x334   :  { %1798 = vmatpush.bf16.msra.mxu2 %v1763_v42  ;;  %v4201_v57 = vpop.permute.xlu1 %2448  ;;  %vm4569_vm7 = vmmov %vm4568_vm4 }
 0x335   :  { %2078 = vmatmul.msk.bf16.vlgmr.msrb.gmra.mxu2 %vm4556_vm2, %v4056_v58  ;;  %v2451_v14 = vunpack.i.h.bf16 %v4201_v57  ;;  %v2450_v38 = vunpack.i.l.bf16 %v4201_v57  ;;  %2076 = vmatmul.msk.bf16.vlgmr.msrb.gmra.mxu0 %vm4558_vm1, %v4056_v58  ;;  %vm4570_vm0 = vmmov %vm4568_vm4 }
 0x336   :  { %2079 = vmatmul.msk.bf16.vlgmr.msrb.gmra.mxu3 %vm4559_vm6, %v4056_v58  ;;  %vm4571_vm2 = vmmov %vm4558_vm1 }
 0x337   :  { %v1179_v45 = vsel %vm4560_vm8, %v2435_v62, %v2451_v14  ;;  %v1178_v43 = vsel %vm4561_vm9, %v2451_v14, %v2405_v60  ;;  %v1706_v28 = vsel %vm4562_vm13, %v2450_v38, %v2436_v8  ;;  %v1378_v14 = vpop.f32.mrf.mxu3  ;;  %vm4572_vm12 = vmmov %vm4567_vm15 }
 0x338   :  { %v1226_v47 = vpack.c.bf16 %v3951_v0, %v1179_v45  ;;  %v1227_v26 = vpack.c.bf16 %v3921_v50, %v1178_v43  ;;  %v1737_v41 = vpack.c.bf16 %v3958_v35, %v1706_v28  ;;  %v1127_v50 = vld [vmem:[%s4400_s4] sm:$0xff]  ;;  %v4234_v0 = vpop.f32.mrf.mxu2  ;;  %vm4573_vm1 = vmmov %vm4572_vm12 }
 0x339   :  { %1934 = vperm.xlu2 %2477, %v1127_v50   ;;  %vm4574_vm6 = vmmov %vm4573_vm1 }
 0x33a   :  { %1628 = vmatpush.bf16.msra.mxu0 %v1226_v47  ;;  %1641 = vmatpush.bf16.msra.mxu1 %v1227_v26  ;;  %vm4575_vm8 = vmmov %vm4552_vm3  ;;  %v1391_v26 = vpop.f32.mrf.mxu0 }
 0x33b   :  { %1799 = vmatpush.bf16.msra.mxu2 %v1737_v41  ;;  %vm4576_vm9 = vmmov %vm4552_vm3 }
 0x33c   :  { %vm4577_vm13 = vmmov %vm4552_vm3 }
 0x33d   :  { %vm4583_vm3 = vmmov %vm4573_vm1 }
 0x340   :  { %v1365_v35 = vpop.f32.mrf.mxu2 }
 0x341   :  { %v1404_v35 = vpop.f32.mrf.mxu1 }
 0x342   :  { %2081 = vmatmul.msk.bf16.vlgmr.msra.gmra.mxu1 %vm4564_vm5, %v4056_v58  ;;  %vm4579_vm5 = vmmov %vm4570_vm0 }
 0x345   :  { %2083 = vmatmul.msk.bf16.vlgmr.msra.gmra.mxu2 %vm4563_vm11, %v4225_v54  ;;  %2080 = vmatmul.msk.bf16.vlgmr.msra.gmra.mxu0 %vm4565_vm14, %v4056_v58  ;;  %vm4578_vm11 = vmmov %vm4571_vm2 }
 0x346   :  { %vm4580_vm14 = vmmov %vm4570_vm0 }
 0x348   :  { %v4238_v60 = vpop.f32.mrf.mxu2 }
 0x350   :  { %v1417_v16 = vpop.f32.mrf.mxu2 }
 0x358   :  { %v4240_v9 = vpop.f32.mrf.mxu2 }
 0x360   :  { %v1469_v36 = vpop.f32.mrf.mxu2 }
 0x363   :  { %v2459_v25 = vpop.permute.xlu2 %2458 }
 0x364   :  { %v2460_v7 = vunpack.i.l.bf16 %v2459_v25 }
 0x379   :  { %v1722_v37 = vpop.permute.xlu2 %1721 }
 0x37b   :  { %v2444_v44 = vpop.permute.xlu0 %2443 }
 0x37c   :  { %v2445_v59 = vunpack.i.l.bf16 %v2444_v44  ;;  %v2446_v11 = vunpack.i.h.bf16 %v2444_v44 }
 0x37e   :  { %v1734_v10 = vsel %vm4566_vm10, %v2440_v52, %v2445_v59  ;;  %v2461_v52 = vunpack.i.h.bf16 %v2459_v25  ;;  %vm4581_vm10 = vmmov %vm4571_vm2 }
 0x37f   :  { %v1748_v46 = vpack.c.bf16 %v1734_v10, %v1734_v10 }
 0x380   :  { %v1702_v28 = vsel %vm4575_vm8, %v2460_v7, %v2461_v52 }
 0x381   :  { %v1766_v58 = vsel %vm4567_vm15, %v1748_v46, 0  ;;  %v1741_v16 = vpack.c.bf16 %v4062_v20, %v1702_v28  ;;  %v4280_v20 = vpop.f32.mrf.mxu0  ;;  %vm4582_vm15 = vmmov %vm4571_vm2 }
 0x382   :  { %1811 = vmatpush.bf16.msra.mxu3 %v1766_v58  ;;  %v4276_v58 = vpop.f32.mrf.mxu3 }
 0x383   :  { %v2454_v51 = vpop.permute.xlu0 %2453 }
 0x384   :  { %v2456_v62 = vunpack.i.h.bf16 %v2454_v51  ;;  %v2455_v48 = vunpack.i.l.bf16 %v2454_v51 }
 0x386   :  { %1812 = vmatpush.bf16.msra.mxu3 %v1738_v24  ;;  %v1733_v13 = vsel %vm4568_vm4, %v2445_v59, %v2456_v62  ;;  %v1732_v4 = vsel %vm4569_vm7, %v2456_v62, %v2446_v11  ;;  %v1731_v12 = vsel %vm4570_vm0, %v2446_v11, %v2455_v48  ;;  %v4290_v11 = vpop.f32.mrf.mxu1  ;;  %vm4584_vm4 = vmmov %vm4573_vm1 }
 0x387   :  { %v1749_v53 = vpack.c.bf16 %v1733_v13, %v1733_v13  ;;  %v1750_v63 = vpack.c.bf16 %v1732_v4, %v1732_v4  ;;  %v1751_v42 = vpack.c.bf16 %v1731_v12, %v1731_v12  ;;  %v1552_v8 = vpop.f32.mrf.mxu2  ;;  %vm4585_vm7 = vmmov %vm4575_vm8 }
 0x388   :  { %v4267_v47 = vadd.f32 %v1552_v8, %v1389_v21  ;;  %vm4590_vm8 = vmmov %vm4583_vm3 }
 0x389   :  { %2084 = vmatmul.msk.bf16.vlgmr.msra.gmra.mxu3 %vm4571_vm2, %v4225_v54  ;;  %v1769_v34 = vsel %vm4572_vm12, %v1749_v53, 0  ;;  %v1772_v45 = vsel %vm4573_vm1, %v1750_v63, 0  ;;  %v1775_v43 = vsel %vm4574_vm6, %v1751_v42, 0  ;;  %v1443_v53 = vpop.f32.mrf.mxu0  ;;  %vm4586_vm2 = vmmov %vm4570_vm0 }
 0x38a   :  { %1824 = vmatpush.bf16.msrb.mxu0 %v1769_v34  ;;  %1837 = vmatpush.bf16.msrb.mxu1 %v1772_v45  ;;  %vm4587_vm12 = vmmov %vm4570_vm0 }
 0x38b   :  { %1850 = vmatpush.bf16.msrb.mxu2 %v1775_v43  ;;  %v2464_v41 = vpop.permute.xlu0 %2463  ;;  %vm4588_vm1 = vmmov %vm4581_vm10 }
 0x38c   :  { %v2465_v50 = vunpack.i.l.bf16 %v2464_v41  ;;  %v2466_v25 = vunpack.i.h.bf16 %v2464_v41  ;;  %vm4589_vm6 = vmmov %vm4583_vm3 }
 0x38e   :  { %v1704_v44 = vsel %vm4576_vm9, %v1680_v30, %v2465_v50  ;;  %v1703_v59 = vsel %vm4577_vm13, %v2465_v50, %v2460_v7  ;;  %v1701_v7 = vsel %vm4585_vm7, %v2461_v52, %v2466_v25  ;;  %v1456_v34 = vpop.f32.mrf.mxu1  ;;  %vm4591_vm9 = vmmov %vm4583_vm3 }
 0x38f   :  { %1851 = vmatpush.bf16.msrb.mxu2 %v1741_v16  ;;  %v1739_v10 = vpack.c.bf16 %v4070_v22, %v1704_v44  ;;  %v1740_v46 = vpack.c.bf16 %v4066_v56, %v1703_v59  ;;  %v1554_v36 = vpop.f32.mrf.mxu2  ;;  %v1742_v4 = vpack.c.bf16 %v4084_v49, %v1701_v7  ;;  %vm4592_vm13 = vmmov %vm4585_vm7 }
 0x391   :  { %1825 = vmatpush.bf16.msrb.mxu0 %v1739_v10  ;;  %1838 = vmatpush.bf16.msrb.mxu1 %v1740_v46 }
 0x392   :  { %v1720_v21 = vpop.permute.xlu1 %1719  ;;  %2087 = vmatmul.msk.bf16.vlgmr.msrb.gmra.mxu2 %vm4578_vm11, %v4225_v54  ;;  %vm4593_vm11 = vmmov %vm4585_vm7 }
 0x393   :  { %v1729_v30 = vsel %vm4579_vm5, %v1720_v21, %v1722_v37  ;;  %v1730_v22 = vsel %vm4580_vm14, %v2455_v48, %v1720_v21  ;;  %v1430_v48 = vpop.f32.mrf.mxu3  ;;  %v2474_v13 = vpop.permute.xlu0 %2473  ;;  %vm4594_vm5 = vmmov %vm4585_vm7 }
 0x394   :  { %v1752_v56 = vpack.c.bf16 %v1730_v22, %v1730_v22  ;;  %v1753_v51 = vpack.c.bf16 %v1729_v30, %v1729_v30  ;;  %2085 = vmatmul.msk.bf16.vlgmr.msrb.gmra.mxu0 %vm4581_vm10, %v4225_v54  ;;  %2086 = vmatmul.msk.bf16.vlgmr.msrb.gmra.mxu1 %vm4582_vm15, %v4225_v54  ;;  %v2476_v8 = vunpack.i.h.bf16 %v2474_v13  ;;  %v2475_v14 = vunpack.i.l.bf16 %v2474_v13  ;;  %vm4595_vm14 = vmmov %vm4594_vm5  ;;  %v4346_v34 = vpop.permute.xlu2 %1934 }
 0x395   :  { %vm4596_vm10 = vmmov %vm4588_vm1 }
 0x396   :  { %v1778_v62 = vsel %vm4583_vm3, %v1752_v56, 0  ;;  %v1781_v24 = vsel %vm4584_vm4, %v1753_v51, 0  ;;  %v1698_v16 = vsel %vm4592_vm13, %v2475_v14, %v2476_v8  ;;  %v1697_v27 = vsel %vm4593_vm11, %v2476_v8, %v2450_v38  ;;  %vm4597_vm15 = vmmov %vm4588_vm1 }
 0x397   :  { %1863 = vmatpush.bf16.msrb.mxu3 %v1778_v62  ;;  %1876 = vmatpush.bf16.msra.mxu0 %v1781_v24  ;;  %v1745_v36 = vpack.c.bf16 %v4128_v61, %v1698_v16  ;;  %v1746_v57 = vpack.c.bf16 %v4031_v39, %v1697_v27  ;;  %vm4598_vm3 = vmmov %vm4588_vm1 }
 0x398   :  { %vm4599_vm4 = vmmov %vm4588_vm1 }
 0x399   :  { %v1539_v30 = vpop.f32.mrf.mxu1 }
 0x39a   :  { %v2469_v12 = vpop.permute.xlu1 %2468  ;;  %v1540_v38 = vadd.f32 %v1539_v30, %v4246_v5 }
 0x39b   :  { %v2471_v63 = vunpack.i.h.bf16 %v2469_v12  ;;  %v2470_v42 = vunpack.i.l.bf16 %v2469_v12  ;;  %1864 = vmatpush.bf16.msrb.mxu3 %v1742_v4  ;;  %v1480_v44 = vpop.f32.mrf.mxu3 }
 0x39d   :  { %v1728_v45 = vsel %vm4570_vm0, %v1722_v37, %v2470_v42  ;;  %v1727_v52 = vsel %vm4586_vm2, %v2470_v42, %v2471_v63  ;;  %v1736_v43 = vsel %vm4587_vm12, %v2471_v63, %v2426_v1 }
 0x39e   :  { %2088 = vmatmul.msk.bf16.vlgmr.msrb.gmra.mxu3 %vm4588_vm1, %v4225_v54  ;;  %v1754_v49 = vpack.c.bf16 %v1728_v45, %v1728_v45  ;;  %v1755_v28 = vpack.c.bf16 %v1727_v52, %v1727_v52  ;;  %v1756_v26 = vpack.c.bf16 %v1736_v43, %v1736_v43 }
 0x3a0   :  { %v1784_v41 = vsel %vm4589_vm6, %v1754_v49, 0  ;;  %v1787_v50 = vsel %vm4590_vm8, %v1755_v28, 0  ;;  %v1790_v35 = vsel %vm4591_vm9, %v1756_v26, 0 }
 0x3a1   :  { %1889 = vmatpush.bf16.msra.mxu1 %v1784_v41  ;;  %1902 = vmatpush.bf16.msra.mxu2 %v1787_v50 }
 0x3a2   :  { %1915 = vmatpush.bf16.msra.mxu3 %v1790_v35  ;;  %v1690_v1 = vpop.permute.xlu1 %1689  ;;  %v1526_v59 = vpop.f32.mrf.mxu0 }
 0x3a3   :  { %v1699_v10 = vsel %vm4594_vm5, %v1690_v1, %v2475_v14  ;;  %v1700_v46 = vsel %vm4595_vm14, %v2466_v25, %v1690_v1  ;;  %v1482_v32 = vpop.f32.mrf.mxu3 }
 0x3a4   :  { %v1743_v37 = vpack.c.bf16 %v4122_v31, %v1700_v46  ;;  %v1744_v21 = vpack.c.bf16 %v4118_v15, %v1699_v10  ;;  %v1541_v31 = vpop.f32.mrf.mxu1 }
 0x3a5   :  { %1903 = vmatpush.bf16.msra.mxu2 %v1745_v36 }
 0x3a6   :  { %1916 = vmatpush.bf16.msra.mxu3 %v1746_v57  ;;  %1877 = vmatpush.bf16.msra.mxu0 %v1743_v37 }
 0x3a7   :  { %1890 = vmatpush.bf16.msra.mxu1 %v1744_v21 }
 0x3a8   :  { %2091 = vmatmul.msk.bf16.vlgmr.msra.gmra.mxu2 %vm4596_vm10, %v4225_v54 }
 0x3a9   :  { %2089 = vmatmul.msk.bf16.vlgmr.msra.gmra.mxu0 %vm4597_vm15, %v4225_v54 }
 0x3aa   :  { %2090 = vmatmul.msk.bf16.vlgmr.msra.gmra.mxu1 %vm4598_vm3, %v4225_v54  ;;  %v1528_v15 = vpop.f32.mrf.mxu0 }
 0x3ab   :  { %v1565_v39 = vpop.f32.mrf.mxu3 }
 0x3ac   :  { %v1566_v61 = vadd.f32 %v1565_v39, %v4252_v40  ;;  %v1527_v40 = vadd.f32 %v1526_v59, %v4234_v0 }
 0x3ae   :  { %2092 = vmatmul.msk.bf16.vlgmr.msra.gmra.mxu3 %vm4599_vm4, %v4225_v54 }
 0x3af   :  { %v1591_v25 = vpop.f32.mrf.mxu1 }
 0x3b0   :  { %v1592_v22 = vadd.f32 %v1591_v25, %v4276_v58 }
 0x3b2   :  { %v1578_v5 = vpop.f32.mrf.mxu0 }
 0x3b3   :  { %v1567_v62 = vpop.f32.mrf.mxu3  ;;  %v1579_v1 = vadd.f32 %v1578_v5, %v4238_v60 }
 0x3b7   :  { %v1593_v7 = vpop.f32.mrf.mxu1 }
 0x3b8   :  { %v1604_v56 = vpop.f32.mrf.mxu2 }
 0x3b9   :  { %v4336_v51 = vadd.f32 %v1604_v56, %v4280_v20 }
 0x3ba   :  { %v1580_v24 = vpop.f32.mrf.mxu0 }
 0x3bb   :  { %v1617_v13 = vpop.f32.mrf.mxu3 }
 0x3bc   :  { %v4339_v4 = vadd.f32 %v1617_v13, %v4290_v11 }
 0x3bf   :  { %v1643_v12 = vpop.f32.mrf.mxu1 }
 0x3c0   :  { %v1606_v48 = vpop.f32.mrf.mxu2  ;;  %v4344_v53 = vadd.f32 %v1643_v12, %v1480_v44 }
 0x3c2   :  { %v4341_v54 = vpop.f32.mrf.mxu0 }
 0x3c3   :  { %v1619_v42 = vpop.f32.mrf.mxu3 }
 0x3c7   :  { %v1645_v8 = vpop.f32.mrf.mxu1 }
 0x3c8   :  { %v1801_v58 = vpop.f32.mrf.mxu2 }
 0x3c9   :  { %v1922_v63 = vadd.f32 %v1801_v58, %v1527_v40 }
 0x3ca   :  { %v1632_v20 = vpop.f32.mrf.mxu0 }
 0x3cb   :  { %v1937_v45 = vadd.f32 %v4346_v34, %v1922_v63 }
 0x3cd   :  { %v1947_v49 = vmul.f32 %v3453_v18, %v1937_v45 }
 0x3cf   :  { %v1978_v44 = vmul.f32 %v1947_v49, %v1947_v49 }
 0x3d0   :  { %v1803_v14 = vpop.f32.mrf.mxu2 }
 0x3d1   :  { %v1631_v14 = vadd.f32 %v4341_v54, %v4240_v9 }
 0x40c   :  { %v1814_v52 = vpop.f32.mrf.mxu3 }
 0x40d   :  { %v1923_v11 = vadd.f32 %v1814_v52, %v1540_v38 }
 0x40f   :  { %v1938_v43 = vadd.f32 %v4346_v34, %v1923_v11 }
 0x411   :  { %v1948_v0 = vmul.f32 %v3446_v55, %v1938_v43  ;;  %v1827_v28 = vpop.f32.mrf.mxu0  ;;  %v1840_v26 = vpop.f32.mrf.mxu1 }
 0x412   :  { %v1924_v41 = vadd.f32 %v1827_v28, %v4267_v47  ;;  %v1925_v50 = vadd.f32 %v1840_v26, %v1566_v61 }
 0x413   :  { %v1957_v35 = vpack.c.bf16 %v1948_v0, %v1947_v49  ;;  %v1967_v16 = vadd.f32 %v1948_v0, %v1947_v49  ;;  %v1979_v27 = vmul.f32 %v1948_v0, %v1948_v0 }
 0x414   :  { %v1939_v59 = vadd.f32 %v4346_v34, %v1924_v41  ;;  %v1940_v10 = vadd.f32 %v4346_v34, %v1925_v50  ;;  %v1816_v46 = vpop.f32.mrf.mxu3 }
 0x415   :  { %1962 = vst [vmem:[%s4401_s5] sm:$0xff] %v1957_v35  ;;  %v1988_v55 = vadd.f32 %v1979_v27, %v1978_v44  ;;  %v1853_v18 = vpop.f32.mrf.mxu2 }
 0x416   :  { %v1949_v47 = vmul.f32 %v3611_v29, %v1939_v59  ;;  %v1950_v36 = vmul.f32 %v3650_v23, %v1940_v10  ;;  %v1926_v37 = vadd.f32 %v1853_v18, %v1579_v1 }
 0x418   :  { %v1968_v21 = vadd.f32 %v1967_v16, %v1949_v47  ;;  %v1980_v57 = vmul.f32 %v1949_v47, %v1949_v47  ;;  %v1958_v30 = vpack.c.bf16 %v1950_v36, %v1949_v47  ;;  %v1941_v60 = vadd.f32 %v4346_v34, %v1926_v37 }
 0x419   :  { %v1829_v38 = vpop.f32.mrf.mxu0  ;;  %v1842_v32 = vpop.f32.mrf.mxu1  ;;  %v1981_v39 = vmul.f32 %v1950_v36, %v1950_v36 }
 0x41a   :  { %v1989_v15 = vadd.f32 %v1988_v55, %v1980_v57  ;;  %1963 = vst [vmem:[%s4401_s5 + $0x8] sm:$0xff] %v1958_v30  ;;  %v1969_v31 = vadd.f32 %v1968_v21, %v1950_v36  ;;  %v1951_v61 = vmul.f32 %v3600_v17, %v1941_v60 }
 0x41c   :  { %v1990_v29 = vadd.f32 %v1989_v15, %v1981_v39  ;;  %v1970_v5 = vadd.f32 %v1969_v31, %v1951_v61  ;;  %v1982_v23 = vmul.f32 %v1951_v61, %v1951_v61 }
 0x41d   :  { %v1855_v25 = vpop.f32.mrf.mxu2 }
 0x41e   :  { %v1991_v56 = vadd.f32 %v1990_v29, %v1982_v23 }
 0x421   :  { %v1866_v62 = vpop.f32.mrf.mxu3 }
 0x422   :  { %v1927_v24 = vadd.f32 %v1866_v62, %v1592_v22 }
 0x424   :  { %v1942_v7 = vadd.f32 %v4346_v34, %v1927_v24 }
 0x426   :  { %v1952_v48 = vmul.f32 %v3728_v2, %v1942_v7  ;;  %v1879_v13 = vpop.f32.mrf.mxu0 }
 0x427   :  { %v1928_v12 = vadd.f32 %v1879_v13, %v4336_v51  ;;  %v1892_v40 = vpop.f32.mrf.mxu1 }
 0x428   :  { %v1959_v58 = vpack.c.bf16 %v1952_v48, %v1951_v61  ;;  %v1971_v63 = vadd.f32 %v1970_v5, %v1952_v48  ;;  %v1983_v42 = vmul.f32 %v1952_v48, %v1952_v48  ;;  %v1929_v17 = vadd.f32 %v1892_v40, %v4339_v4 }
 0x429   :  { %v1943_v20 = vadd.f32 %v4346_v34, %v1928_v12  ;;  %v1868_v8 = vpop.f32.mrf.mxu3 }
 0x42a   :  { %1964 = vst [vmem:[%s4401_s5 + $0x10] sm:$0xff] %v1959_v58  ;;  %v1944_v2 = vadd.f32 %v4346_v34, %v1929_v17  ;;  %v1992_v22 = vadd.f32 %v1991_v56, %v1983_v42 }
 0x42b   :  { %v1953_v51 = vmul.f32 %v3754_v3, %v1943_v20  ;;  %v1905_v45 = vpop.f32.mrf.mxu2 }
 0x42c   :  { %v1954_v52 = vmul.f32 %v3773_v19, %v1944_v2  ;;  %v1930_v11 = vadd.f32 %v1905_v45, %v1631_v14 }
 0x42d   :  { %v1984_v4 = vmul.f32 %v1953_v51, %v1953_v51  ;;  %v1972_v43 = vadd.f32 %v1971_v63, %v1953_v51 }
 0x42e   :  { %v1960_v49 = vpack.c.bf16 %v1954_v52, %v1953_v51  ;;  %v1945_v0 = vadd.f32 %v4346_v34, %v1930_v11  ;;  %v1881_v28 = vpop.f32.mrf.mxu0  ;;  %v1985_v26 = vmul.f32 %v1954_v52, %v1954_v52 }
 0x42f   :  { %v1894_v9 = vpop.f32.mrf.mxu1  ;;  %v1973_v54 = vadd.f32 %v1972_v43, %v1954_v52  ;;  %v1993_v41 = vadd.f32 %v1992_v22, %v1984_v4 }
 0x430   :  { %1965 = vst [vmem:[%s4401_s5 + $0x18] sm:$0xff] %v1960_v49  ;;  %v1955_v3 = vmul.f32 %v3743_v6, %v1945_v0 }
 0x431   :  { %v1918_v50 = vpop.f32.mrf.mxu3  ;;  %v1994_v35 = vadd.f32 %v1993_v41, %v1985_v26 }
 0x432   :  { %v1931_v19 = vadd.f32 %v1918_v50, %v4344_v53  ;;  %v1974_v16 = vadd.f32 %v1973_v54, %v1955_v3  ;;  %v1986_v44 = vmul.f32 %v1955_v3, %v1955_v3 }
 0x433   :  { %v1907_v27 = vpop.f32.mrf.mxu2 }
 0x434   :  { %v1946_v1 = vadd.f32 %v4346_v34, %v1931_v19  ;;  %v1995_v59 = vadd.f32 %v1994_v35, %v1986_v44 }
 0x436   :  { %v1956_v10 = vmul.f32 %v3608_v33, %v1946_v1 }
 0x438   :  { %v1961_v46 = vpack.c.bf16 %v1956_v10, %v1955_v3  ;;  %v1975_v55 = vadd.f32 %v1974_v16, %v1956_v10  ;;  %v1987_v18 = vmul.f32 %v1956_v10, %v1956_v10 }
 0x439   :  { %v1920_v47 = vpop.f32.mrf.mxu3 }
 0x43a   :  { %1966 = vst [vmem:[%s4401_s5 + $0x20] sm:$0xff] %v1961_v46  ;;  %1976 = vadd.xlane.f32.xlu0 %v1975_v55  ;;  %v1996_v6 = vadd.f32 %v1995_v59, %v1987_v18 }
 0x43c   :  { %1997 = vadd.xlane.f32.xlu1 %v1996_v6 }
 0x4ad   :  { %v1977_v53 = vpop.xlane.xlu0 %1976 }
 0x4ae   :  { %2001 = vperm.xlu2 %2477, %v1977_v53  }
 0x4af   :  { %v1998_v36 = vpop.xlane.xlu1 %1997 }
 0x4b6   :  { %2006 = vperm.xlu2 %2477, %v1998_v36  }
 0x508   :  { %v2002_v37 = vpop.permute.xlu2 %2001 }
 0x509   :  { %2009 = vst [vmem:[%s4402_s6] sm:$0xff] %v2002_v37 }
 0x510   :  { %v2007_v33 = vpop.permute.xlu2 %2006 }
 0x511   :  { %2010 = vst [vmem:[%s4402_s6 + $0x8] sm:$0xff] %v2007_v33 }

</bundles_post_ra>
